<compile_context>
chip_gen: v7x
topology: tpu7x:2x2x1
jax: 0.10.0
libtpu: 0.0.40
codegen_flags: <defaults>
</compile_context>

<pallas_src>
import math
import jax
import jax.numpy as jnp
from jax import lax
from jax.experimental import pallas as pl
from jax.experimental.pallas import tpu as pltpu

INPUT_DIM = 14
MODEL_DIM = 128
N_HEADS = 8
HEAD_DIM = MODEL_DIM // N_HEADS
FF_DIM = 2048          # nn.TransformerEncoderLayer default dim_feedforward
N_LAYERS = 6
LN_EPS = 1e-5          # nn.TransformerEncoderLayer default layer_norm_eps


# ------------------------------ kernel ---------------------------------------

def _layernorm(x, w, b):
    mu = jnp.mean(x, axis=-1, keepdims=True)
    var = jnp.mean((x - mu) ** 2, axis=-1, keepdims=True)
    return (x - mu) * lax.rsqrt(var + LN_EPS) * w + b


def _swe_fused_kernel(x_ref, we_ref, be_ref, mask_ref,
                      wqkv_ref, bqkv_ref, wo_ref, bo_ref,
                      ln1w_ref, ln1b_ref, w1_ref, b1_ref,
                      w2_ref, b2_ref, ln2w_ref, ln2b_ref,
                      fcw_ref, fcb_ref,
                      y_ref, h_ref):
    l = pl.program_id(0)

    # ---- prologue (grid step 0 only): embed + positional encoding -----------
    @pl.when(l == 0)
    def _():
        x = x_ref[...]                                           # (S, INPUT_DIM)
        h_ref[...] = (jnp.dot(x.astype(jnp.bfloat16), we_ref[...],
                              preferred_element_type=jnp.float32)
                      + be_ref[...])                             # PE row folded into bias

    h = h_ref[...]                                               # (S, D) f32, VMEM-resident
    seq = h.shape[0]

    # ---- multi-head self-attention (all heads via block-diagonal head mask) --
    qkv = (jnp.dot(h.astype(jnp.bfloat16), wqkv_ref[...],
                   preferred_element_type=jnp.float32) + bqkv_ref[...])   # (S, 3D)
    scale = 1.0 / math.sqrt(HEAD_DIM)
    q = qkv[:, 0:MODEL_DIM] * scale
    k = qkv[:, MODEL_DIM:2 * MODEL_DIM]
    v = qkv[:, 2 * MODEL_DIM:3 * MODEL_DIM]

    mask = mask_ref[...]                                         # (H*S, D) block-diag per head
    q_big = jnp.concatenate([q] * N_HEADS, axis=0) * mask        # (H*S, D)
    # scores[hh*S + i, j] = scale * <q_i, k_j> restricted to head hh's 16 dims
    s = lax.dot_general(q_big, k, (((1,), (1,)), ((), ())),
                        preferred_element_type=jnp.float32)      # (H*S, S)
    s = s - jnp.max(s, axis=-1, keepdims=True)
    p = jnp.exp(s)
    p = p * pl.reciprocal(jnp.sum(p, axis=-1, keepdims=True), approx=True)
    ctx = jnp.dot(p, v, preferred_element_type=jnp.float32) * mask        # (H*S, D)
    attn = ctx[0:seq, :]
    for hh in range(1, N_HEADS):                                 # combine heads (lane-dense adds)
        attn = attn + ctx[hh * seq:(hh + 1) * seq, :]            # (S, D)

    attn = (jnp.dot(attn.astype(jnp.bfloat16), wo_ref[...],
                    preferred_element_type=jnp.float32) + bo_ref[...])
    h1 = _layernorm(h + attn, ln1w_ref[...], ln1b_ref[...])      # post-norm (norm_first=False)

    # ---- feed-forward: linear1 -> relu -> linear2 ----------------------------
    hid = jnp.maximum(
        jnp.dot(h1.astype(jnp.bfloat16), w1_ref[...],
                preferred_element_type=jnp.float32) + b1_ref[...], 0.0)   # (S, FF_DIM)
    ff = (jnp.dot(hid.astype(jnp.bfloat16), w2_ref[...],
                  preferred_element_type=jnp.float32) + b2_ref[...])
    h2 = _layernorm(h1 + ff, ln2w_ref[...], ln2b_ref[...])
    h_ref[...] = h2

    # ---- epilogue (last grid step only): fc_out as VPU multiply + lane reduce -
    @pl.when(l == pl.num_programs(0) - 1)
    def _():
        y_ref[...] = jnp.sum(h2 * fcw_ref[...], axis=-1, keepdims=True) + fcb_ref[...]


# ------------------------------ host-side helpers -----------------------------

def positional_encoding_slice(seq_len_used, d_model):
    # Reproduces PositionalEncoding.pe[:x.size(1)].  With seq-first input and
    # batch dim 1 this is the position-0 row ([0,1,0,1,...]) broadcast over all
    # sequence positions (faithful to the PyTorch module's indexing).
    pos = jnp.arange(seq_len_used, dtype=jnp.float32)[:, None]
    div = jnp.exp(jnp.arange(0, d_model, 2, dtype=jnp.float32)
                  * (-math.log(10000.0) / d_model))
    pe = jnp.zeros((seq_len_used, d_model), jnp.float32)
    pe = pe.at[:, 0::2].set(jnp.sin(pos * div))
    pe = pe.at[:, 1::2].set(jnp.cos(pos * div))
    return pe                                                    # (seq_len_used, D)


def _make_head_mask(seq_len):
    # mask[h*S + q, d] = 1  iff  lane d belongs to head h  (block-diagonal).
    row_head = jnp.arange(N_HEADS * seq_len) // seq_len          # (H*S,)
    lane_head = jnp.arange(MODEL_DIM) // HEAD_DIM                # (D,)
    return (row_head[:, None] == lane_head[None, :]).astype(jnp.float32)


def make_params(key):
    f32, bf16 = jnp.float32, jnp.bfloat16

    def init(k, shape, scale=0.05):
        return (scale * jax.random.normal(k, shape)).astype(f32)

    keys = jax.random.split(key, 2 + N_LAYERS)
    params = {
        # weights pre-transposed to (in, out) so kernels compute x @ W
        "embed_w": init(keys[0], (INPUT_DIM, MODEL_DIM)).astype(bf16),
        "embed_b": jnp.zeros((1, MODEL_DIM), f32),
        "fc_w": init(keys[1], (1, MODEL_DIM)),                   # row vector for VPU reduce
        "fc_b": jnp.zeros((1, 1), f32),
    }

    acc = {n: [] for n in ("wqkv", "bqkv", "wo", "bo", "ln1w", "ln1b",
                           "w1", "b1", "w2", "b2", "ln2w", "ln2b")}
    for i in range(N_LAYERS):
        lk = jax.random.split(keys[2 + i], 8)
        acc["wqkv"].append(init(lk[0], (MODEL_DIM, 3 * MODEL_DIM)).astype(bf16))
        acc["bqkv"].append(init(lk[1], (1, 3 * MODEL_DIM), 0.02))
        acc["wo"].append(init(lk[2], (MODEL_DIM, MODEL_DIM)).astype(bf16))
        acc["bo"].append(init(lk[3], (1, MODEL_DIM), 0.02))
        acc["ln1w"].append(jnp.ones((1, MODEL_DIM), f32))
        acc["ln1b"].append(jnp.zeros((1, MODEL_DIM), f32))
        acc["w1"].append(init(lk[4], (MODEL_DIM, FF_DIM)).astype(bf16))
        acc["b1"].append(init(lk[5], (1, FF_DIM), 0.02))
        acc["w2"].append(init(lk[6], (FF_DIM, MODEL_DIM)).astype(bf16))
        acc["b2"].append(init(lk[7], (1, MODEL_DIM), 0.02))
        acc["ln2w"].append(jnp.ones((1, MODEL_DIM), f32))
        acc["ln2b"].append(jnp.zeros((1, MODEL_DIM), f32))
    # stack each per-layer weight with a leading layer axis
    params.update({n: jnp.stack(v, axis=0) for n, v in acc.items()})
    return params


# ------------------------------ forward ---------------------------------------

def swe_model_forward(x, params):
    # x: (S, B, INPUT_DIM), seq-first like nn.TransformerEncoder default.
    S, B, Din = x.shape
    assert B == 1 and Din == INPUT_DIM, "kernel implemented for batch dim == 1"
    x2 = x.reshape(S, Din).astype(jnp.float32)

    # pe[:x.size(1)] with B==1 -> constant position-0 row; fold into embed bias.
    pe = positional_encoding_slice(B, MODEL_DIM)                 # (1, D)
    embed_b_pe = params["embed_b"] + pe                          # (1, D)
    head_mask = _make_head_mask(S)                               # (H*S, D)

    def const_spec(shape):
        return pl.BlockSpec(shape, lambda l: (0, 0))

    def layer_spec(shape):                                       # leading layer dim squeezed
        return pl.BlockSpec((None,) + shape, lambda l: (l, 0, 0))

    in_specs = [
        const_spec((S, INPUT_DIM)),                 # x
        const_spec((INPUT_DIM, MODEL_DIM)),         # embed_w (bf16)
        const_spec((1, MODEL_DIM)),                 # embed_b + PE
        const_spec((N_HEADS * S, MODEL_DIM)),       # head mask
        layer_spec((MODEL_DIM, 3 * MODEL_DIM)),     # wqkv (bf16)
        layer_spec((1, 3 * MODEL_DIM)),             # bqkv
        layer_spec((MODEL_DIM, MODEL_DIM)),         # wo (bf16)
        layer_spec((1, MODEL_DIM)),                 # bo
        layer_spec((1, MODEL_DIM)),                 # ln1w
        layer_spec((1, MODEL_DIM)),                 # ln1b
        layer_spec((MODEL_DIM, FF_DIM)),            # w1 (bf16)
        layer_spec((1, FF_DIM)),                    # b1
        layer_spec((FF_DIM, MODEL_DIM)),            # w2 (bf16)
        layer_spec((1, MODEL_DIM)),                 # b2
        layer_spec((1, MODEL_DIM)),                 # ln2w
        layer_spec((1, MODEL_DIM)),                 # ln2b
        const_spec((1, MODEL_DIM)),                 # fc_w
        const_spec((1, 1)),                         # fc_b
    ]

    y = pl.pallas_call(
        _swe_fused_kernel,
        grid=(N_LAYERS,),
        in_specs=in_specs,
        out_specs=pl.BlockSpec((S, 1), lambda l: (0, 0)),
        out_shape=jax.ShapeDtypeStruct((S, 1), jnp.float32),
        scratch_shapes=[pltpu.VMEM((S, MODEL_DIM), jnp.float32)],  # resident activation
        compiler_params=pltpu.CompilerParams(
            dimension_semantics=("arbitrary",)),     # layers are sequential
    )(x2, params["embed_w"], embed_b_pe, head_mask,
      params["wqkv"], params["bqkv"], params["wo"], params["bo"],
      params["ln1w"], params["ln1b"], params["w1"], params["b1"],
      params["w2"], params["b2"], params["ln2w"], params["ln2b"],
      params["fc_w"], params["fc_b"])
    return y.reshape(S, B, 1)


# ------------------------------ main ------------------------------------------

if __name__ == "__main__":
    key = jax.random.PRNGKey(0)
    k_param, k_x = jax.random.split(key)
    params = make_params(k_param)

    S, B = 8, 1
    x = jax.random.normal(k_x, (S, B, INPUT_DIM), dtype=jnp.float32)

    fwd = jax.jit(swe_model_forward)
    out = jax.block_until_ready(fwd(x, params))

    assert out.shape == (S, B, 1)
    assert bool(jnp.all(jnp.isfinite(out)))
    print("KERNEL_OK")
</pallas_src>

<mosaic_0001>
module attributes {stable_mosaic.version = 11 : i64} {
  func.func @_swe_fused_kernel(%arg0: i32, %arg1: memref<8x14xf32, #tpu.memory_space<vmem>>, %arg2: memref<14x128xbf16, #tpu.memory_space<vmem>>, %arg3: memref<1x128xf32, #tpu.memory_space<vmem>>, %arg4: memref<64x128xf32, #tpu.memory_space<vmem>>, %arg5: memref<1x128x384xbf16, #tpu.memory_space<vmem>>, %arg6: memref<1x1x384xf32, #tpu.memory_space<vmem>>, %arg7: memref<1x128x128xbf16, #tpu.memory_space<vmem>>, %arg8: memref<1x1x128xf32, #tpu.memory_space<vmem>>, %arg9: memref<1x1x128xf32, #tpu.memory_space<vmem>>, %arg10: memref<1x1x128xf32, #tpu.memory_space<vmem>>, %arg11: memref<1x128x2048xbf16, #tpu.memory_space<vmem>>, %arg12: memref<1x1x2048xf32, #tpu.memory_space<vmem>>, %arg13: memref<1x2048x128xbf16, #tpu.memory_space<vmem>>, %arg14: memref<1x1x128xf32, #tpu.memory_space<vmem>>, %arg15: memref<1x1x128xf32, #tpu.memory_space<vmem>>, %arg16: memref<1x1x128xf32, #tpu.memory_space<vmem>>, %arg17: memref<1x128xf32, #tpu.memory_space<vmem>>, %arg18: memref<1x1xf32, #tpu.memory_space<vmem>>, %arg19: memref<8x1xf32, #tpu.memory_space<vmem>>, %arg20: memref<8x128xf32, #tpu.memory_space<vmem>>) attributes {dimension_semantics = [#tpu.dimension_semantics<arbitrary>], iteration_bounds = array<i64: 6>, scalar_prefetch = 0 : i64, scratch_operands = 1 : i64, tpu.core_type = #tpu.core_type<tc>, window_params = [{pipeline_mode = #tpu.pipeline_mode<synchronous>, transform_indices = @transform_0, window_bounds = array<i64: 8, 14>}, {pipeline_mode = #tpu.pipeline_mode<synchronous>, transform_indices = @transform_1, window_bounds = array<i64: 14, 128>}, {pipeline_mode = #tpu.pipeline_mode<synchronous>, transform_indices = @transform_2, window_bounds = array<i64: 1, 128>}, {pipeline_mode = #tpu.pipeline_mode<synchronous>, transform_indices = @transform_3, window_bounds = array<i64: 64, 128>}, {transform_indices = @transform_4, window_bounds = array<i64: 1, 128, 384>}, {transform_indices = @transform_5, window_bounds = array<i64: 1, 1, 384>}, {transform_indices = @transform_6, window_bounds = array<i64: 1, 128, 128>}, {transform_indices = @transform_7, window_bounds = array<i64: 1, 1, 128>}, {transform_indices = @transform_8, window_bounds = array<i64: 1, 1, 128>}, {transform_indices = @transform_9, window_bounds = array<i64: 1, 1, 128>}, {transform_indices = @transform_10, window_bounds = array<i64: 1, 128, 2048>}, {transform_indices = @transform_11, window_bounds = array<i64: 1, 1, 2048>}, {transform_indices = @transform_12, window_bounds = array<i64: 1, 2048, 128>}, {transform_indices = @transform_13, window_bounds = array<i64: 1, 1, 128>}, {transform_indices = @transform_14, window_bounds = array<i64: 1, 1, 128>}, {transform_indices = @transform_15, window_bounds = array<i64: 1, 1, 128>}, {pipeline_mode = #tpu.pipeline_mode<synchronous>, transform_indices = @transform_16, window_bounds = array<i64: 1, 128>}, {pipeline_mode = #tpu.pipeline_mode<synchronous>, transform_indices = @transform_17, window_bounds = array<i64: 1, 1>}, {pipeline_mode = #tpu.pipeline_mode<synchronous>, transform_indices = @transform_18, window_bounds = array<i64: 8, 1>}]} {
    %c0_i32 = arith.constant 0 : i32
    %0 = arith.cmpi eq, %arg0, %c0_i32 : i32
    %1 = arith.extui %0 : i1 to i32
    %c0_i32_0 = arith.constant 0 : i32
    %2 = arith.cmpi ne, %1, %c0_i32_0 : i32
    scf.if %2 {
      %c0_62 = arith.constant 0 : index
      %c0_63 = arith.constant 0 : index
      %132 = vector.load %arg1[%c0_62, %c0_63] : memref<8x14xf32, #tpu.memory_space<vmem>>, vector<8x14xf32>
      %133 = arith.truncf %132 : vector<8x14xf32> to vector<8x14xbf16>
      %c0_64 = arith.constant 0 : index
      %c0_65 = arith.constant 0 : index
      %134 = vector.load %arg2[%c0_64, %c0_65] : memref<14x128xbf16, #tpu.memory_space<vmem>>, vector<14x128xbf16>
      %cst_66 = arith.constant dense<0.000000e+00> : vector<8x128xf32>
      %135 = tpu.matmul %133, %134, %cst_66 {dimension_numbers = #tpu.dot_dimension_numbers<[1], [0], [0], [1], [0, 0, 1, 1], [], []>} : vector<8x14xbf16>, vector<14x128xbf16>, vector<8x128xf32> -> vector<8x128xf32>
      %c0_67 = arith.constant 0 : index
      %c0_68 = arith.constant 0 : index
      %136 = vector.load %arg3[%c0_67, %c0_68] : memref<1x128xf32, #tpu.memory_space<vmem>>, vector<1x128xf32>
      %137 = vector.broadcast %136 : vector<1x128xf32> to vector<8x128xf32>
      %138 = arith.addf %135, %137 : vector<8x128xf32>
      %c0_69 = arith.constant 0 : index
      %c0_70 = arith.constant 0 : index
      %139 = vector.load %arg20[%c0_69, %c0_70] : memref<8x128xf32, #tpu.memory_space<vmem>>, vector<8x128xf32>
      tpu.vector_store %arg20[%c0_69, %c0_70], %138 {strides = array<i32>} : memref<8x128xf32, #tpu.memory_space<vmem>>, vector<8x128xf32>,
    } else {
    }
    %c0 = arith.constant 0 : index
    %c0_1 = arith.constant 0 : index
    %3 = vector.load %arg20[%c0, %c0_1] : memref<8x128xf32, #tpu.memory_space<vmem>>, vector<8x128xf32>
    %4 = arith.truncf %3 : vector<8x128xf32> to vector<8x128xbf16>
    %c0_2 = arith.constant 0 : index
    %c0_3 = arith.constant 0 : index
    %c0_4 = arith.constant 0 : index
    %5 = vector.load %arg5[%c0_2, %c0_3, %c0_4] : memref<1x128x384xbf16, #tpu.memory_space<vmem>>, vector<1x128x384xbf16>
    %6 = vector.shape_cast %5 : vector<1x128x384xbf16> to vector<128x384xbf16>
    %cst = arith.constant dense<0.000000e+00> : vector<8x384xf32>
    %7 = tpu.matmul %4, %6, %cst {dimension_numbers = #tpu.dot_dimension_numbers<[1], [0], [0], [1], [0, 0, 1, 1], [], []>} : vector<8x128xbf16>, vector<128x384xbf16>, vector<8x384xf32> -> vector<8x384xf32>
    %c0_5 = arith.constant 0 : index
    %c0_6 = arith.constant 0 : index
    %c0_7 = arith.constant 0 : index
    %8 = vector.load %arg6[%c0_5, %c0_6, %c0_7] : memref<1x1x384xf32, #tpu.memory_space<vmem>>, vector<1x1x384xf32>
    %9 = vector.shape_cast %8 : vector<1x1x384xf32> to vector<1x384xf32>
    %10 = vector.broadcast %9 : vector<1x384xf32> to vector<8x384xf32>
    %11 = arith.addf %7, %10 : vector<8x384xf32>
    %12 = vector.extract_strided_slice %11 {offsets = [0, 0], sizes = [8, 128], strides = [1, 1]} : vector<8x384xf32> to vector<8x128xf32>
    %cst_8 = arith.constant 2.500000e-01 : f32
    %13 = vector.broadcast %cst_8 : f32 to vector<8x128xf32>
    %14 = arith.mulf %12, %13 : vector<8x128xf32>
    %15 = vector.extract_strided_slice %11 {offsets = [0, 128], sizes = [8, 128], strides = [1, 1]} : vector<8x384xf32> to vector<8x128xf32>
    %16 = vector.extract_strided_slice %11 {offsets = [0, 256], sizes = [8, 128], strides = [1, 1]} : vector<8x384xf32> to vector<8x128xf32>
    %c0_9 = arith.constant 0 : index
    %c0_10 = arith.constant 0 : index
    %17 = vector.load %arg4[%c0_9, %c0_10] : memref<64x128xf32, #tpu.memory_space<vmem>>, vector<64x128xf32>
    %18 = tpu.concatenate %14, %14, %14, %14, %14, %14, %14, %14 in 0 : vector<8x128xf32>, vector<8x128xf32>, vector<8x128xf32>, vector<8x128xf32>, vector<8x128xf32>, vector<8x128xf32>, vector<8x128xf32>, vector<8x128xf32> -> vector<64x128xf32>
    %19 = arith.mulf %18, %17 : vector<64x128xf32>
    %cst_11 = arith.constant dense<0.000000e+00> : vector<64x8xf32>
    %20 = tpu.matmul %19, %15, %cst_11 {dimension_numbers = #tpu.dot_dimension_numbers<[1], [1], [0], [0], [0, 0, 1, 0], [], []>} : vector<64x128xf32>, vector<8x128xf32>, vector<64x8xf32> -> vector<64x8xf32>
    %cst_12 = arith.constant dense<0xFF800000> : vector<64xf32>
    %21 = vector.multi_reduction <maximumf>, %20, %cst_12 [1] : vector<64x8xf32> to vector<64xf32>
    %22 = vector.shape_cast %21 : vector<64xf32> to vector<64x1xf32>
    %23 = vector.broadcast %22 : vector<64x1xf32> to vector<64x8xf32>
    %24 = arith.subf %20, %23 : vector<64x8xf32>
    %25 = math.exp %24 : vector<64x8xf32>
    %cst_13 = arith.constant dense<0.000000e+00> : vector<64xf32>
    %26 = vector.multi_reduction <add>, %25, %cst_13 [1] : vector<64x8xf32> to vector<64xf32>
    %27 = vector.shape_cast %26 : vector<64xf32> to vector<64x1xf32>
    %28 = tpu.reciprocal %27 {approx = true} : vector<64x1xf32> -> vector<64x1xf32>
    %29 = vector.broadcast %28 : vector<64x1xf32> to vector<64x8xf32>
    %30 = arith.mulf %25, %29 : vector<64x8xf32>
    %cst_14 = arith.constant dense<0.000000e+00> : vector<64x128xf32>
    %31 = tpu.matmul %30, %16, %cst_14 {dimension_numbers = #tpu.dot_dimension_numbers<[1], [0], [0], [1], [0, 0, 1, 1], [], []>} : vector<64x8xf32>, vector<8x128xf32>, vector<64x128xf32> -> vector<64x128xf32>
    %32 = arith.mulf %31, %17 : vector<64x128xf32>
    %33 = vector.extract_strided_slice %32 {offsets = [0, 0], sizes = [8, 128], strides = [1, 1]} : vector<64x128xf32> to vector<8x128xf32>
    %34 = vector.extract_strided_slice %32 {offsets = [8, 0], sizes = [8, 128], strides = [1, 1]} : vector<64x128xf32> to vector<8x128xf32>
    %35 = arith.addf %33, %34 : vector<8x128xf32>
    %36 = vector.extract_strided_slice %32 {offsets = [16, 0], sizes = [8, 128], strides = [1, 1]} : vector<64x128xf32> to vector<8x128xf32>
    %37 = arith.addf %35, %36 : vector<8x128xf32>
    %38 = vector.extract_strided_slice %32 {offsets = [24, 0], sizes = [8, 128], strides = [1, 1]} : vector<64x128xf32> to vector<8x128xf32>
    %39 = arith.addf %37, %38 : vector<8x128xf32>
    %40 = vector.extract_strided_slice %32 {offsets = [32, 0], sizes = [8, 128], strides = [1, 1]} : vector<64x128xf32> to vector<8x128xf32>
    %41 = arith.addf %39, %40 : vector<8x128xf32>
    %42 = vector.extract_strided_slice %32 {offsets = [40, 0], sizes = [8, 128], strides = [1, 1]} : vector<64x128xf32> to vector<8x128xf32>
    %43 = arith.addf %41, %42 : vector<8x128xf32>
    %44 = vector.extract_strided_slice %32 {offsets = [48, 0], sizes = [8, 128], strides = [1, 1]} : vector<64x128xf32> to vector<8x128xf32>
    %45 = arith.addf %43, %44 : vector<8x128xf32>
    %46 = vector.extract_strided_slice %32 {offsets = [56, 0], sizes = [8, 128], strides = [1, 1]} : vector<64x128xf32> to vector<8x128xf32>
    %47 = arith.addf %45, %46 : vector<8x128xf32>
    %48 = arith.truncf %47 : vector<8x128xf32> to vector<8x128xbf16>
    %c0_15 = arith.constant 0 : index
    %c0_16 = arith.constant 0 : index
    %c0_17 = arith.constant 0 : index
    %49 = vector.load %arg7[%c0_15, %c0_16, %c0_17] : memref<1x128x128xbf16, #tpu.memory_space<vmem>>, vector<1x128x128xbf16>
    %50 = vector.shape_cast %49 : vector<1x128x128xbf16> to vector<128x128xbf16>
    %cst_18 = arith.constant dense<0.000000e+00> : vector<8x128xf32>
    %51 = tpu.matmul %48, %50, %cst_18 {dimension_numbers = #tpu.dot_dimension_numbers<[1], [0], [0], [1], [0, 0, 1, 1], [], []>} : vector<8x128xbf16>, vector<128x128xbf16>, vector<8x128xf32> -> vector<8x128xf32>
    %c0_19 = arith.constant 0 : index
    %c0_20 = arith.constant 0 : index
    %c0_21 = arith.constant 0 : index
    %52 = vector.load %arg8[%c0_19, %c0_20, %c0_21] : memref<1x1x128xf32, #tpu.memory_space<vmem>>, vector<1x1x128xf32>
    %53 = vector.shape_cast %52 : vector<1x1x128xf32> to vector<1x128xf32>
    %54 = vector.broadcast %53 : vector<1x128xf32> to vector<8x128xf32>
    %55 = arith.addf %51, %54 : vector<8x128xf32>
    %56 = arith.addf %3, %55 : vector<8x128xf32>
    %c0_22 = arith.constant 0 : index
    %c0_23 = arith.constant 0 : index
    %c0_24 = arith.constant 0 : index
    %57 = vector.load %arg9[%c0_22, %c0_23, %c0_24] : memref<1x1x128xf32, #tpu.memory_space<vmem>>, vector<1x1x128xf32>
    %58 = vector.shape_cast %57 : vector<1x1x128xf32> to vector<1x128xf32>
    %c0_25 = arith.constant 0 : index
    %c0_26 = arith.constant 0 : index
    %c0_27 = arith.constant 0 : index
    %59 = vector.load %arg10[%c0_25, %c0_26, %c0_27] : memref<1x1x128xf32, #tpu.memory_space<vmem>>, vector<1x1x128xf32>
    %60 = vector.shape_cast %59 : vector<1x1x128xf32> to vector<1x128xf32>
    %cst_28 = arith.constant dense<0.000000e+00> : vector<8xf32>
    %61 = vector.multi_reduction <add>, %56, %cst_28 [1] : vector<8x128xf32> to vector<8xf32>
    %62 = vector.shape_cast %61 : vector<8xf32> to vector<8x1xf32>
    %cst_29 = arith.constant 1.280000e+02 : f32
    %63 = vector.broadcast %cst_29 : f32 to vector<8x1xf32>
    %64 = arith.divf %62, %63 : vector<8x1xf32>
    %65 = vector.broadcast %64 : vector<8x1xf32> to vector<8x128xf32>
    %66 = arith.subf %56, %65 : vector<8x128xf32>
    %67 = arith.mulf %66, %66 : vector<8x128xf32>
    %cst_30 = arith.constant dense<0.000000e+00> : vector<8xf32>
    %68 = vector.multi_reduction <add>, %67, %cst_30 [1] : vector<8x128xf32> to vector<8xf32>
    %69 = vector.shape_cast %68 : vector<8xf32> to vector<8x1xf32>
    %cst_31 = arith.constant 1.280000e+02 : f32
    %70 = vector.broadcast %cst_31 : f32 to vector<8x1xf32>
    %71 = arith.divf %69, %70 : vector<8x1xf32>
    %72 = vector.broadcast %64 : vector<8x1xf32> to vector<8x128xf32>
    %73 = arith.subf %56, %72 : vector<8x128xf32>
    %cst_32 = arith.constant 9.99999974E-6 : f32
    %74 = vector.broadcast %cst_32 : f32 to vector<8x1xf32>
    %75 = arith.addf %71, %74 : vector<8x1xf32>
    %76 = math.rsqrt %75 : vector<8x1xf32>
    %77 = vector.broadcast %76 : vector<8x1xf32> to vector<8x128xf32>
    %78 = arith.mulf %73, %77 : vector<8x128xf32>
    %79 = vector.broadcast %58 : vector<1x128xf32> to vector<8x128xf32>
    %80 = arith.mulf %78, %79 : vector<8x128xf32>
    %81 = vector.broadcast %60 : vector<1x128xf32> to vector<8x128xf32>
    %82 = arith.addf %80, %81 : vector<8x128xf32>
    %83 = arith.truncf %82 : vector<8x128xf32> to vector<8x128xbf16>
    %c0_33 = arith.constant 0 : index
    %c0_34 = arith.constant 0 : index
    %c0_35 = arith.constant 0 : index
    %84 = vector.load %arg11[%c0_33, %c0_34, %c0_35] : memref<1x128x2048xbf16, #tpu.memory_space<vmem>>, vector<1x128x2048xbf16>
    %85 = vector.shape_cast %84 : vector<1x128x2048xbf16> to vector<128x2048xbf16>
    %cst_36 = arith.constant dense<0.000000e+00> : vector<8x2048xf32>
    %86 = tpu.matmul %83, %85, %cst_36 {dimension_numbers = #tpu.dot_dimension_numbers<[1], [0], [0], [1], [0, 0, 1, 1], [], []>} : vector<8x128xbf16>, vector<128x2048xbf16>, vector<8x2048xf32> -> vector<8x2048xf32>
    %c0_37 = arith.constant 0 : index
    %c0_38 = arith.constant 0 : index
    %c0_39 = arith.constant 0 : index
    %87 = vector.load %arg12[%c0_37, %c0_38, %c0_39] : memref<1x1x2048xf32, #tpu.memory_space<vmem>>, vector<1x1x2048xf32>
    %88 = vector.shape_cast %87 : vector<1x1x2048xf32> to vector<1x2048xf32>
    %89 = vector.broadcast %88 : vector<1x2048xf32> to vector<8x2048xf32>
    %90 = arith.addf %86, %89 : vector<8x2048xf32>
    %cst_40 = arith.constant 0.000000e+00 : f32
    %91 = vector.broadcast %cst_40 : f32 to vector<8x2048xf32>
    %92 = arith.maximumf %90, %91 : vector<8x2048xf32>
    %93 = arith.truncf %92 : vector<8x2048xf32> to vector<8x2048xbf16>
    %c0_41 = arith.constant 0 : index
    %c0_42 = arith.constant 0 : index
    %c0_43 = arith.constant 0 : index
    %94 = vector.load %arg13[%c0_41, %c0_42, %c0_43] : memref<1x2048x128xbf16, #tpu.memory_space<vmem>>, vector<1x2048x128xbf16>
    %95 = vector.shape_cast %94 : vector<1x2048x128xbf16> to vector<2048x128xbf16>
    %cst_44 = arith.constant dense<0.000000e+00> : vector<8x128xf32>
    %96 = tpu.matmul %93, %95, %cst_44 {dimension_numbers = #tpu.dot_dimension_numbers<[1], [0], [0], [1], [0, 0, 1, 1], [], []>} : vector<8x2048xbf16>, vector<2048x128xbf16>, vector<8x128xf32> -> vector<8x128xf32>
    %c0_45 = arith.constant 0 : index
    %c0_46 = arith.constant 0 : index
    %c0_47 = arith.constant 0 : index
    %97 = vector.load %arg14[%c0_45, %c0_46, %c0_47] : memref<1x1x128xf32, #tpu.memory_space<vmem>>, vector<1x1x128xf32>
    %98 = vector.shape_cast %97 : vector<1x1x128xf32> to vector<1x128xf32>
    %99 = vector.broadcast %98 : vector<1x128xf32> to vector<8x128xf32>
    %100 = arith.addf %96, %99 : vector<8x128xf32>
    %101 = arith.addf %82, %100 : vector<8x128xf32>
    %c0_48 = arith.constant 0 : index
    %c0_49 = arith.constant 0 : index
    %c0_50 = arith.constant 0 : index
    %102 = vector.load %arg15[%c0_48, %c0_49, %c0_50] : memref<1x1x128xf32, #tpu.memory_space<vmem>>, vector<1x1x128xf32>
    %103 = vector.shape_cast %102 : vector<1x1x128xf32> to vector<1x128xf32>
    %c0_51 = arith.constant 0 : index
    %c0_52 = arith.constant 0 : index
    %c0_53 = arith.constant 0 : index
    %104 = vector.load %arg16[%c0_51, %c0_52, %c0_53] : memref<1x1x128xf32, #tpu.memory_space<vmem>>, vector<1x1x128xf32>
    %105 = vector.shape_cast %104 : vector<1x1x128xf32> to vector<1x128xf32>
    %cst_54 = arith.constant dense<0.000000e+00> : vector<8xf32>
    %106 = vector.multi_reduction <add>, %101, %cst_54 [1] : vector<8x128xf32> to vector<8xf32>
    %107 = vector.shape_cast %106 : vector<8xf32> to vector<8x1xf32>
    %cst_55 = arith.constant 1.280000e+02 : f32
    %108 = vector.broadcast %cst_55 : f32 to vector<8x1xf32>
    %109 = arith.divf %107, %108 : vector<8x1xf32>
    %110 = vector.broadcast %109 : vector<8x1xf32> to vector<8x128xf32>
    %111 = arith.subf %101, %110 : vector<8x128xf32>
    %112 = arith.mulf %111, %111 : vector<8x128xf32>
    %cst_56 = arith.constant dense<0.000000e+00> : vector<8xf32>
    %113 = vector.multi_reduction <add>, %112, %cst_56 [1] : vector<8x128xf32> to vector<8xf32>
    %114 = vector.shape_cast %113 : vector<8xf32> to vector<8x1xf32>
    %cst_57 = arith.constant 1.280000e+02 : f32
    %115 = vector.broadcast %cst_57 : f32 to vector<8x1xf32>
    %116 = arith.divf %114, %115 : vector<8x1xf32>
    %117 = vector.broadcast %109 : vector<8x1xf32> to vector<8x128xf32>
    %118 = arith.subf %101, %117 : vector<8x128xf32>
    %cst_58 = arith.constant 9.99999974E-6 : f32
    %119 = vector.broadcast %cst_58 : f32 to vector<8x1xf32>
    %120 = arith.addf %116, %119 : vector<8x1xf32>
    %121 = math.rsqrt %120 : vector<8x1xf32>
    %122 = vector.broadcast %121 : vector<8x1xf32> to vector<8x128xf32>
    %123 = arith.mulf %118, %122 : vector<8x128xf32>
    %124 = vector.broadcast %103 : vector<1x128xf32> to vector<8x128xf32>
    %125 = arith.mulf %123, %124 : vector<8x128xf32>
    %126 = vector.broadcast %105 : vector<1x128xf32> to vector<8x128xf32>
    %127 = arith.addf %125, %126 : vector<8x128xf32>
    %c0_59 = arith.constant 0 : index
    %c0_60 = arith.constant 0 : index
    %128 = vector.load %arg20[%c0_59, %c0_60] : memref<8x128xf32, #tpu.memory_space<vmem>>, vector<8x128xf32>
    tpu.vector_store %arg20[%c0_59, %c0_60], %127 {strides = array<i32>} : memref<8x128xf32, #tpu.memory_space<vmem>>, vector<8x128xf32>,
    %c5_i32 = arith.constant 5 : i32
    %129 = arith.cmpi eq, %arg0, %c5_i32 : i32
    %130 = arith.extui %129 : i1 to i32
    %c0_i32_61 = arith.constant 0 : i32
    %131 = arith.cmpi ne, %130, %c0_i32_61 : i32
    scf.if %131 {
      %c0_62 = arith.constant 0 : index
      %c0_63 = arith.constant 0 : index
      %132 = vector.load %arg17[%c0_62, %c0_63] : memref<1x128xf32, #tpu.memory_space<vmem>>, vector<1x128xf32>
      %133 = vector.broadcast %132 : vector<1x128xf32> to vector<8x128xf32>
      %134 = arith.mulf %127, %133 : vector<8x128xf32>
      %cst_64 = arith.constant dense<0.000000e+00> : vector<8xf32>
      %135 = vector.multi_reduction <add>, %134, %cst_64 [1] : vector<8x128xf32> to vector<8xf32>
      %136 = vector.shape_cast %135 : vector<8xf32> to vector<8x1xf32>
      %c0_65 = arith.constant 0 : index
      %c0_66 = arith.constant 0 : index
      %137 = vector.load %arg18[%c0_65, %c0_66] : memref<1x1xf32, #tpu.memory_space<vmem>>, vector<1x1xf32>
      %138 = vector.broadcast %137 : vector<1x1xf32> to vector<8x1xf32>
      %139 = arith.addf %136, %138 : vector<8x1xf32>
      %c0_67 = arith.constant 0 : index
      %c0_68 = arith.constant 0 : index
      %140 = vector.load %arg19[%c0_67, %c0_68] : memref<8x1xf32, #tpu.memory_space<vmem>>, vector<8x1xf32>
      tpu.vector_store %arg19[%c0_67, %c0_68], %139 {strides = array<i32>} : memref<8x1xf32, #tpu.memory_space<vmem>>, vector<8x1xf32>,
    } else {
    }
    return
  }
  func.func @transform_0(%arg0: i32) -> (i32, i32) {
    %c0_i32 = arith.constant 0 : i32
    %c0_i32_0 = arith.constant 0 : i32
    %c0_i32_1 = arith.constant 0 : i32
    return %c0_i32, %c0_i32_0 : i32, i32
  }
  func.func @transform_1(%arg0: i32) -> (i32, i32) {
    %c0_i32 = arith.constant 0 : i32
    %c0_i32_0 = arith.constant 0 : i32
    %c0_i32_1 = arith.constant 0 : i32
    return %c0_i32, %c0_i32_0 : i32, i32
  }
  func.func @transform_2(%arg0: i32) -> (i32, i32) {
    %c0_i32 = arith.constant 0 : i32
    %c0_i32_0 = arith.constant 0 : i32
    %c0_i32_1 = arith.constant 0 : i32
    return %c0_i32, %c0_i32_0 : i32, i32
  }
  func.func @transform_3(%arg0: i32) -> (i32, i32) {
    %c0_i32 = arith.constant 0 : i32
    %c0_i32_0 = arith.constant 0 : i32
    %c0_i32_1 = arith.constant 0 : i32
    return %c0_i32, %c0_i32_0 : i32, i32
  }
  func.func @transform_4(%arg0: i32) -> (i32, i32, i32) {
    %c0_i32 = arith.constant 0 : i32
    %c0_i32_0 = arith.constant 0 : i32
    %c0_i32_1 = arith.constant 0 : i32
    return %arg0, %c0_i32, %c0_i32_0 : i32, i32, i32
  }
  func.func @transform_5(%arg0: i32) -> (i32, i32, i32) {
    %c0_i32 = arith.constant 0 : i32
    %c0_i32_0 = arith.constant 0 : i32
    %c0_i32_1 = arith.constant 0 : i32
    return %arg0, %c0_i32, %c0_i32_0 : i32, i32, i32
  }
  func.func @transform_6(%arg0: i32) -> (i32, i32, i32) {
    %c0_i32 = arith.constant 0 : i32
    %c0_i32_0 = arith.constant 0 : i32
    %c0_i32_1 = arith.constant 0 : i32
    return %arg0, %c0_i32, %c0_i32_0 : i32, i32, i32
  }
  func.func @transform_7(%arg0: i32) -> (i32, i32, i32) {
    %c0_i32 = arith.constant 0 : i32
    %c0_i32_0 = arith.constant 0 : i32
    %c0_i32_1 = arith.constant 0 : i32
    return %arg0, %c0_i32, %c0_i32_0 : i32, i32, i32
  }
  func.func @transform_8(%arg0: i32) -> (i32, i32, i32) {
    %c0_i32 = arith.constant 0 : i32
    %c0_i32_0 = arith.constant 0 : i32
    %c0_i32_1 = arith.constant 0 : i32
    return %arg0, %c0_i32, %c0_i32_0 : i32, i32, i32
  }
  func.func @transform_9(%arg0: i32) -> (i32, i32, i32) {
    %c0_i32 = arith.constant 0 : i32
    %c0_i32_0 = arith.constant 0 : i32
    %c0_i32_1 = arith.constant 0 : i32
    return %arg0, %c0_i32, %c0_i32_0 : i32, i32, i32
  }
  func.func @transform_10(%arg0: i32) -> (i32, i32, i32) {
    %c0_i32 = arith.constant 0 : i32
    %c0_i32_0 = arith.constant 0 : i32
    %c0_i32_1 = arith.constant 0 : i32
    return %arg0, %c0_i32, %c0_i32_0 : i32, i32, i32
  }
  func.func @transform_11(%arg0: i32) -> (i32, i32, i32) {
    %c0_i32 = arith.constant 0 : i32
    %c0_i32_0 = arith.constant 0 : i32
    %c0_i32_1 = arith.constant 0 : i32
    return %arg0, %c0_i32, %c0_i32_0 : i32, i32, i32
  }
  func.func @transform_12(%arg0: i32) -> (i32, i32, i32) {
    %c0_i32 = arith.constant 0 : i32
    %c0_i32_0 = arith.constant 0 : i32
    %c0_i32_1 = arith.constant 0 : i32
    return %arg0, %c0_i32, %c0_i32_0 : i32, i32, i32
  }
  func.func @transform_13(%arg0: i32) -> (i32, i32, i32) {
    %c0_i32 = arith.constant 0 : i32
    %c0_i32_0 = arith.constant 0 : i32
    %c0_i32_1 = arith.constant 0 : i32
    return %arg0, %c0_i32, %c0_i32_0 : i32, i32, i32
  }
  func.func @transform_14(%arg0: i32) -> (i32, i32, i32) {
    %c0_i32 = arith.constant 0 : i32
    %c0_i32_0 = arith.constant 0 : i32
    %c0_i32_1 = arith.constant 0 : i32
    return %arg0, %c0_i32, %c0_i32_0 : i32, i32, i32
  }
  func.func @transform_15(%arg0: i32) -> (i32, i32, i32) {
    %c0_i32 = arith.constant 0 : i32
    %c0_i32_0 = arith.constant 0 : i32
    %c0_i32_1 = arith.constant 0 : i32
    return %arg0, %c0_i32, %c0_i32_0 : i32, i32, i32
  }
  func.func @transform_16(%arg0: i32) -> (i32, i32) {
    %c0_i32 = arith.constant 0 : i32
    %c0_i32_0 = arith.constant 0 : i32
    %c0_i32_1 = arith.constant 0 : i32
    return %c0_i32, %c0_i32_0 : i32, i32
  }
  func.func @transform_17(%arg0: i32) -> (i32, i32) {
    %c0_i32 = arith.constant 0 : i32
    %c0_i32_0 = arith.constant 0 : i32
    %c0_i32_1 = arith.constant 0 : i32
    return %c0_i32, %c0_i32_0 : i32, i32
  }
  func.func @transform_18(%arg0: i32) -> (i32, i32) {
    %c0_i32 = arith.constant 0 : i32
    %c0_i32_0 = arith.constant 0 : i32
    %c0_i32_1 = arith.constant 0 : i32
    return %c0_i32, %c0_i32_0 : i32, i32
  }
}

</mosaic_0001>

<bundles_post_ra>
// kernel: swe_model_forward.1
= control target key start
LH: loop header
LB: loop body
LE: loop exit
PB: predicated region body
PF: predicated region fallthrough
CT: control target
= control target key end

     0   :  { %s7356_s0 = inlined_call_operand.hbm [shape: f32[8,14], index: 0, kind: input, shape index: {}]   ;;  %s7357_s1 = inlined_call_operand.hbm [shape: bf16[14,128], index: 1, kind: input, shape index: {}]   ;;  %s7358_s2 = inlined_call_operand.vmem [shape: f32[1,128], index: 2, kind: input, shape index: {}]   ;;  %s7359_s3 = inlined_call_operand.vmem [shape: f32[64,128], index: 3, kind: input, shape index: {}]   ;;  %s7360_s4 = inlined_call_operand.hbm [shape: bf16[6,128,384], index: 4, kind: input, shape index: {}]   ;;  %s7361_s5 = inlined_call_operand.hbm [shape: f32[6,1,384], index: 5, kind: input, shape index: {}]   ;;  %s7362_s6 = inlined_call_operand.hbm [shape: bf16[6,128,128], index: 6, kind: input, shape index: {}]   ;;  %s7363_s7 = inlined_call_operand.hbm [shape: f32[6,1,128], index: 7, kind: input, shape index: {}]   ;;  %s7364_s8 = inlined_call_operand.hbm [shape: f32[6,1,128], index: 8, kind: input, shape index: {}]   ;;  %s7365_s9 = inlined_call_operand.hbm [shape: f32[6,1,128], index: 9, kind: input, shape index: {}]   ;;  %s7366_s10 = inlined_call_operand.hbm [shape: bf16[6,128,2048], index: 10, kind: input, shape index: {}]   ;;  %s7367_s11 = inlined_call_operand.hbm [shape: f32[6,1,2048], index: 11, kind: input, shape index: {}]   ;;  %s7368_s12 = inlined_call_operand.hbm [shape: bf16[6,2048,128], index: 12, kind: input, shape index: {}]   ;;  %s7369_s13 = inlined_call_operand.hbm [shape: f32[6,1,128], index: 13, kind: input, shape index: {}]   ;;  %s7370_s14 = inlined_call_operand.hbm [shape: f32[6,1,128], index: 14, kind: input, shape index: {}]   ;;  %s7371_s15 = inlined_call_operand.hbm [shape: f32[6,1,128], index: 15, kind: input, shape index: {}]   ;;  %s7372_s16 = inlined_call_operand.hbm [shape: f32[1,128], index: 16, kind: input, shape index: {}]   ;;  %s7373_s17 = inlined_call_operand.<no memory space> [shape: f32[1,1], index: 17, kind: input, shape index: {}]   ;;  %s7374_s18 = inlined_call_operand.vmem [shape: f32[8,1], index: 18, kind: output, shape index: {}]  }
   0x1   :  { %7407 = sst [smem:[#allocation32_spill]] %s7356_s0  ;;  %v23_v0 = vstv %s7373_s17 }
   0x2   :  { %7408 = sst [smem:[#allocation33_spill]] %s7357_s1  ;;  %24 = vst [vmem:[#allocation3] sm:$0x1] %v23_v0 }
   0x3   :  { %7409 = sst [smem:[#allocation34_spill]] %s7358_s2 }
   0x4   :  { %7410 = sst [smem:[#allocation35_spill]] %s7359_s3 }
   0x5   :  { %7411 = sst [smem:[#allocation36_spill]] %s7360_s4 }
   0x6   :  { %7412 = sst [smem:[#allocation37_spill]] %s7361_s5 }
   0x7   :  { %7413 = sst [smem:[#allocation38_spill]] %s7362_s6 }
   0x8   :  { %7414 = sst [smem:[#allocation39_spill]] %s7363_s7 }
   0x9   :  { %7415 = sst [smem:[#allocation40_spill]] %s7372_s16 }
   0xa   :  { %7416 = sst [smem:[#allocation41_spill]] %s7374_s18 }
   0xb   :  { %25 = vsyncpa [#allocation5], 0 }
   0xc   :  { %26 = vsyncpa [#allocation7], 0  ;;  %s6297_s29 = smov 0   ;;  %s6299_s30 = smov 0  }
   0xd   :  { %s6301_s0 = smov 0   ;;  %s6303_s19 = smov 0  }
   0xe LB: > { %7417 = sst [smem:[#allocation25_spill]] %s6164_s30  ;;  %s6316_s17 = sadd.s32 4294967295, %s6172_s19   ;;  %s6172_s19 = sphi %s6303_s19, %s7470_s19   ;;  %s6168_s0 = sphi %s6301_s0, %s7473_s0   ;;  %s6164_s30 = sphi %s6299_s30, %s7472_s30   ;;  %s6160_s29 = sphi %s6297_s29, %s7471_s29  }
   0xf   : > { %7418 = sst [smem:[#allocation26_spill]] %s6168_s0  ;;  %s6319_s1 = sadd.s32 1, %s6172_s19  }
  0x10   : > { %7419 = sst [smem:[#allocation27_spill]] %s6316_s17  ;;  %s120_s20 = ssub.s32 %s6172_s19, %s6319_s1 }
  0x11   : > { %7420 = sst [smem:[#allocation28_spill]] %s6319_s1  ;;  %s123_s21 = sadd.s32 1, %s6168_s0 }
  0x12   : > { %p121_p0 = scmp.eq.s32.totalorder %s120_s20, 0  ;;  %p130_p1 = scmp.ne.s32.totalorder %s6168_s0, %s6164_s30 }
  0x13   : > { %p131_p2 = scmp.eq.s32.totalorder %s6172_s19, 0  ;;  %p136_p3 = scmp.ne.s32.totalorder %s6164_s30, %s6160_s29 }
  0x14   : > { %s6329_s22 = scalar_select %p121_p0, %s6168_s0, %s123_s21  }
  0x15   : > { %p6331_p4 = por %p131_p2, %p130_p1  ;;  %p7384_p5 = scmp.eq.s32.totalorder %s6316_s17, 0 }
  0x16   : > { %7421 = sst [smem:[#allocation29_spill]] %s6329_s22  ;;  %p4700_p6 = scmp.ge.s32.totalorder %s6172_s19, 1 }
  0x17   : > { %p496_p7 = scmp.lt.s32.totalorder %s6172_s19, 7  ;;  %p6340_p8 = por %p7384_p5, %p136_p3 }
  0x18   : > { %s6174_s25 = smov [#allocation4]   ;;  %p5428_p12 = scmp.lt.s32.totalorder %s6172_s19, 6 }
  0x19   : > { %s7423_s23 = scalar_select %p6340_p8, 1, 0 }
  0x1a   : > { %p6345_p10 = pnand %p4700_p6, %p496_p7  ;;  %s509_s26 = sshll.u32 %s6174_s25, 4  ;;  %s510_s26 = int_to_ptr.vmem [resolvable:$true] %s509_s26 }
  0x1b   : > { %7424 = sst [smem:[#allocation30_spill]] %s7423_s23  ;;  %s6353_s27 = sand.u32 1, %s6168_s0  }
  0x1c   : > { %s7425_s24 = scalar_select %p6345_p10, 1, 0 }
  0x1d   : > { %p5378_p11 = pneg %p6345_p10  ;;  %s553_s29 = sand.u32 1, %s6172_s19  }
  0x1e   : > { %7426 = sst [smem:[#allocation31_spill]] %s7425_s24  ;;  %p6364_p0 = pnand %p5428_p12, %p6331_p4 }
  0x1f   : > { %p6357_p13 = pnand %p5378_p11, %p7384_p5  ;;  %s5336_s21 = smul.u32 192, %s6353_s27 }
  0x20   : > { %s7428_s20 = scalar_select %p6364_p0, 1, 0 }
  0x21   : > { %s7427_s28 = scalar_select %p6357_p13, 1, 0 }
  0x22   : > { %s7429_s1 = sld [smem:[#allocation32_spill]]  ;;  %p6377_p2 = pneg %p6357_p13 }
  0x24   : > { %s7430_s23 = scalar_select %p6377_p2, 1, 0 }
  0x28   : > { %s5682_s18 = scalar_lea.hbm %s7429_s1, 128 }
  0x29   : > { %p5683_p1 = scmp.ne.s32.totalorder %s7429_s1, %s5682_s18  ;;  %p5689_p6 = scmp.lt.u32.totalorder %s5682_s18, %s7429_s1 }
  0x2b   : > { %p5685_p3 = pnand %p6377_p2, %p5683_p1 }
  0x2d   : > { %p5686_p4 = pneg %p5685_p3 }
  0x2f   : > { %p5691_p7 = pnand %p5689_p6, %p5686_p4 }
  0x31   : > { %5694 = shalt.err (!%p5691_p7)
}
  0x32   : > { %s5695_s22 = scalar_lea.vmem %s510_s26, 128  ;;  %p5703_p5 = scmp.lt.s32.totalorder %s510_s26, %s510_s26 }
  0x33   : > { %p5696_p11 = scmp.ne.s32.totalorder %s510_s26, %s5695_s22  ;;  %p5704_p8 = scmp.lt.s32.totalorder %s5695_s22, %s5695_s22 }
  0x35   : > { %p5698_p12 = pnand %p5696_p11, %p6377_p2  ;;  %p5705_p10 = por %p5704_p8, %p5703_p5 }
  0x37   : > { %p5699_p9 = pneg %p5698_p12 }
  0x39   : > { %p5706_p0 = pnand %p5705_p10, %p5699_p9 }
  0x3b   : > { %5709 = shalt.err (!%p5706_p0)
}
  0x3c   : > { %5381 = dma.hbm_to_vmem [thread:$0]  (!%p6357_p13), %s7429_s1, 128, %s510_s26, [#allocation5]  }
  0x3d   : > { %s5337_s18 = smul.u32 3072, %s6172_s19  ;;  %s557_s30 = scalar_lea.vmem [#allocation8], %s5336_s21 }
  0x3e   : > { %s564_s25 = sshll.u32 %s557_s30, 4  ;;  %s7431_s4 = sld [smem:[#allocation36_spill]]  ;;  %s6394_s25 = int_to_ptr.vmem [resolvable:$true] %s564_s25 }
  0x3f   : > { %s6401_s24 = scalar_lea.sflag [#allocation5], %s553_s29  ;;  %p7432_p8 = scmp.ne.s32.totalorder %s7428_s20, 0 }
  0x41   : > { %p6407_p9 = pneg %p7432_p8 }
  0x44   : > { %s6399_s22 = scalar_lea.hbm %s7431_s4, %s5337_s18  ;;  %s5715_s0 = scalar_lea.hbm %s7431_s4, 18432 }
  0x45   : > { %s5710_s3 = scalar_lea.hbm %s6399_s22, 3072  ;;  %p5716_p1 = scmp.lt.u32.totalorder %s6399_s22, %s7431_s4 }
  0x46   : > { %p5711_p5 = scmp.ne.s32.totalorder %s6399_s22, %s5710_s3  ;;  %p5717_p3 = scmp.lt.u32.totalorder %s5715_s0, %s5710_s3 }
  0x47   : > { %p5719_p6 = scmp.lt.u32.totalorder %s5710_s3, %s6399_s22 }
  0x48   : > { %p5713_p10 = pnand %p6407_p9, %p5711_p5  ;;  %p5718_p4 = por %p5717_p3, %p5716_p1 }
  0x4a   : > { %p5714_p0 = pneg %p5713_p10  ;;  %p5720_p7 = por %p5719_p6, %p5718_p4 }
  0x4c   : > { %p5721_p11 = pnand %p5720_p7, %p5714_p0 }
  0x4e   : > { %5724 = shalt.err (!%p5721_p11)
}
  0x4f   : > { %s5725_s29 = scalar_lea.vmem %s6394_s25, 3072  ;;  %s6175_s2 = smov [#allocation8]  }
  0x50   : > { %p5726_p12 = scmp.ne.s32.totalorder %s6394_s25, %s5725_s29  ;;  %s5730_s17 = sshll.u32 %s6175_s2, 4  ;;  %s5731_s17 = int_to_ptr.vmem [resolvable:$false] %s5730_s17 }
  0x51   : > { %s5732_s21 = scalar_lea.vmem %s5731_s17, 6144  ;;  %p5733_p13 = scmp.lt.s32.totalorder %s6394_s25, %s5731_s17 }
  0x52   : > { %p5728_p5 = pnand %p5726_p12, %p6407_p9  ;;  %p5734_p2 = scmp.lt.s32.totalorder %s5732_s21, %s5725_s29 }
  0x54   : > { %p5729_p10 = pneg %p5728_p5  ;;  %p5735_p1 = por %p5734_p2, %p5733_p13 }
  0x56   : > { %p5736_p3 = pnand %p5735_p1, %p5729_p10 }
  0x58   : > { %5739 = shalt.err (!%p5736_p3)
}
  0x59   : > { %s6176_s3 = smov 192   ;;  %s6177_s0 = smov 12  }
  0x5a   : > { %5391 = dma.hbm_to_vmem [thread:$0]  (!%p7432_p8), %s6399_s22, 3072, %s6394_s25, %s6401_s24, %s6176_s3, %s6176_s3, %s6177_s0  }
  0x5b   : > { %s5338_s18 = smul.u32 3, %s6353_s27  ;;  %s4707_s2 = sshll.u32 %s6353_s27, 6 }
  0x5c   : > { %s5339_s30 = smul.u32 48, %s6172_s19  ;;  %s7434_s5 = sld [smem:[#allocation37_spill]] }
  0x5d   : > { %s578_s1 = scalar_lea.vmem [#allocation9], %s5338_s18 }
  0x5e   : > { %s586_s4 = sshll.u32 %s578_s1, 4  ;;  %s587_s4 = int_to_ptr.vmem [resolvable:$true] %s586_s4 }
  0x62   : > { %s6437_s21 = scalar_lea.hbm %s7434_s5, %s5339_s30  ;;  %s5745_s3 = scalar_lea.hbm %s7434_s5, 288 }
  0x63   : > { %s5740_s16 = scalar_lea.hbm %s6437_s21, 48  ;;  %p5746_p4 = scmp.lt.u32.totalorder %s6437_s21, %s7434_s5 }
  0x64   : > { %p5741_p13 = scmp.ne.s32.totalorder %s6437_s21, %s5740_s16  ;;  %p5747_p6 = scmp.lt.u32.totalorder %s5745_s3, %s5740_s16 }
  0x65   : > { %p5749_p11 = scmp.lt.u32.totalorder %s5740_s16, %s6437_s21 }
  0x66   : > { %p5743_p2 = pnand %p5741_p13, %p6407_p9  ;;  %p5748_p7 = por %p5747_p6, %p5746_p4 }
  0x68   : > { %p5744_p0 = pneg %p5743_p2  ;;  %p5750_p12 = por %p5749_p11, %p5748_p7 }
  0x6a   : > { %p5751_p5 = pnand %p5750_p12, %p5744_p0 }
  0x6c   : > { %5754 = shalt.err (!%p5751_p5)
}
  0x6d   : > { %s5755_s1 = scalar_lea.vmem %s587_s4, 48  ;;  %s6178_s18 = smov [#allocation9]  }
  0x6e   : > { %p5756_p10 = scmp.ne.s32.totalorder %s587_s4, %s5755_s1  ;;  %s5760_s30 = sshll.u32 %s6178_s18, 4  ;;  %s5761_s30 = int_to_ptr.vmem [resolvable:$false] %s5760_s30 }
  0x6f   : > { %s5762_s29 = scalar_lea.vmem %s5761_s30, 96  ;;  %p5763_p13 = scmp.lt.s32.totalorder %s587_s4, %s5761_s30 }
  0x70   : > { %p5758_p1 = pnand %p5756_p10, %p6407_p9  ;;  %p5764_p2 = scmp.lt.s32.totalorder %s5762_s29, %s5755_s1 }
  0x72   : > { %p5759_p3 = pneg %p5758_p1  ;;  %p5765_p8 = por %p5764_p2, %p5763_p13 }
  0x74   : > { %p5766_p4 = pnand %p5765_p8, %p5759_p3 }
  0x76   : > { %5769 = shalt.err (!%p5766_p4)
}
  0x77   : > { %p7435_p6 = scmp.ne.s32.totalorder %s7428_s20, 0  ;;  %s5044_s16 = sshll.u32 %s6172_s19, 10 }
  0x78   : > { %s597_s25 = scalar_lea.vmem [#allocation10], %s4707_s2  ;;  %s7436_s6 = sld [smem:[#allocation38_spill]] }
  0x79   : > { %5394 = dma.hbm_to_vmem [thread:$0]  (!%p7435_p6), %s6437_s21, 48, %s587_s4, %s6401_s24  }
  0x7a   : > { %s604_s22 = sshll.u32 %s597_s25, 4  ;;  %s6465_s22 = int_to_ptr.vmem [resolvable:$true] %s604_s22 }
  0x7e   : > { %s6463_s17 = scalar_lea.hbm %s7436_s6, %s5044_s16  ;;  %s5775_s2 = scalar_lea.hbm %s7436_s6, 6144 }
  0x7f   : > { %s5770_s1 = scalar_lea.hbm %s6463_s17, 1024  ;;  %p5776_p11 = scmp.lt.u32.totalorder %s6463_s17, %s7436_s6 }
  0x80   : > { %p5771_p8 = scmp.ne.s32.totalorder %s6463_s17, %s5770_s1  ;;  %p5777_p12 = scmp.lt.u32.totalorder %s5775_s2, %s5770_s1 }
  0x81   : > { %p5779_p10 = scmp.lt.u32.totalorder %s5770_s1, %s6463_s17 }
  0x82   : > { %p5773_p0 = pnand %p5771_p8, %p6407_p9  ;;  %p5778_p5 = por %p5777_p12, %p5776_p11 }
  0x84   : > { %p5774_p7 = pneg %p5773_p0  ;;  %p5780_p1 = por %p5779_p10, %p5778_p5 }
  0x86   : > { %p5781_p3 = pnand %p5780_p1, %p5774_p7 }
  0x88   : > { %5784 = shalt.err (!%p5781_p3)
}
  0x89   : > { %s5785_s29 = scalar_lea.vmem %s6465_s22, 1024  ;;  %s6179_s16 = smov [#allocation10]  }
  0x8a   : > { %p5786_p13 = scmp.ne.s32.totalorder %s6465_s22, %s5785_s29  ;;  %s5790_s25 = sshll.u32 %s6179_s16, 4  ;;  %s5791_s25 = int_to_ptr.vmem [resolvable:$false] %s5790_s25 }
  0x8b   : > { %s5792_s3 = scalar_lea.vmem %s5791_s25, 2048  ;;  %p5793_p8 = scmp.lt.s32.totalorder %s6465_s22, %s5791_s25 }
  0x8c   : > { %p5788_p2 = pnand %p5786_p13, %p6407_p9  ;;  %p5794_p0 = scmp.lt.s32.totalorder %s5792_s3, %s5785_s29 }
  0x8e   : > { %p5789_p4 = pneg %p5788_p2  ;;  %p5795_p11 = por %p5794_p0, %p5793_p8 }
  0x90   : > { %p5796_p12 = pnand %p5795_p11, %p5789_p4 }
  0x92   : > { %5799 = shalt.err (!%p5796_p12)
}
  0x93   : > { %s7401_s0 = smov 64   ;;  %s7398_s1 = smov 4  }
  0x94   : > { %5397 = dma.hbm_to_vmem [thread:$0]  (!%p7435_p6), %s6463_s17, 1024, %s6465_s22, %s6401_s24, %s7401_s0, %s7401_s0, %s7398_s1  }
  0x95   : > { %s6493_s4 = sshll.u32 %s6172_s19, 4  ;;  %s7437_s7 = sld [smem:[#allocation39_spill]] }
  0x96   : > { %s617_s30 = scalar_lea.vmem [#allocation11], %s6353_s27 }
  0x97   : > { %s624_s29 = sshll.u32 %s617_s30, 4  ;;  %s625_s29 = int_to_ptr.vmem [resolvable:$true] %s624_s29 }
  0x9b   : > { %s6499_s18 = scalar_lea.hbm %s7437_s7, %s6493_s4  ;;  %s5805_s25 = scalar_lea.hbm %s7437_s7, 96 }
  0x9c   : > { %s5800_s16 = scalar_lea.hbm %s6499_s18, 16  ;;  %p5806_p1 = scmp.lt.u32.totalorder %s6499_s18, %s7437_s7 }
  0x9d   : > { %p5801_p7 = scmp.ne.s32.totalorder %s6499_s18, %s5800_s16  ;;  %p5807_p3 = scmp.lt.u32.totalorder %s5805_s25, %s5800_s16 }
  0x9e   : > { %p5809_p2 = scmp.lt.u32.totalorder %s5800_s16, %s6499_s18 }
  0x9f   : > { %p5803_p5 = pnand %p5801_p7, %p6407_p9  ;;  %p5808_p13 = por %p5807_p3, %p5806_p1 }
  0xa1   : > { %p5804_p10 = pneg %p5803_p5  ;;  %p5810_p4 = por %p5809_p2, %p5808_p13 }
  0xa3   : > { %p5811_p8 = pnand %p5810_p4, %p5804_p10 }
  0xa5   : > { %5814 = shalt.err (!%p5811_p8)
}
  0xa6   : > { %s5815_s2 = scalar_lea.vmem %s625_s29, 16  ;;  %s6182_s30 = smov [#allocation11]  }
  0xa7   : > { %p5816_p0 = scmp.ne.s32.totalorder %s625_s29, %s5815_s2  ;;  %s5820_s1 = sshll.u32 %s6182_s30, 4  ;;  %s5821_s1 = int_to_ptr.vmem [resolvable:$false] %s5820_s1 }
  0xa8   : > { %s5822_s22 = scalar_lea.vmem %s5821_s1, 32  ;;  %p5823_p7 = scmp.lt.s32.totalorder %s625_s29, %s5821_s1 }
  0xa9   : > { %p5818_p11 = pnand %p5816_p0, %p6407_p9  ;;  %p5824_p5 = scmp.lt.s32.totalorder %s5822_s22, %s5815_s2 }
  0xab   : > { %p5819_p12 = pneg %p5818_p11  ;;  %p5825_p6 = por %p5824_p5, %p5823_p7 }
  0xad   : > { %p5826_p1 = pnand %p5825_p6, %p5819_p12 }
  0xaf   : > { %5829 = shalt.err (!%p5826_p1)
}
  0xb0   : > { %p7438_p3 = scmp.ne.s32.totalorder %s7428_s20, 0  ;;  %s6524_s25 = scalar_lea.hbm %s7364_s8, %s6493_s4 }
  0xb1   : > { %s634_s1 = scalar_lea.vmem [#allocation12], %s6353_s27  ;;  %s5830_s21 = scalar_lea.hbm %s6524_s25, 16 }
  0xb2   : > { %5400 = dma.hbm_to_vmem [thread:$0]  (!%p7438_p3), %s6499_s18, 16, %s625_s29, %s6401_s24  }
  0xb3   : > { %s641_s3 = sshll.u32 %s634_s1, 4  ;;  %p5831_p6 = scmp.ne.s32.totalorder %s6524_s25, %s5830_s21  ;;  %s642_s3 = int_to_ptr.vmem [resolvable:$true] %s641_s3 }
  0xb4   : > { %s5835_s18 = scalar_lea.hbm %s7364_s8, 96  ;;  %p5836_p2 = scmp.lt.u32.totalorder %s6524_s25, %s7364_s8 }
  0xb5   : > { %p5833_p10 = pnand %p5831_p6, %p6407_p9  ;;  %p5837_p4 = scmp.lt.u32.totalorder %s5835_s18, %s5830_s21 }
  0xb6   : > { %p5839_p0 = scmp.lt.u32.totalorder %s5830_s21, %s6524_s25 }
  0xb7   : > { %p5834_p13 = pneg %p5833_p10  ;;  %p5838_p8 = por %p5837_p4, %p5836_p2 }
  0xb9   : > { %p5840_p11 = por %p5839_p0, %p5838_p8 }
  0xbb   : > { %p5841_p12 = pnand %p5840_p11, %p5834_p13 }
  0xbd   : > { %5844 = shalt.err (!%p5841_p12)
}
  0xbe   : > { %s5845_s16 = scalar_lea.vmem %s642_s3, 16  ;;  %s6183_s17 = smov [#allocation12]  }
  0xbf   : > { %p5846_p7 = scmp.ne.s32.totalorder %s642_s3, %s5845_s16  ;;  %s5850_s1 = sshll.u32 %s6183_s17, 4  ;;  %s5851_s1 = int_to_ptr.vmem [resolvable:$false] %s5850_s1 }
  0xc0   : > { %s5852_s2 = scalar_lea.vmem %s5851_s1, 32  ;;  %p5853_p6 = scmp.lt.s32.totalorder %s642_s3, %s5851_s1 }
  0xc1   : > { %p5848_p5 = pnand %p5846_p7, %p6407_p9  ;;  %p5854_p10 = scmp.lt.s32.totalorder %s5852_s2, %s5845_s16 }
  0xc3   : > { %p5849_p1 = pneg %p5848_p5  ;;  %p5855_p3 = por %p5854_p10, %p5853_p6 }
  0xc5   : > { %p5856_p2 = pnand %p5855_p3, %p5849_p1 }
  0xc7   : > { %5859 = shalt.err (!%p5856_p2)
}
  0xc8   : > { %p7439_p4 = scmp.ne.s32.totalorder %s7428_s20, 0  ;;  %s6549_s18 = scalar_lea.hbm %s7365_s9, %s6493_s4 }
  0xc9   : > { %s651_s29 = scalar_lea.vmem [#allocation13], %s6353_s27  ;;  %s7403_s16 = sshll.u32 %s6353_s27, 10 }
  0xca   : > { %5403 = dma.hbm_to_vmem [thread:$0]  (!%p7439_p4), %s6524_s25, 16, %s642_s3, %s6401_s24  }
  0xcb   : > { %s658_s22 = sshll.u32 %s651_s29, 4  ;;  %s5860_s17 = scalar_lea.hbm %s6549_s18, 16  ;;  %s659_s22 = int_to_ptr.vmem [resolvable:$true] %s658_s22 }
  0xcc   : > { %p5861_p3 = scmp.ne.s32.totalorder %s6549_s18, %s5860_s17  ;;  %s5865_s3 = scalar_lea.hbm %s7365_s9, 96 }
  0xcd   : > { %p5866_p0 = scmp.lt.u32.totalorder %s6549_s18, %s7365_s9  ;;  %p5867_p11 = scmp.lt.u32.totalorder %s5865_s3, %s5860_s17 }
  0xce   : > { %p5863_p13 = pnand %p5861_p3, %p6407_p9  ;;  %p5869_p7 = scmp.lt.u32.totalorder %s5860_s17, %s6549_s18 }
  0xcf   : > { %p5868_p12 = por %p5867_p11, %p5866_p0 }
  0xd0   : > { %p5864_p8 = pneg %p5863_p13 }
  0xd1   : > { %p5870_p5 = por %p5869_p7, %p5868_p12 }
  0xd3   : > { %p5871_p1 = pnand %p5870_p5, %p5864_p8 }
  0xd5   : > { %5874 = shalt.err (!%p5871_p1)
}
  0xd6   : > { %s5875_s30 = scalar_lea.vmem %s659_s22, 16  ;;  %s6184_s29 = smov [#allocation13]  }
  0xd7   : > { %p5876_p6 = scmp.ne.s32.totalorder %s659_s22, %s5875_s30  ;;  %s5880_s0 = sshll.u32 %s6184_s29, 4  ;;  %s5881_s0 = int_to_ptr.vmem [resolvable:$false] %s5880_s0 }
  0xd8   : > { %s5882_s1 = scalar_lea.vmem %s5881_s0, 32  ;;  %p5883_p3 = scmp.lt.s32.totalorder %s659_s22, %s5881_s0 }
  0xd9   : > { %p5878_p10 = pnand %p5876_p6, %p6407_p9  ;;  %p5884_p13 = scmp.lt.s32.totalorder %s5882_s1, %s5875_s30 }
  0xdb   : > { %p5879_p2 = pneg %p5878_p10  ;;  %p5885_p4 = por %p5884_p13, %p5883_p3 }
  0xdd   : > { %p5886_p0 = pnand %p5885_p4, %p5879_p2 }
  0xdf   : > { %5889 = shalt.err (!%p5886_p0)
}
  0xe0   : > { %p7440_p11 = scmp.ne.s32.totalorder %s7428_s20, 0  ;;  %s5045_s17 = sshll.u32 %s6172_s19, 14 }
  0xe1   : > { %s6577_s2 = scalar_lea.hbm %s7366_s10, %s5045_s17  ;;  %s669_s0 = scalar_lea.vmem [#allocation14], %s7403_s16 }
  0xe2   : > { %5406 = dma.hbm_to_vmem [thread:$0]  (!%p7440_p11), %s6549_s18, 16, %s659_s22, %s6401_s24  }
  0xe3   : > { %s676_s21 = sshll.u32 %s669_s0, 4  ;;  %s5890_s30 = scalar_lea.hbm %s6577_s2, 16384  ;;  %s6581_s21 = int_to_ptr.vmem [resolvable:$true] %s676_s21 }
  0xe4   : > { %p5891_p4 = scmp.ne.s32.totalorder %s6577_s2, %s5890_s30  ;;  %s5895_s29 = scalar_lea.hbm %s7366_s10, 98304 }
  0xe5   : > { %p5896_p7 = scmp.lt.u32.totalorder %s6577_s2, %s7366_s10  ;;  %p5897_p5 = scmp.lt.u32.totalorder %s5895_s29, %s5890_s30 }
  0xe6   : > { %p5893_p8 = pnand %p5891_p4, %p6407_p9  ;;  %p5899_p6 = scmp.lt.u32.totalorder %s5890_s30, %s6577_s2 }
  0xe7   : > { %p5898_p1 = por %p5897_p5, %p5896_p7 }
  0xe8   : > { %p5894_p12 = pneg %p5893_p8 }
  0xe9   : > { %p5900_p10 = por %p5899_p6, %p5898_p1 }
  0xeb   : > { %p5901_p2 = pnand %p5900_p10, %p5894_p12 }
  0xed   : > { %5904 = shalt.err (!%p5901_p2)
}
  0xee   : > { %s5905_s3 = scalar_lea.vmem %s6581_s21, 16384  ;;  %s6185_s0 = smov [#allocation14]  }
  0xef   : > { %p5906_p3 = scmp.ne.s32.totalorder %s6581_s21, %s5905_s3  ;;  %s5910_s18 = sshll.u32 %s6185_s0, 4  ;;  %s5911_s18 = int_to_ptr.vmem [resolvable:$false] %s5910_s18 }
  0xf0   : > { %s5912_s22 = scalar_lea.vmem %s5911_s18, 32768  ;;  %p5913_p4 = scmp.lt.s32.totalorder %s6581_s21, %s5911_s18 }
  0xf1   : > { %p5908_p13 = pnand %p5906_p3, %p6407_p9  ;;  %p5914_p8 = scmp.lt.s32.totalorder %s5912_s22, %s5905_s3 }
  0xf3   : > { %p5909_p0 = pneg %p5908_p13  ;;  %p5915_p7 = por %p5914_p8, %p5913_p4 }
  0xf5   : > { %p5916_p5 = pnand %p5915_p7, %p5909_p0 }
  0xf7   : > { %5919 = shalt.err (!%p5916_p5)
}
  0xf8   : > { %s6186_s30 = smov 1024   ;;  %s7441_s29 = smov 64  }
  0xf9   : > { %5409 = dma.hbm_to_vmem [thread:$0]  (!%p7440_p11), %s6577_s2, 16384, %s6581_s21, %s6401_s24, %s6186_s30, %s6186_s30, %s7441_s29  }
  0xfa   : > { %s4716_s1 = sshll.u32 %s6353_s27, 4  ;;  %s5046_s25 = sshll.u32 %s6172_s19, 8 }
  0xfb   : > { %s6611_s3 = scalar_lea.hbm %s7367_s11, %s5046_s25  ;;  %s690_s22 = scalar_lea.vmem [#allocation15], %s4716_s1 }
  0xfc   : > { %s698_s16 = sshll.u32 %s690_s22, 4  ;;  %s6618_s7 = scalar_lea.hbm %s7368_s12, %s5045_s17  ;;  %s699_s16 = int_to_ptr.vmem [resolvable:$true] %s698_s16 }
  0xfd   : > { %s5920_s2 = scalar_lea.hbm %s6611_s3, 256  ;;  %s5925_s25 = scalar_lea.hbm %s7367_s11, 1536 }
  0xfe   : > { %p5921_p12 = scmp.ne.s32.totalorder %s6611_s3, %s5920_s2  ;;  %p5926_p10 = scmp.lt.u32.totalorder %s6611_s3, %s7367_s11 }
  0xff   : > { %p5927_p2 = scmp.lt.u32.totalorder %s5925_s25, %s5920_s2  ;;  %p5929_p13 = scmp.lt.u32.totalorder %s5920_s2, %s6611_s3 }
 0x100   : > { %p5923_p1 = pnand %p5921_p12, %p6407_p9 }
 0x101   : > { %p5928_p3 = por %p5927_p2, %p5926_p10 }
 0x102   : > { %p5924_p6 = pneg %p5923_p1 }
 0x103   : > { %p5930_p0 = por %p5929_p13, %p5928_p3 }
 0x105   : > { %p5931_p4 = pnand %p5930_p0, %p5924_p6 }
 0x107   : > { %5934 = shalt.err (!%p5931_p4)
}
 0x108   : > { %s5935_s5 = scalar_lea.vmem %s699_s16, 256  ;;  %s6187_s6 = smov [#allocation15]  }
 0x109   : > { %p5936_p8 = scmp.ne.s32.totalorder %s699_s16, %s5935_s5  ;;  %s5940_s19 = sshll.u32 %s6187_s6, 4  ;;  %s5941_s19 = int_to_ptr.vmem [resolvable:$false] %s5940_s19 }
 0x10a   : > { %s5942_s17 = scalar_lea.vmem %s5941_s19, 512  ;;  %p5943_p12 = scmp.lt.s32.totalorder %s699_s16, %s5941_s19 }
 0x10b   : > { %p5938_p7 = pnand %p5936_p8, %p6407_p9  ;;  %p5944_p1 = scmp.lt.s32.totalorder %s5942_s17, %s5935_s5 }
 0x10d   : > { %p5939_p5 = pneg %p5938_p7  ;;  %p5945_p11 = por %p5944_p1, %p5943_p12 }
 0x10f   : > { %p5946_p2 = pnand %p5945_p11, %p5939_p5 }
 0x111   : > { %5949 = shalt.err (!%p5946_p2)
}
 0x112   : > { %p7442_p10 = scmp.ne.s32.totalorder %s7428_s20, 0  ;;  %s7443_s1 = sshll.u32 %s6353_s27, 10 }
 0x113   : > { %s709_s22 = scalar_lea.vmem [#allocation16], %s7443_s1  ;;  %s6646_s25 = scalar_lea.hbm %s7369_s13, %s6493_s4 }
 0x114   : > { %5412 = dma.hbm_to_vmem [thread:$0]  (!%p7442_p10), %s6611_s3, 256, %s699_s16, %s6401_s24  }
 0x115   : > { %s716_s2 = sshll.u32 %s709_s22, 4  ;;  %s5950_s0 = scalar_lea.hbm %s6618_s7, 16384  ;;  %s6640_s2 = int_to_ptr.vmem [resolvable:$true] %s716_s2 }
 0x116   : > { %p5951_p11 = scmp.ne.s32.totalorder %s6618_s7, %s5950_s0  ;;  %s5955_s6 = scalar_lea.hbm %s7368_s12, 98304 }
 0x117   : > { %p5956_p13 = scmp.lt.u32.totalorder %s6618_s7, %s7368_s12  ;;  %p5957_p0 = scmp.lt.u32.totalorder %s5955_s6, %s5950_s0 }
 0x118   : > { %p5953_p6 = pnand %p5951_p11, %p6407_p9  ;;  %p5959_p8 = scmp.lt.u32.totalorder %s5950_s0, %s6618_s7 }
 0x119   : > { %p5958_p4 = por %p5957_p0, %p5956_p13 }
 0x11a   : > { %p5954_p3 = pneg %p5953_p6 }
 0x11b   : > { %p5960_p7 = por %p5959_p8, %p5958_p4 }
 0x11d   : > { %p5961_p5 = pnand %p5960_p7, %p5954_p3 }
 0x11f   : > { %5964 = shalt.err (!%p5961_p5)
}
 0x120   : > { %s5965_s19 = scalar_lea.vmem %s6640_s2, 16384  ;;  %s6188_s17 = smov [#allocation16]  }
 0x121   : > { %p5966_p12 = scmp.ne.s32.totalorder %s6640_s2, %s5965_s19  ;;  %s5970_s1 = sshll.u32 %s6188_s17, 4  ;;  %s5971_s1 = int_to_ptr.vmem [resolvable:$false] %s5970_s1 }
 0x122   : > { %s5972_s22 = scalar_lea.vmem %s5971_s1, 32768  ;;  %p5973_p11 = scmp.lt.s32.totalorder %s6640_s2, %s5971_s1 }
 0x123   : > { %p5968_p1 = pnand %p5966_p12, %p6407_p9  ;;  %p5974_p6 = scmp.lt.s32.totalorder %s5972_s22, %s5965_s19 }
 0x125   : > { %p5969_p2 = pneg %p5968_p1  ;;  %p5975_p13 = por %p5974_p6, %p5973_p11 }
 0x127   : > { %p5976_p0 = pnand %p5975_p13, %p5969_p2 }
 0x129   : > { %5979 = shalt.err (!%p5976_p0)
}
 0x12a   : > { %s7444_s21 = smov 4   ;;  %s729_s30 = scalar_lea.vmem [#allocation17], %s6353_s27 }
 0x12b   : > { %5415 = dma.hbm_to_vmem [thread:$0]  (!%p7442_p10), %s6618_s7, 16384, %s6640_s2, %s6401_s24, %s7441_s29, %s7441_s29, %s7444_s21  }
 0x12c   : > { %s736_s0 = sshll.u32 %s729_s30, 4  ;;  %s6189_s18 = smov [#allocation6]   ;;  %s6674_s0 = int_to_ptr.vmem [resolvable:$true] %s736_s0 }
 0x12d   : > { %s519_s5 = sshll.u32 %s6189_s18, 4  ;;  %s5980_s6 = scalar_lea.hbm %s6646_s25, 16  ;;  %s520_s5 = int_to_ptr.vmem [resolvable:$true] %s519_s5 }
 0x12e   : > { %p5981_p3 = scmp.ne.s32.totalorder %s6646_s25, %s5980_s6  ;;  %s5985_s19 = scalar_lea.hbm %s7369_s13, 96 }
 0x12f   : > { %p5986_p7 = scmp.lt.u32.totalorder %s6646_s25, %s7369_s13  ;;  %p5987_p5 = scmp.lt.u32.totalorder %s5985_s19, %s5980_s6 }
 0x130   : > { %p5983_p4 = pnand %p5981_p3, %p6407_p9  ;;  %p5989_p1 = scmp.lt.u32.totalorder %s5980_s6, %s6646_s25 }
 0x131   : > { %p5988_p12 = por %p5987_p5, %p5986_p7 }
 0x132   : > { %p5984_p8 = pneg %p5983_p4 }
 0x133   : > { %p5990_p2 = por %p5989_p1, %p5988_p12 }
 0x135   : > { %p5991_p11 = pnand %p5990_p2, %p5984_p8 }
 0x137   : > { %5994 = shalt.err (!%p5991_p11)
}
 0x138   : > { %s5995_s7 = scalar_lea.vmem %s6674_s0, 16  ;;  %s6190_s2 = smov [#allocation17]  }
 0x139   : > { %p5996_p6 = scmp.ne.s32.totalorder %s6674_s0, %s5995_s7  ;;  %s6000_s22 = sshll.u32 %s6190_s2, 4  ;;  %s6001_s22 = int_to_ptr.vmem [resolvable:$false] %s6000_s22 }
 0x13a   : > { %s6002_s30 = scalar_lea.vmem %s6001_s22, 32  ;;  %p6003_p3 = scmp.lt.s32.totalorder %s6674_s0, %s6001_s22 }
 0x13b   : > { %p5998_p13 = pnand %p5996_p6, %p6407_p9  ;;  %p6004_p4 = scmp.lt.s32.totalorder %s6002_s30, %s5995_s7 }
 0x13d   : > { %p5999_p0 = pneg %p5998_p13  ;;  %p6005_p7 = por %p6004_p4, %p6003_p3 }
 0x13f   : > { %p6006_p5 = pnand %p6005_p7, %p5999_p0 }
 0x141   : > { %6009 = shalt.err (!%p6006_p5)
}
 0x142   : > { %5418 = dma.hbm_to_vmem [thread:$0]  (!%p7442_p10), %s6646_s25, 16, %s6674_s0, %s6401_s24  }
 0x143   : > { %s7445_s16 = sld [smem:[#allocation33_spill]]  ;;  %p7446_p12 = scmp.ne.s32.totalorder %s7430_s23, 0 }
 0x149   : > { %s6010_s3 = scalar_lea.hbm %s7445_s16, 128 }
 0x14a   : > { %p6011_p8 = scmp.ne.s32.totalorder %s7445_s16, %s6010_s3  ;;  %p6017_p11 = scmp.lt.u32.totalorder %s6010_s3, %s7445_s16 }
 0x14c   : > { %p6013_p1 = pnand %p6011_p8, %p7446_p12 }
 0x14e   : > { %p6014_p2 = pneg %p6013_p1 }
 0x150   : > { %p6019_p6 = pnand %p6017_p11, %p6014_p2 }
 0x152   : > { %6022 = shalt.err (!%p6019_p6)
}
 0x153   : > { %s6023_s2 = scalar_lea.vmem %s520_s5, 128  ;;  %p6031_p4 = scmp.lt.s32.totalorder %s520_s5, %s520_s5 }
 0x154   : > { %p6024_p13 = scmp.ne.s32.totalorder %s520_s5, %s6023_s2  ;;  %p6032_p7 = scmp.lt.s32.totalorder %s6023_s2, %s6023_s2 }
 0x156   : > { %p6026_p0 = pnand %p6024_p13, %p7446_p12  ;;  %p6033_p5 = por %p6032_p7, %p6031_p4 }
 0x158   : > { %p6027_p3 = pneg %p6026_p0 }
 0x15a   : > { %p6034_p10 = pnand %p6033_p5, %p6027_p3 }
 0x15c   : > { %6037 = shalt.err (!%p6034_p10)
}
 0x15d   : > { %p7447_p8 = scmp.ne.s32.totalorder %s7427_s28, 0  ;;  %s6723_s18 = scalar_lea.hbm %s7370_s14, %s6493_s4 }
 0x15e   : > { %s746_s6 = scalar_lea.vmem [#allocation18], %s6353_s27  ;;  %s6038_s19 = scalar_lea.hbm %s6723_s18, 16 }
 0x15f   : > { %5384 = dma.hbm_to_vmem [thread:$0]  (!%p7447_p8), %s7445_s16, 128, %s520_s5, [#allocation7], %s7441_s29, %s7441_s29, %s7444_s21  }
 0x160   : > { %s753_s3 = sshll.u32 %s746_s6, 4  ;;  %p6039_p10 = scmp.ne.s32.totalorder %s6723_s18, %s6038_s19  ;;  %s754_s3 = int_to_ptr.vmem [resolvable:$true] %s753_s3 }
 0x161   : > { %s6043_s29 = scalar_lea.hbm %s7370_s14, 96  ;;  %p6044_p11 = scmp.lt.u32.totalorder %s6723_s18, %s7370_s14 }
 0x162   : > { %p6041_p1 = pnand %p6039_p10, %p6407_p9  ;;  %p6045_p6 = scmp.lt.u32.totalorder %s6043_s29, %s6038_s19 }
 0x163   : > { %p6047_p0 = scmp.lt.u32.totalorder %s6038_s19, %s6723_s18 }
 0x164   : > { %p6042_p2 = pneg %p6041_p1  ;;  %p6046_p13 = por %p6045_p6, %p6044_p11 }
 0x166   : > { %p6048_p3 = por %p6047_p0, %p6046_p13 }
 0x168   : > { %p6049_p4 = pnand %p6048_p3, %p6042_p2 }
 0x16a   : > { %6052 = shalt.err (!%p6049_p4)
}
 0x16b   : > { %s6053_s7 = scalar_lea.vmem %s754_s3, 16  ;;  %s6191_s2 = smov [#allocation18]  }
 0x16c   : > { %p6054_p7 = scmp.ne.s32.totalorder %s754_s3, %s6053_s7  ;;  %s6058_s25 = sshll.u32 %s6191_s2, 4  ;;  %s6059_s25 = int_to_ptr.vmem [resolvable:$false] %s6058_s25 }
 0x16d   : > { %s6060_s0 = scalar_lea.vmem %s6059_s25, 32  ;;  %p6061_p1 = scmp.lt.s32.totalorder %s754_s3, %s6059_s25 }
 0x16e   : > { %p6056_p5 = pnand %p6054_p7, %p6407_p9  ;;  %p6062_p8 = scmp.lt.s32.totalorder %s6060_s0, %s6053_s7 }
 0x170   : > { %p6057_p10 = pneg %p6056_p5  ;;  %p6063_p12 = por %p6062_p8, %p6061_p1 }
 0x172   : > { %p6064_p6 = pnand %p6063_p12, %p6057_p10 }
 0x174   : > { %6067 = shalt.err (!%p6064_p6)
}
 0x175   : > { %p7448_p11 = scmp.ne.s32.totalorder %s7428_s20, 0  ;;  %s6192_s22 = smov [#allocation20]  }
 0x176   : > { %s539_s30 = sshll.u32 %s6192_s22, 4  ;;  %s6748_s17 = scalar_lea.hbm %s7371_s15, %s6493_s4  ;;  %s540_s30 = int_to_ptr.vmem [resolvable:$true] %s539_s30 }
 0x177   : > { %5421 = dma.hbm_to_vmem [thread:$0]  (!%p7448_p11), %s6723_s18, 16, %s754_s3, %s6401_s24  }
 0x178   : > { %s7449_s21 = sld [smem:[#allocation40_spill]]  ;;  %p7450_p8 = scmp.ne.s32.totalorder %s7430_s23, 0 }
 0x17e   : > { %s6068_s5 = scalar_lea.hbm %s7449_s21, 16 }
 0x17f   : > { %p6069_p12 = scmp.ne.s32.totalorder %s7449_s21, %s6068_s5  ;;  %p6075_p0 = scmp.lt.u32.totalorder %s6068_s5, %s7449_s21 }
 0x181   : > { %p6071_p2 = pnand %p6069_p12, %p7450_p8 }
 0x183   : > { %p6072_p13 = pneg %p6071_p2 }
 0x185   : > { %p6077_p3 = pnand %p6075_p0, %p6072_p13 }
 0x187   : > { %6080 = shalt.err (!%p6077_p3)
}
 0x188   : > { %s6081_s25 = scalar_lea.vmem %s540_s30, 16  ;;  %s6088_s4 = scalar_lea.vmem %s540_s30, 32 }
 0x189   : > { %p6082_p4 = scmp.ne.s32.totalorder %s540_s30, %s6081_s25  ;;  %p6089_p10 = scmp.lt.s32.totalorder %s540_s30, %s540_s30 }
 0x18a   : > { %p6090_p1 = scmp.lt.s32.totalorder %s6088_s4, %s6081_s25 }
 0x18b   : > { %p6084_p7 = pnand %p6082_p4, %p7450_p8 }
 0x18c   : > { %p6091_p6 = por %p6090_p1, %p6089_p10 }
 0x18d   : > { %p6085_p5 = pneg %p6084_p7 }
 0x18f   : > { %p6092_p11 = pnand %p6091_p6, %p6085_p5 }
 0x191   : > { %6095 = shalt.err (!%p6092_p11)
}
 0x192   : > { %p7451_p12 = scmp.ne.s32.totalorder %s7427_s28, 0  ;;  %s763_s23 = scalar_lea.vmem [#allocation19], %s6353_s27 }
 0x193   : > { %s770_s6 = sshll.u32 %s763_s23, 4  ;;  %s6096_s19 = scalar_lea.hbm %s6748_s17, 16  ;;  %s771_s6 = int_to_ptr.vmem [resolvable:$true] %s770_s6 }
 0x194   : > { %5387 = dma.hbm_to_vmem [thread:$0]  (!%p7451_p12), %s7449_s21, 16, %s540_s30, [#allocation7]  }
 0x195   : > { %p6097_p8 = scmp.ne.s32.totalorder %s6748_s17, %s6096_s19  ;;  %s6101_s29 = scalar_lea.hbm %s7371_s15, 96 }
 0x196   : > { %p6102_p13 = scmp.lt.u32.totalorder %s6748_s17, %s7371_s15  ;;  %p6103_p0 = scmp.lt.u32.totalorder %s6101_s29, %s6096_s19 }
 0x197   : > { %p6099_p2 = pnand %p6097_p8, %p6407_p9  ;;  %p6105_p4 = scmp.lt.u32.totalorder %s6096_s19, %s6748_s17 }
 0x198   : > { %p6104_p3 = por %p6103_p0, %p6102_p13 }
 0x199   : > { %p6100_p11 = pneg %p6099_p2 }
 0x19a   : > { %p6106_p7 = por %p6105_p4, %p6104_p3 }
 0x19c   : > { %p6107_p5 = pnand %p6106_p7, %p6100_p11 }
 0x19e   : > { %6110 = shalt.err (!%p6107_p5)
}
 0x19f   : > { %s6111_s27 = scalar_lea.vmem %s771_s6, 16  ;;  %s6193_s30 = smov [#allocation19]  }
 0x1a0   : > { %p6112_p10 = scmp.ne.s32.totalorder %s771_s6, %s6111_s27  ;;  %s6116_s2 = sshll.u32 %s6193_s30, 4  ;;  %s6117_s2 = int_to_ptr.vmem [resolvable:$false] %s6116_s2 }
 0x1a1   : > { %s6118_s18 = scalar_lea.vmem %s6117_s2, 32  ;;  %p6119_p12 = scmp.lt.s32.totalorder %s771_s6, %s6117_s2 }
 0x1a2   : > { %p6114_p1 = pnand %p6112_p10, %p6407_p9  ;;  %p6120_p8 = scmp.lt.s32.totalorder %s6118_s18, %s6111_s27 }
 0x1a4   : > { %p6115_p6 = pneg %p6114_p1  ;;  %p6121_p2 = por %p6120_p8, %p6119_p12 }
 0x1a6   : > { %p6122_p0 = pnand %p6121_p2, %p6115_p6 }
 0x1a8   : > { %6125 = shalt.err (!%p6122_p0)
}
 0x1a9   : > { %p7452_p13 = scmp.ne.s32.totalorder %s7428_s20, 0  ;;  %s7453_s3 = sld [smem:[#allocation31_spill]] }
 0x1ab   : > { %5424 = dma.hbm_to_vmem [thread:$0]  (!%p7452_p13), %s6748_s17, 16, %s771_s6, %s6401_s24  }
 0x1af   : > { %p7454_p11 = scmp.ne.s32.totalorder %s7453_s3, 0 }
 0x1b0   : > { %s7455_s26 = sld [smem:[#allocation27_spill]] (!%p7454_p11) }
 0x1b1   : > { %779 = sbr.rel (%p7454_p11) target bundleno = 3228 (0xc9c), region = 92 }
 0x1b6   : > { %p7456_p9 = scmp.eq.s32.totalorder (!%p7454_p11), %s7455_s26, 0 }
 0x1b8   : > { %6143 = dma.done.wait (%p7456_p9), [#allocation5], 128   ;;  %p7457_p3 = pmov %p7456_p9 }
 0x1ba   : > { %6145 = vsyncadd (%p7457_p3), [#allocation5], 4294967168  ;;  %p7458_p4 = pmov %p7457_p3 }
 0x1bb   : > { %p7459_p7 = pmov %p7457_p3 }
 0x1bc   : > { %6147 = dma.done.wait (%p7458_p4), [#allocation7], 128  }
 0x1bd   : > { %6149 = vsyncadd (%p7459_p7), [#allocation7], 4294967168  ;;  %s7460_s20 = sld [smem:[#allocation25_spill]]  ;;  %s7461_s25 = sld [smem:[#allocation30_spill]] }
 0x1be   : > { %s789_s4 = sand.u32 1, %s7455_s26  }
 0x1bf   : > { %s790_s0 = scalar_lea.sflag [#allocation5], %s789_s4 }
 0x1c3   : > { %s6799_s24 = sand.u32 1, %s7460_s20   ;;  %p7462_p5 = scmp.ne.s32.totalorder %s7461_s25, 0 }
 0x1c4   : > { %s5340_s17 = smul.u32 192, %s6799_s24 }
 0x1c6   : > { %s6802_s22 = scalar_lea.vmem [#allocation8], %s5340_s17 }
 0x1c7   : > { %6151 = dma.done.wait (%p7462_p5), %s790_s0, 37264  }
 0x1c8   : > { %6153 = vsyncadd (%p7462_p5), %s790_s0, 4294930032  ;;  %s5341_s23 = smul.u32 3, %s6799_s24  ;;  %s4728_s6 = sshll.u32 %s6799_s24, 6 }
 0x1c9   : > { %s4729_s19 = sshll.u32 %s6799_s24, 10  ;;  %s4730_s1 = sshll.u32 %s6799_s24, 4 }
 0x1ca   : > { %s6812_s28 = scalar_lea.vmem [#allocation9], %s5341_s23  ;;  %s6814_s29 = scalar_lea.vmem [#allocation10], %s4728_s6 }
 0x1cb   : > { %s819_s5 = scalar_lea.vmem [#allocation11], %s6799_s24  ;;  %s827_s7 = scalar_lea.vmem [#allocation12], %s6799_s24 }
 0x1cc   : > { %s835_s27 = scalar_lea.vmem [#allocation13], %s6799_s24  ;;  %s6819_s30 = scalar_lea.vmem [#allocation14], %s4729_s19 }
 0x1cd   : > { %s6821_s2 = scalar_lea.vmem [#allocation15], %s4730_s1  ;;  %s6823_s18 = scalar_lea.vmem [#allocation16], %s4729_s19 }
 0x1ce   : > { %s870_s3 = scalar_lea.vmem [#allocation17], %s6799_s24  ;;  %s878_s20 = scalar_lea.vmem [#allocation18], %s6799_s24 }
 0x1cf   : > { %s886_s25 = scalar_lea.vmem [#allocation19], %s6799_s24  ;;  %p7463_p10 = pmov %p7457_p3 }
 0x1d0   : > { %p7464_p1 = pmov %p7457_p3 }
 0x1d1   : > { %6155 = dma.done.wait (%p7463_p10), [#allocation7], 16  }
 0x1d2   : > { %6157 = vsyncadd (%p7464_p1), [#allocation7], 4294967280  ;;  %p7465_p6 = scmp.ne.s32.totalorder %s7455_s26, 0 }
 0x1d3   : > { %vm1012_vm0 = vcmask (!%p7465_p6), 1046528   ;;  %v6194_v1 = vmov (!%p7465_p6), 0.0   ;;  %v5477_v2 = vld [vmem:[#allocation6] sm:$0x7f] (!%p7465_p6)   ;;  %v992_v3 = vld [vmem:[#allocation4] sm:$0xff] (!%p7465_p6)  ;;  %vm6195_vm1 = vmmov (!%p7465_p6), 0  }
 0x1d4   : > { %991 = sbr.rel (%p7465_p6) target bundleno = 687 (0x2af), region = 156  ;;  %5262 = vmatprep.subr.bf16.mxu0 (!%p7465_p6), %v6194_v1  ;;  %5264 = vmatprep.mubr.msk.bf16.mxu0 (!%p7465_p6), %vm6195_vm1, %v6194_v1  ;;  %v1014_v4 = vsel (!%p7465_p6), %vm1012_vm0, %v5477_v2, 0  ;;  %v993_v5 = vpack.c.bf16 (!%p7465_p6), %v992_v3, %v992_v3  ;;  %vm1008_vm2 = vcmask (!%p7465_p6), 113664   ;;  %s7466_s0 = sld [smem:[#allocation34_spill]] (!%p7465_p6) }
 0x1d5   : > { %5263 = vmatpush3.bf16.msra.mxu0 (!%p7465_p6), %v1014_v4 }
 0x1d8   : > { %5265 = vmatmul.mubr.msk.bf16.vlgmr.msra.gmra.mrb[0].mxu0 (!%p7465_p6), %vm1008_vm2, %v993_v5 }
 0x1da   : > { %v4734_v6 = vld [vmem:[%s7466_s0] ss:$0 sm:$0xff] (!%p7465_p6) }
 0x2ab   : > { %v1050_v7 = vpop.f32.mrb[0].mxu0 }
 0x2ac   : > { %v1051_v8 = vadd.f32 %v4734_v6, %v1050_v7  ;;  %v5266_v9 = vpop.f32.mrb[1].mxu0 }
 0x2ad   : > { %v1053_v10 = vpop.f32.mrb[2].mxu0 }
 0x2ae   : > { %1056 = vst [vmem:[#allocation2] sm:$0xff] %v1051_v8  ;;  %v5267_v11 = vpop.f32.mrb[3].mxu0 }
 0x2af PF: > { %v5478_v12 = vld [vmem:[%s6802_s22 + $0x4] ss:$12 sps:$4 sm:$0xff]   ;;  %v5480_v13 = vld [vmem:[%s6802_s22] ss:$12 sps:$4 sm:$0xff]   ;;  %v6196_v14 = vmov 0   ;;  %v6197_v15 = vmov 0.0   ;;  %v1093_v40 = vlaneseq }
 0x2b0   : > { %1268 = vmatprep.mubr.bf16.mxu0 %v6196_v14  ;;  %5268 = vmatprep.subr.bf16.mxu1 %v6197_v15  ;;  %v5481_v16 = vld [vmem:[%s6802_s22 + $0x1c] ss:$12 sps:$4 sm:$0xff]   ;;  %vm6198_vm3 = vmmov 0   ;;  %v5483_v17 = vld [vmem:[%s6802_s22 + $0x18] ss:$12 sps:$4 sm:$0xff]   ;;  %s7467_s23 = sld [smem:[#allocation35_spill]] }
 0x2b1   : > { %1236 = vmatprep.subr.bf16.mxu0 %v5478_v12  ;;  %5284 = vmatprep.mubr.msk.bf16.mxu1 %vm6198_vm3, %v6197_v15  ;;  %v5484_v18 = vld [vmem:[%s6802_s22 + $0x34] ss:$12 sps:$4 sm:$0xff]   ;;  %v5486_v19 = vld [vmem:[%s6802_s22 + $0x30] ss:$12 sps:$4 sm:$0xff]   ;;  %v5487_v20 = vld [vmem:[%s6802_s22 + $0x4c] ss:$12 sps:$4 sm:$0xff]  }
 0x2b2   : > { %1237 = vmatpush1.bf16.msra.mxu0 %v5480_v13  ;;  %v5489_v21 = vld [vmem:[%s6802_s22 + $0x48] ss:$12 sps:$4 sm:$0xff]   ;;  %v5490_v23 = vld [vmem:[%s6802_s22 + $0x64] ss:$12 sps:$4 sm:$0xff]   ;;  %v5503_v24 = vld [vmem:[%s6802_s22 + $0x20] ss:$12 sps:$4 sm:$0xff]  }
 0x2b3   : > { %1238 = vmatprep.subr.bf16.mxu0 %v5481_v16  ;;  %v5502_v22 = vld [vmem:[%s6802_s22 + $0x8] ss:$12 sps:$4 sm:$0xff]   ;;  %v5492_v25 = vld [vmem:[%s6802_s22 + $0x60] ss:$12 sps:$4 sm:$0xff]   ;;  %v5495_v27 = vld [vmem:[%s6802_s22 + $0x78] ss:$12 sps:$4 sm:$0xff]  }
 0x2b4   : > { %5269 = vmatpush3.bf16.msra.mxu1 %v5502_v22  ;;  %v5493_v26 = vld [vmem:[%s6802_s22 + $0x7c] ss:$12 sps:$4 sm:$0xff]   ;;  %v5504_v28 = vld [vmem:[%s6802_s22 + $0x38] ss:$12 sps:$4 sm:$0xff]   ;;  %v5496_v29 = vld [vmem:[%s6802_s22 + $0x94] ss:$12 sps:$4 sm:$0xff]  }
 0x2b5   : > { %5270 = vmatprep.subr.bf16.mxu1 %v6197_v15  ;;  %v5505_v30 = vld [vmem:[%s6802_s22 + $0x50] ss:$12 sps:$4 sm:$0xff]   ;;  %v5499_v32 = vld [vmem:[%s6802_s22 + $0xac] ss:$12 sps:$4 sm:$0xff]   ;;  %v5506_v33 = vld [vmem:[%s6802_s22 + $0x68] ss:$12 sps:$4 sm:$0xff]  }
 0x2b6   : > { %1239 = vmatpush1.bf16.msra.mxu0 %v5483_v17  ;;  %v5498_v31 = vld [vmem:[%s6802_s22 + $0x90] ss:$12 sps:$4 sm:$0xff]   ;;  %v5501_v34 = vld [vmem:[%s6802_s22 + $0xa8] ss:$12 sps:$4 sm:$0xff]   ;;  %v5507_v36 = vld [vmem:[%s6802_s22 + $0x80] ss:$12 sps:$4 sm:$0xff]  }
 0x2b7   : > { %1240 = vmatprep.subr.bf16.mxu0 %v5484_v18  ;;  %v6865_v35 = vld [vmem:[#allocation2] sm:$0xff]  ;;  %v5509_v39 = vld [vmem:[%s6802_s22 + $0xb0] ss:$12 sps:$4 sm:$0xff]   ;;  %v6879_v41 = vshrl.u32 %v1093_v40, 7  ;;  %v1091_v43 = vld [vmem:[%s6812_s28] sm:$0x7] }
 0x2b8   : > { %5271 = vmatpush3.bf16.msra.mxu1 %v5503_v24  ;;  %v1058_v37 = vpack.c.bf16 %v6865_v35, %v6865_v35  ;;  %v5508_v38 = vld [vmem:[%s6802_s22 + $0x98] ss:$12 sps:$4 sm:$0xff]   ;;  %v6898_v53 = vld [vmem:[%s7467_s23 + $0x8] sm:$0xff]  ;;  %vm1439_vm4 = vcmask 64512  }
 0x2b9   : > { %5272 = vmatprep.subr.bf16.mxu1 %v6197_v15  ;;  %v6882_v42 = vsub.s32 0, %v6879_v41  ;;  %v6886_v44 = vsub.s32 1, %v6879_v41  ;;  %v6893_v52 = vld [vmem:[%s7467_s23] sm:$0xff]  ;;  %v6901_v56 = vsub.s32 2, %v6879_v41  ;;  %v6906_v57 = vld [vmem:[%s7467_s23 + $0x10] sm:$0xff]  ;;  %v6914_v61 = vld [vmem:[%s7467_s23 + $0x18] sm:$0xff] }
 0x2ba   : > { %1241 = vmatpush1.bf16.msra.mxu0 %v5486_v19  ;;  %v6920_v63 = vld [vmem:[%s7467_s23 + $0x20] sm:$0xff]  ;;  %v6927_v3 = vld [vmem:[%s7467_s23 + $0x28] sm:$0xff]  ;;  %v6932_v6 = vld [vmem:[%s7467_s23 + $0x30] sm:$0xff] }
 0x2bb   : > { %1242 = vmatprep.subr.bf16.mxu0 %v5487_v20  ;;  %v1096_v45 = vrot.slane %v1091_v43, %v6882_v42  ;;  %v1100_v46 = vrot.slane %v1091_v43, %v6886_v44  ;;  %v1104_v62 = vrot.slane %v1091_v43, %v6901_v56  ;;  %v6939_v11 = vld [vmem:[%s7467_s23 + $0x38] sm:$0xff] }
 0x2bc   : > { %5273 = vmatpush3.bf16.msra.mxu1 %v5504_v28 }
 0x2bd   : > { %5274 = vmatprep.subr.bf16.mxu1 %v6197_v15 }
 0x2be   : > { %1243 = vmatpush1.bf16.msra.mxu0 %v5489_v21 }
 0x2bf   : > { %1244 = vmatprep.subr.bf16.mxu0 %v5490_v23 }
 0x2c0   : > { %5275 = vmatpush3.bf16.msra.mxu1 %v5505_v30 }
 0x2c1   : > { %5276 = vmatprep.subr.bf16.mxu1 %v6197_v15 }
 0x2c2   : > { %1245 = vmatpush1.bf16.msra.mxu0 %v5492_v25 }
 0x2c3   : > { %1246 = vmatprep.subr.bf16.mxu0 %v5493_v26 }
 0x2c4   : > { %5277 = vmatpush3.bf16.msra.mxu1 %v5506_v33 }
 0x2c5   : > { %5278 = vmatprep.subr.bf16.mxu1 %v6197_v15 }
 0x2c6   : > { %1247 = vmatpush1.bf16.msra.mxu0 %v5495_v27 }
 0x2c7   : > { %1248 = vmatprep.subr.bf16.mxu0 %v5496_v29 }
 0x2c8   : > { %5279 = vmatpush3.bf16.msra.mxu1 %v5507_v36 }
 0x2c9   : > { %5280 = vmatprep.subr.bf16.mxu1 %v6197_v15 }
 0x2ca   : > { %1249 = vmatpush1.bf16.msra.mxu0 %v5498_v31 }
 0x2cb   : > { %1250 = vmatprep.subr.bf16.mxu0 %v5499_v32 }
 0x2cc   : > { %5281 = vmatpush3.bf16.msra.mxu1 %v5508_v38 }
 0x2cd   : > { %5282 = vmatprep.subr.bf16.mxu1 %v6197_v15 }
 0x2ce   : > { %1251 = vmatpush1.bf16.msra.mxu0 %v5501_v34 }
 0x2cf   : > { %5316 = vmatprep.subr.bf16.mxu0 %v6197_v15 }
 0x2d0   : > { %5283 = vmatpush3.bf16.msra.mxu1 %v5509_v39 }
 0x2d1   : > { %1269 = vmatmul.mubr.bf16.vlgmr.msra.gmra.mrb[0].mxu0 %v1058_v37 }
 0x2d2   : > { %5332 = vmatprep.mubr.msk.bf16.mxu0 %vm6198_vm3, %v6197_v15 }
 0x2d3   : > { %5285 = vmatmul.mubr.bf16.vlgmr.msra.gmra.mrb[0].mxu1 %v1058_v37 }
 0x3a4   : > { %v1270_v47 = vpop.f32.mrb[0].mxu0 }
 0x3a5   : > { %v1271_v48 = vadd.f32 %v1270_v47, %v1096_v45  ;;  %v1272_v49 = vpop.f32.mrb[1].mxu0 }
 0x3a6   : > { %v1273_v50 = vadd.f32 %v1272_v49, %v1100_v46  ;;  %v1274_v51 = vpop.f32.mrb[2].mxu0  ;;  %v1311_v1 = vpop.f32.mrb[0].mxu1 }
 0x3a7   : > { %v1317_v54 = vmul.f32 0.25, %v1271_v48  ;;  %v1275_v55 = vpop.f32.mrb[3].mxu0  ;;  %v1312_v4 = vadd.f32 %v1311_v1, %v1104_v62  ;;  %v5286_v5 = vpop.f32.mrb[1].mxu1 }
 0x3a8   : > { %5288 = vmatprep.subr.mxu1 %v1273_v50  ;;  %v1314_v7 = vpop.f32.mrb[2].mxu1 }
 0x3a9   : > { %5289 = vmatpush3.xpose.msra.mxu1 %v1273_v50  ;;  %v1326_v58 = vmul.f32 %v6893_v52, %v1317_v54  ;;  %v1327_v59 = vmul.f32 %v6898_v53, %v1317_v54  ;;  %v1328_v60 = vmul.f32 %v6906_v57, %v1317_v54  ;;  %v1329_v0 = vmul.f32 %v6914_v61, %v1317_v54  ;;  %v5287_v8 = vpop.f32.mrb[3].mxu1 }
 0x3aa   : > { %v1330_v2 = vmul.f32 %v6920_v63, %v1317_v54  ;;  %5302 = vmatprep.subr.mxu1 %v1312_v4  ;;  %v1331_v9 = vmul.f32 %v6927_v3, %v1317_v54  ;;  %v1332_v10 = vmul.f32 %v6932_v6, %v1317_v54  ;;  %v1333_v12 = vmul.f32 %v6939_v11, %v1317_v54 }
 0x3ab   : > { %5290 = vmatprep.mubr.f32.mxu1 %v1326_v58 }
 0x3ac   : > { %5291 = vmatmul.mubr.f32.vlgmr.msra.gmra.mrb[4].mxu1 %v1327_v59 }
 0x3ad   : > { %5293 = vmatprep.mubr.f32.mxu1 %v1328_v60  ;;  %5303 = vmatpush3.msra.mxu1 %v1312_v4 }
 0x3b0   : > { %5294 = vmatmul.mubr.f32.gmra.mrb[6].mxu1 %v1329_v0 }
 0x3b1   : > { %5296 = vmatprep.mubr.f32.mxu1 %v1330_v2 }
 0x3b4   : > { %5297 = vmatmul.mubr.f32.gmra.mrb[8].mxu1 %v1331_v9 }
 0x3b5   : > { %5299 = vmatprep.mubr.f32.mxu1 %v1332_v10 }
 0x3b8   : > { %5300 = vmatmul.mubr.f32.gmra.mrb[10].mxu1 %v1333_v12 }
 0x47f   : > { %v5292_v13 = vpop.f32.mrb[4].mxu1 }
 0x480   : > { %v1400_v16 = vpop.f32.mrb[5].mxu1  ;;  %v1443_v20 = vsel %vm1439_vm4, %v5292_v13, -inf }
 0x481   : > { %v1440_v17 = vsel %vm1439_vm4, %v1400_v16, -inf }
 0x482   : > { %1441 = vmax.xlane.f32.xlu0 %v1440_v17 }
 0x483   : > { %v5295_v18 = vpop.f32.mrb[6].mxu1 }
 0x484   : > { %v1410_v19 = vpop.f32.mrb[7].mxu1  ;;  %v1449_v24 = vsel %vm1439_vm4, %v5295_v18, -inf }
 0x485   : > { %v1446_v21 = vsel %vm1439_vm4, %v1410_v19, -inf }
 0x486   : > { %1444 = vmax.xlane.f32.xlu0 %v1443_v20  ;;  %1447 = vmax.xlane.f32.xlu1 %v1446_v21 }
 0x487   : > { %v5298_v22 = vpop.f32.mrb[8].mxu1 }
 0x488   : > { %v1420_v23 = vpop.f32.mrb[9].mxu1  ;;  %v1455_v28 = vsel %vm1439_vm4, %v5298_v22, -inf }
 0x489   : > { %v1452_v25 = vsel %vm1439_vm4, %v1420_v23, -inf }
 0x48a   : > { %1450 = vmax.xlane.f32.xlu1 %v1449_v24  ;;  %1453 = vmax.xlane.f32.xlu0 %v1452_v25  ;;  %v5512_v24 = vld [vmem:[%s6814_s29 + $0x10] sm:$0xff]  }
 0x48b   : > { %v5301_v26 = vpop.f32.mrb[10].mxu1 }
 0x48c   : > { %v1430_v27 = vpop.f32.mrb[11].mxu1  ;;  %v1461_v30 = vsel %vm1439_vm4, %v5301_v26, -inf }
 0x48d   : > { %v1458_v29 = vsel %vm1439_vm4, %v1430_v27, -inf }
 0x48e   : > { %1456 = vmax.xlane.f32.xlu1 %v1455_v28  ;;  %1459 = vmax.xlane.f32.xlu0 %v1458_v29 }
 0x492   : > { %1462 = vmax.xlane.f32.xlu1 %v1461_v30 }
 0x50f   : > { %v1442_v31 = vpop.xlane.xlu0 %1441 }
 0x510   : > { %v1464_v32 = vsub.f32 %v1400_v16, %v1442_v31 }
 0x512   : > { %v1472_v33 = vmul.f32 1.442695, %v1464_v32 }
 0x513   : > { %v1445_v34 = vpop.xlane.xlu0 %1444  ;;  %v1448_v36 = vpop.xlane.xlu1 %1447 }
 0x514   : > { %5646 = vpow2.f32 %v1472_v33  ;;  %v1465_v37 = vsub.f32 %v5292_v13, %v1445_v34  ;;  %v1466_v38 = vsub.f32 %v1410_v19, %v1448_v36 }
 0x516   : > { %v1474_v39 = vmul.f32 1.442695, %v1465_v37  ;;  %v1476_v40 = vmul.f32 1.442695, %v1466_v38 }
 0x517   : > { %v1451_v43 = vpop.xlane.xlu1 %1450  ;;  %v1454_v45 = vpop.xlane.xlu0 %1453 }
 0x518   : > { %5648 = vpow2.f32 %v1474_v39  ;;  %v1467_v46 = vsub.f32 %v5295_v18, %v1451_v43  ;;  %v1468_v47 = vsub.f32 %v1420_v23, %v1454_v45  ;;  %v5511_v23 = vld [vmem:[%s6814_s29 + $0x8] sm:$0xff]  }
 0x519   : > { %5650 = vpow2.f32 %v1476_v40 }
 0x51a   : > { %v1478_v48 = vmul.f32 1.442695, %v1467_v46  ;;  %v1480_v49 = vmul.f32 1.442695, %v1468_v47 }
 0x51b   : > { %v1457_v50 = vpop.xlane.xlu1 %1456  ;;  %v1460_v51 = vpop.xlane.xlu0 %1459 }
 0x51c   : > { %5652 = vpow2.f32 %v1478_v48  ;;  %v1469_v54 = vsub.f32 %v5298_v22, %v1457_v50  ;;  %v1470_v55 = vsub.f32 %v1430_v27, %v1460_v51  ;;  %v5510_v22 = vld [vmem:[%s6814_s29] sm:$0xff]  }
 0x51d   : > { %5654 = vpow2.f32 %v1480_v49  ;;  %5317 = vmatpush3.bf16.msra.mxu0 %v5510_v22 }
 0x51e   : > { %v5647_v58 = vpop.eup %5646  ;;  %v1482_v59 = vmul.f32 1.442695, %v1469_v54  ;;  %v1484_v60 = vmul.f32 1.442695, %v1470_v55  ;;  %5318 = vmatprep.subr.bf16.mxu0 %v6197_v15  ;;  %v5513_v55 = vld [vmem:[%s6814_s29 + $0x18] sm:$0xff]  }
 0x51f   : > { %v1463_v62 = vpop.xlane.xlu1 %1462  ;;  %v1488_v0 = vsel %vm1439_vm4, %v5647_v58, 0.0 }
 0x520   : > { %5656 = vpow2.f32 %v1482_v59  ;;  %v1471_v1 = vsub.f32 %v5301_v26, %v1463_v62  ;;  %1489 = vadd.xlane.f32.xlu0 %v1488_v0  ;;  %v5515_v59 = vld [vmem:[%s6814_s29 + $0x28] sm:$0xff]   ;;  %v5517_v62 = vld [vmem:[%s6814_s29 + $0x38] sm:$0xff]  }
 0x521   : > { %5658 = vpow2.f32 %v1484_v60  ;;  %5319 = vmatpush3.bf16.msra.mxu0 %v5511_v23  ;;  %v5516_v60 = vld [vmem:[%s6814_s29 + $0x30] sm:$0xff]  }
 0x522   : > { %v5649_v2 = vpop.eup %5648  ;;  %v1486_v4 = vmul.f32 1.442695, %v1471_v1  ;;  %5320 = vmatprep.subr.bf16.mxu0 %v6197_v15 }
 0x523   : > { %v5651_v5 = vpop.eup %5650  ;;  %v1491_v7 = vsel %vm1439_vm4, %v5649_v2, 0.0 }
 0x524   : > { %5660 = vpow2.f32 %v1486_v4  ;;  %1492 = vadd.xlane.f32.xlu1 %v1491_v7  ;;  %v1494_v8 = vsel %vm1439_vm4, %v5651_v5, 0.0 }
 0x525   : > { %1495 = vadd.xlane.f32.xlu0 %v1494_v8  ;;  %5321 = vmatpush3.bf16.msra.mxu0 %v5512_v24 }
 0x526   : > { %v5653_v9 = vpop.eup %5652  ;;  %5322 = vmatprep.subr.bf16.mxu0 %v6197_v15 }
 0x527   : > { %v5655_v10 = vpop.eup %5654  ;;  %v1497_v12 = vsel %vm1439_vm4, %v5653_v9, 0.0 }
 0x528   : > { %1498 = vadd.xlane.f32.xlu1 %v1497_v12  ;;  %v1500_v13 = vsel %vm1439_vm4, %v5655_v10, 0.0 }
 0x529   : > { %1501 = vadd.xlane.f32.xlu0 %v1500_v13  ;;  %5323 = vmatpush3.bf16.msra.mxu0 %v5513_v55 }
 0x52a   : > { %v5657_v16 = vpop.eup %5656  ;;  %5324 = vmatprep.subr.bf16.mxu0 %v6197_v15 }
 0x52b   : > { %v5659_v17 = vpop.eup %5658  ;;  %v1503_v18 = vsel %vm1439_vm4, %v5657_v16, 0.0 }
 0x52c   : > { %1504 = vadd.xlane.f32.xlu1 %v1503_v18  ;;  %v1506_v19 = vsel %vm1439_vm4, %v5659_v17, 0.0 }
 0x52d   : > { %1507 = vadd.xlane.f32.xlu0 %v1506_v19 }
 0x52e   : > { %v5661_v20 = vpop.eup %5660 }
 0x52f   : > { %v1509_v21 = vsel %vm1439_vm4, %v5661_v20, 0.0 }
 0x530   : > { %1510 = vadd.xlane.f32.xlu1 %v1509_v21 }
 0x5ad   : > { %v1490_v25 = vpop.xlane.xlu0 %1489 }
 0x5ae   : > { %5662 = vrcp.f32 %v1490_v25 }
 0x5b1   : > { %v1493_v26 = vpop.xlane.xlu1 %1492 }
 0x5b2   : > { %5664 = vrcp.f32 %v1493_v26  ;;  %v1496_v27 = vpop.xlane.xlu0 %1495 }
 0x5b3   : > { %5666 = vrcp.f32 %v1496_v27  ;;  %v1814_v27 = vld [vmem:[%s6819_s30] sm:$0xff] }
 0x5b5   : > { %v1499_v28 = vpop.xlane.xlu1 %1498 }
 0x5b6   : > { %5668 = vrcp.f32 %v1499_v28  ;;  %v1502_v29 = vpop.xlane.xlu0 %1501  ;;  %v1822_v28 = vld [vmem:[%s6819_s30 + $0x40] sm:$0xff] }
 0x5b7   : > { %5670 = vrcp.f32 %v1502_v29  ;;  %v1815_v29 = vld [vmem:[%s6819_s30 + $0x8] sm:$0xff] }
 0x5b8   : > { %v5663_v30 = vpop.eup %5662 }
 0x5b9   : > { %v1505_v31 = vpop.xlane.xlu1 %1504  ;;  %v1520_v32 = vmul.f32 %v5663_v30, %v5647_v58  ;;  %v5514_v58 = vld [vmem:[%s6814_s29 + $0x20] sm:$0xff]   ;;  %v4780_v30 = vcombine.low %v1814_v27, %v1822_v28  ;;  %s7468_s29 = sld [smem:[#allocation27_spill]] }
 0x5ba   : > { %5672 = vrcp.f32 %v1505_v31  ;;  %v1508_v33 = vpop.xlane.xlu0 %1507  ;;  %5325 = vmatpush3.bf16.msra.mxu0 %v5514_v58  ;;  %v4781_v31 = vcombine.high %v1814_v27, %v1822_v28  ;;  %v1926_v28 = vld [vmem:[%s6819_s30 + $0x380] sm:$0xff] }
 0x5bb   : > { %5674 = vrcp.f32 %v1508_v33  ;;  %5304 = vmatprep.mubr.msk.f32.mxu1 %vm1439_vm4, %v1520_v32  ;;  %5326 = vmatprep.subr.bf16.mxu0 %v6197_v15  ;;  %v1823_v32 = vld [vmem:[%s6819_s30 + $0x48] sm:$0xff]  ;;  %v1830_v33 = vld [vmem:[%s6819_s30 + $0x80] sm:$0xff] }
 0x5bc   : > { %v5665_v34 = vpop.eup %5664  ;;  %2666 = vmatprep.subr.bf16.mxu1 %v4781_v31 }
 0x5bd   : > { %v5667_v36 = vpop.eup %5666  ;;  %v1521_v37 = vmul.f32 %v5665_v34, %v5649_v2  ;;  %v1511_v38 = vpop.xlane.xlu1 %1510  ;;  %v1838_v34 = vld [vmem:[%s6819_s30 + $0xc0] sm:$0xff] }
 0x5be   : > { %5676 = vrcp.f32 %v1511_v38  ;;  %v1522_v39 = vmul.f32 %v5667_v36, %v5651_v5  ;;  %5327 = vmatpush3.bf16.msra.mxu0 %v5515_v59  ;;  %v4782_v36 = vcombine.low %v1815_v29, %v1823_v32  ;;  %v4797_v38 = vcombine.high %v1830_v33, %v1838_v34 }
 0x5bf   : > { %5305 = vmatmul.mubr.msk.f32.vlgmr.msra.gmra.mrb[12].mxu1 %vm1439_vm4, %v1521_v37  ;;  %5328 = vmatprep.subr.bf16.mxu0 %v6197_v15  ;;  %v4783_v37 = vcombine.high %v1815_v29, %v1823_v32  ;;  %v1934_v29 = vld [vmem:[%s6819_s30 + $0x3c0] sm:$0xff]  ;;  %v1935_v32 = vld [vmem:[%s6819_s30 + $0x3c8] sm:$0xff]  ;;  %p5039_p12 = scmp.ne.s32.totalorder %s7468_s29, 5 }
 0x5c0   : > { %v5669_v40 = vpop.eup %5668  ;;  %5307 = vmatprep.mubr.msk.f32.mxu1 %vm1439_vm4, %v1522_v39  ;;  %v1831_v39 = vld [vmem:[%s6819_s30 + $0x88] sm:$0xff]  ;;  %2667 = vmatpush1.bf16.msra.mxu1 %v4780_v30  ;;  %v4893_v31 = vcombine.high %v1926_v28, %v1934_v29  ;;  %vm4428_vm5 = vcmask (!%p5039_p12), 7168  }
 0x5c1   : > { %v5671_v43 = vpop.eup %5670  ;;  %v1523_v45 = vmul.f32 %v5669_v40, %v5653_v9  ;;  %v1839_v40 = vld [vmem:[%s6819_s30 + $0xc8] sm:$0xff]  ;;  %2668 = vmatprep.subr.bf16.mxu1 %v4797_v38  ;;  %v1824_v38 = vld [vmem:[%s6819_s30 + $0x50] sm:$0xff] }
 0x5c2   : > { %v1524_v46 = vmul.f32 %v5671_v43, %v5655_v10  ;;  %5329 = vmatpush3.bf16.msra.mxu0 %v5516_v60  ;;  %v1846_v43 = vld [vmem:[%s6819_s30 + $0x100] sm:$0xff]  ;;  %v1927_v30 = vld [vmem:[%s6819_s30 + $0x388] sm:$0xff] }
 0x5c3   : > { %5308 = vmatmul.mubr.msk.f32.gmra.mrb[14].mxu1 %vm1439_vm4, %v1523_v45  ;;  %5330 = vmatprep.subr.bf16.mxu0 %v6197_v15  ;;  %v1854_v45 = vld [vmem:[%s6819_s30 + $0x140] sm:$0xff] }
 0x5c4   : > { %v5673_v47 = vpop.eup %5672  ;;  %5310 = vmatprep.mubr.msk.f32.mxu1 %vm1439_vm4, %v1524_v46  ;;  %v1847_v46 = vld [vmem:[%s6819_s30 + $0x108] sm:$0xff] }
 0x5c5   : > { %v5675_v48 = vpop.eup %5674  ;;  %v1525_v49 = vmul.f32 %v5673_v47, %v5657_v16  ;;  %v1855_v47 = vld [vmem:[%s6819_s30 + $0x148] sm:$0xff] }
 0x5c6   : > { %v1526_v50 = vmul.f32 %v5675_v48, %v5659_v17  ;;  %5331 = vmatpush3.bf16.msra.mxu0 %v5517_v62  ;;  %v4796_v48 = vcombine.low %v1830_v33, %v1838_v34  ;;  %v4814_v55 = vcombine.low %v1847_v46, %v1855_v47  ;;  %v4892_v33 = vcombine.low %v1926_v28, %v1934_v29  ;;  %v1905_v28 = vld [vmem:[%s6819_s30 + $0x2d8] sm:$0xff] }
 0x5c7   : > { %5311 = vmatmul.mubr.msk.f32.gmra.mrb[16].mxu1 %vm1439_vm4, %v1525_v49  ;;  %2707 = vmatprep.subr.bf16.mxu0 %v4783_v37  ;;  %v4798_v49 = vcombine.low %v1831_v39, %v1839_v40  ;;  %v4894_v34 = vcombine.low %v1927_v30, %v1935_v32  ;;  %v1816_v37 = vld [vmem:[%s6819_s30 + $0x10] sm:$0xff] }
 0x5c8   : > { %v5677_v51 = vpop.eup %5676  ;;  %5313 = vmatprep.mubr.msk.f32.mxu1 %vm1439_vm4, %v1526_v50  ;;  %v4813_v50 = vcombine.high %v1846_v43, %v1854_v45  ;;  %2669 = vmatpush1.bf16.msra.mxu1 %v4796_v48 }
 0x5c9   : > { %v1527_v54 = vmul.f32 %v5677_v51, %v5661_v20  ;;  %v4815_v51 = vcombine.high %v1847_v46, %v1855_v47 }
 0x5ca   : > { %2670 = vmatprep.subr.bf16.mxu1 %v4813_v50 }
 0x5cb   : > { %5314 = vmatmul.mubr.msk.f32.gmra.mrb[18].mxu1 %vm1439_vm4, %v1527_v54  ;;  %v4812_v54 = vcombine.low %v1846_v43, %v1854_v45  ;;  %v4785_v43 = vcombine.high %v1816_v37, %v1824_v38 }
 0x5cc   : > { %2698 = vmatprep.mubr.bf16.mxu1 %v6196_v14 }
 0x5cd   : > { %2671 = vmatpush1.bf16.msra.mxu1 %v4812_v54 }
 0x692   : > { %v5306_v0 = vpop.f32.mrb[12].mxu1 }
 0x693   : > { %v1658_v1 = vmul.f32 %v5306_v0, %v6898_v53  ;;  %v1618_v2 = vpop.f32.mrb[13].mxu1  ;;  %v1862_v0 = vld [vmem:[%s6819_s30 + $0x180] sm:$0xff] }
 0x694   : > { %v1657_v4 = vmul.f32 %v1618_v2, %v6893_v52  ;;  %v1863_v2 = vld [vmem:[%s6819_s30 + $0x188] sm:$0xff] }
 0x696   : > { %v1665_v5 = vadd.f32 %v1658_v1, %v1657_v4  ;;  %v5309_v7 = vpop.f32.mrb[14].mxu1  ;;  %v1870_v1 = vld [vmem:[%s6819_s30 + $0x1c0] sm:$0xff] }
 0x697   : > { %v1628_v8 = vpop.f32.mrb[15].mxu1  ;;  %v1660_v10 = vmul.f32 %v5309_v7, %v6914_v61  ;;  %v4829_v4 = vcombine.high %v1862_v0, %v1870_v1  ;;  %v4828_v7 = vcombine.low %v1862_v0, %v1870_v1  ;;  %v1833_v0 = vld [vmem:[%s6819_s30 + $0x98] sm:$0xff] }
 0x698   : > { %v1659_v9 = vmul.f32 %v1628_v8, %v6906_v57  ;;  %v1841_v1 = vld [vmem:[%s6819_s30 + $0xd8] sm:$0xff] }
 0x699   : > { %2672 = vmatprep.subr.bf16.mxu1 %v4829_v4 }
 0x69a   : > { %v1666_v12 = vadd.f32 %v1665_v5, %v1659_v9  ;;  %v5312_v13 = vpop.f32.mrb[16].mxu1  ;;  %v1871_v5 = vld [vmem:[%s6819_s30 + $0x1c8] sm:$0xff]  ;;  %2673 = vmatpush1.bf16.msra.mxu1 %v4828_v7  ;;  %v4803_v7 = vcombine.high %v1833_v0, %v1841_v1 }
 0x69b   : > { %v1638_v16 = vpop.f32.mrb[17].mxu1  ;;  %v1662_v18 = vmul.f32 %v5312_v13, %v6927_v3  ;;  %v4830_v8 = vcombine.low %v1863_v2, %v1871_v5  ;;  %v4831_v9 = vcombine.high %v1863_v2, %v1871_v5  ;;  %v1879_v13 = vld [vmem:[%s6819_s30 + $0x208] sm:$0xff] }
 0x69c   : > { %v1661_v15 = vmul.f32 %v1638_v16, %v6920_v63  ;;  %v1667_v17 = vadd.f32 %v1666_v12, %v1660_v10  ;;  %v4769_v63 = vld [vmem:[%s819_s5] ss:$0 sm:$0xff]  ;;  %v1878_v10 = vld [vmem:[%s6819_s30 + $0x200] sm:$0xff] }
 0x69d   : > { %v1886_v12 = vld [vmem:[%s6819_s30 + $0x240] sm:$0xff] }
 0x69e   : > { %v1668_v53 = vadd.f32 %v1667_v17, %v1661_v15  ;;  %v5315_v19 = vpop.f32.mrb[18].mxu1  ;;  %v4845_v16 = vcombine.high %v1878_v10, %v1886_v12  ;;  %v1887_v15 = vld [vmem:[%s6819_s30 + $0x248] sm:$0xff]  ;;  %v4844_v17 = vcombine.low %v1878_v10, %v1886_v12  ;;  %v1857_v10 = vld [vmem:[%s6819_s30 + $0x158] sm:$0xff] }
 0x69f   : > { %v1648_v20 = vpop.f32.mrb[19].mxu1  ;;  %v1664_v57 = vmul.f32 %v5315_v19, %v6939_v11  ;;  %v1894_v19 = vld [vmem:[%s6819_s30 + $0x280] sm:$0xff] }
 0x6a0   : > { %v1663_v52 = vmul.f32 %v1648_v20, %v6932_v6  ;;  %v1669_v21 = vadd.f32 %v1668_v53, %v1662_v18  ;;  %v4846_v18 = vcombine.low %v1879_v13, %v1887_v15  ;;  %v4847_v53 = vcombine.high %v1879_v13, %v1887_v15  ;;  %2674 = vmatprep.subr.bf16.mxu1 %v4845_v16  ;;  %v1902_v20 = vld [vmem:[%s6819_s30 + $0x2c0] sm:$0xff] }
 0x6a1   : > { %2675 = vmatpush1.bf16.msra.mxu1 %v4844_v17  ;;  %v4802_v13 = vcombine.low %v1833_v0, %v1841_v1  ;;  %v1864_v17 = vld [vmem:[%s6819_s30 + $0x190] sm:$0xff] }
 0x6a2   : > { %v1670_v61 = vadd.f32 %v1669_v21, %v1663_v52  ;;  %v1895_v52 = vld [vmem:[%s6819_s30 + $0x288] sm:$0xff]  ;;  %v4861_v21 = vcombine.high %v1894_v19, %v1902_v20 }
 0x6a4   : > { %v1671_v22 = vadd.f32 %v1670_v61, %v1664_v57  ;;  %v1903_v57 = vld [vmem:[%s6819_s30 + $0x2c8] sm:$0xff]  ;;  %v4860_v61 = vcombine.low %v1894_v19, %v1902_v20  ;;  %2676 = vmatprep.subr.bf16.mxu1 %v4861_v21  ;;  %v1873_v19 = vld [vmem:[%s6819_s30 + $0x1d8] sm:$0xff] }
 0x6a6   : > { %v1672_v23 = vpack.c.bf16 %v1671_v22, %v1671_v22  ;;  %v4862_v22 = vcombine.low %v1895_v52, %v1903_v57  ;;  %2677 = vmatpush1.bf16.msra.mxu1 %v4860_v61  ;;  %v1880_v61 = vld [vmem:[%s6819_s30 + $0x210] sm:$0xff] }
 0x6a8   : > { %5333 = vmatmul.mubr.bf16.vlgmr.msra.gmra.mrb[4].mxu0 %v1672_v23  ;;  %v4863_v23 = vcombine.high %v1895_v52, %v1903_v57 }
 0x6a9   : > { %2739 = vmatprep.mubr.bf16.mxu0 %v6196_v14  ;;  %2708 = vmatpush1.bf16.msra.mxu0 %v4782_v36  ;;  %v4895_v36 = vcombine.high %v1927_v30, %v1935_v32 }
 0x77b   : > { %v1778_v3 = vpop.f32.mrb[4].mxu0 }
 0x77c   : > { %v1779_v24 = vadd.f32 %v4769_v63, %v1778_v3  ;;  %v5334_v6 = vpop.f32.mrb[5].mxu0  ;;  %v1910_v63 = vld [vmem:[%s6819_s30 + $0x300] sm:$0xff] }
 0x77d   : > { %v1781_v25 = vpop.f32.mrb[6].mxu0  ;;  %v1918_v3 = vld [vmem:[%s6819_s30 + $0x340] sm:$0xff] }
 0x77e   : > { %v5335_v26 = vpop.f32.mrb[7].mxu0  ;;  %v1784_v11 = vadd.f32 %v1779_v24, %v6865_v35  ;;  %v4799_v35 = vcombine.high %v1831_v39, %v1839_v40  ;;  %v1911_v24 = vld [vmem:[%s6819_s30 + $0x308] sm:$0xff]  ;;  %v4877_v6 = vcombine.high %v1910_v63, %v1918_v3  ;;  %v1817_v39 = vld [vmem:[%s6819_s30 + $0x18] sm:$0xff]  ;;  %v4784_v40 = vcombine.low %v1816_v37, %v1824_v38 }
 0x77f   : > { %v1919_v25 = vld [vmem:[%s6819_s30 + $0x348] sm:$0xff]  ;;  %v4876_v26 = vcombine.low %v1910_v63, %v1918_v3  ;;  %v1889_v63 = vld [vmem:[%s6819_s30 + $0x258] sm:$0xff] }
 0x780   : > { %1787 = vadd.xlane.f32.xlu0 %v1784_v11  ;;  %2709 = vmatprep.subr.bf16.mxu0 %v4799_v35  ;;  %v4879_v27 = vcombine.high %v1911_v24, %v1919_v25  ;;  %v1825_v35 = vld [vmem:[%s6819_s30 + $0x58] sm:$0xff] }
 0x781   : > { %2710 = vmatpush1.bf16.msra.mxu0 %v4798_v49  ;;  %2678 = vmatprep.subr.bf16.mxu1 %v4877_v6  ;;  %v4786_v45 = vcombine.low %v1817_v39, %v1825_v35  ;;  %v4787_v46 = vcombine.high %v1817_v39, %v1825_v35  ;;  %v1921_v37 = vld [vmem:[%s6819_s30 + $0x358] sm:$0xff]  ;;  %v1928_v35 = vld [vmem:[%s6819_s30 + $0x390] sm:$0xff] }
 0x782   : > { %2711 = vmatprep.subr.bf16.mxu0 %v4815_v51  ;;  %2679 = vmatpush1.bf16.msra.mxu1 %v4876_v26  ;;  %v4778_v51 = vld [vmem:[%s827_s7] ss:$0 sm:$0xff]  ;;  %v1896_v26 = vld [vmem:[%s6819_s30 + $0x290] sm:$0xff] }
 0x783   : > { %2680 = vmatprep.subr.bf16.mxu1 %v4893_v31 }
 0x785   : > { %2712 = vmatpush1.bf16.msra.mxu0 %v4814_v55  ;;  %v4779_v55 = vld [vmem:[%s835_s27] ss:$0 sm:$0xff]  ;;  %s7469_s27 = sld [smem:[#allocation41_spill]] (!%p5039_p12) }
 0x786   : > { %2713 = vmatprep.subr.bf16.mxu0 %v4831_v9  ;;  %2681 = vmatpush1.bf16.msra.mxu1 %v4892_v33  ;;  %v1849_v9 = vld [vmem:[%s6819_s30 + $0x118] sm:$0xff]  ;;  %v1912_v33 = vld [vmem:[%s6819_s30 + $0x310] sm:$0xff] }
 0x787   : > { %2748 = vmatprep.subr.bf16.mxu1 %v4785_v43  ;;  %v4819_v15 = vcombine.high %v1849_v9, %v1857_v10  ;;  %v4818_v52 = vcombine.low %v1849_v9, %v1857_v10  ;;  %v1843_v9 = vld [vmem:[%s6819_s30 + $0xe8] sm:$0xff] }
 0x789   : > { %2714 = vmatpush1.bf16.msra.mxu0 %v4830_v8  ;;  %v1848_v8 = vld [vmem:[%s6819_s30 + $0x110] sm:$0xff] }
 0x78a   : > { %2715 = vmatprep.subr.bf16.mxu0 %v4847_v53  ;;  %v1865_v53 = vld [vmem:[%s6819_s30 + $0x198] sm:$0xff] }
 0x78b   : > { %v4835_v57 = vcombine.high %v1865_v53, %v1873_v19 }
 0x78d   : > { %2716 = vmatpush1.bf16.msra.mxu0 %v4846_v18  ;;  %v1872_v18 = vld [vmem:[%s6819_s30 + $0x1d0] sm:$0xff] }
 0x78e   : > { %2717 = vmatprep.subr.bf16.mxu0 %v4863_v23  ;;  %v4833_v21 = vcombine.high %v1864_v17, %v1872_v18  ;;  %v1881_v23 = vld [vmem:[%s6819_s30 + $0x218] sm:$0xff]  ;;  %v4832_v3 = vcombine.low %v1864_v17, %v1872_v18  ;;  %v1858_v17 = vld [vmem:[%s6819_s30 + $0x160] sm:$0xff]  ;;  %v1851_v18 = vld [vmem:[%s6819_s30 + $0x128] sm:$0xff] }
 0x78f   : > { %v4850_v30 = vcombine.low %v1881_v23, %v1889_v63 }
 0x791   : > { %2718 = vmatpush1.bf16.msra.mxu0 %v4862_v22  ;;  %v1888_v22 = vld [vmem:[%s6819_s30 + $0x250] sm:$0xff] }
 0x792   : > { %2719 = vmatprep.subr.bf16.mxu0 %v4879_v27  ;;  %v4849_v6 = vcombine.high %v1880_v61, %v1888_v22  ;;  %v1897_v27 = vld [vmem:[%s6819_s30 + $0x298] sm:$0xff]  ;;  %v4848_v29 = vcombine.low %v1880_v61, %v1888_v22  ;;  %v1874_v61 = vld [vmem:[%s6819_s30 + $0x1e0] sm:$0xff]  ;;  %v1867_v22 = vld [vmem:[%s6819_s30 + $0x1a8] sm:$0xff] }
 0x793   : > { %v4867_v32 = vcombine.high %v1897_v27, %v1905_v28  ;;  %v4866_v39 = vcombine.low %v1897_v27, %v1905_v28  ;;  %v1891_v27 = vld [vmem:[%s6819_s30 + $0x268] sm:$0xff] }
 0x80d   : > { %v1788_v58 = vpop.xlane.xlu0 %1787 }
 0x80e   : > { %v1790_v59 = vmul.f32 0.0078125, %v1788_v58 }
 0x810   : > { %v7006_v60 = vsub.f32 %v1784_v11, %v1790_v59  ;;  %v4878_v11 = vcombine.low %v1911_v24, %v1919_v25  ;;  %v1832_v59 = vld [vmem:[%s6819_s30 + $0x90] sm:$0xff]  ;;  %v4834_v24 = vcombine.low %v1865_v53, %v1873_v19  ;;  %v4851_v25 = vcombine.high %v1881_v23, %v1889_v63  ;;  %v1859_v53 = vld [vmem:[%s6819_s30 + $0x168] sm:$0xff] }
 0x811   : > { %v1875_v23 = vld [vmem:[%s6819_s30 + $0x1e8] sm:$0xff] }
 0x812   : > { %v1792_v62 = vmul.f32 %v7006_v60, %v7006_v60  ;;  %2720 = vmatpush1.bf16.msra.mxu0 %v4878_v11  ;;  %v1904_v11 = vld [vmem:[%s6819_s30 + $0x2d0] sm:$0xff] }
 0x813   : > { %2721 = vmatprep.subr.bf16.mxu0 %v4895_v36  ;;  %v4865_v31 = vcombine.high %v1896_v26, %v1904_v11  ;;  %v1913_v36 = vld [vmem:[%s6819_s30 + $0x318] sm:$0xff]  ;;  %v4864_v38 = vcombine.low %v1896_v26, %v1904_v11  ;;  %v1890_v26 = vld [vmem:[%s6819_s30 + $0x260] sm:$0xff]  ;;  %v1883_v11 = vld [vmem:[%s6819_s30 + $0x228] sm:$0xff] }
 0x814   : > { %1793 = vadd.xlane.f32.xlu1 %v1792_v62  ;;  %v1840_v62 = vld [vmem:[%s6819_s30 + $0xd0] sm:$0xff]  ;;  %v4883_v43 = vcombine.high %v1913_v36, %v1921_v37 }
 0x815   : > { %v4801_v5 = vcombine.high %v1832_v59, %v1840_v62  ;;  %v4800_v12 = vcombine.low %v1832_v59, %v1840_v62  ;;  %v1827_v59 = vld [vmem:[%s6819_s30 + $0x68] sm:$0xff] }
 0x816   : > { %2722 = vmatpush1.bf16.msra.mxu0 %v4894_v34  ;;  %v1920_v34 = vld [vmem:[%s6819_s30 + $0x350] sm:$0xff] }
 0x817   : > { %2789 = vmatprep.subr.bf16.mxu0 %v4787_v46  ;;  %v1929_v46 = vld [vmem:[%s6819_s30 + $0x398] sm:$0xff] }
 0x8a1   : > { %v1794_v47 = vpop.xlane.xlu1 %1793 }
 0x8a2   : > { %v1795_v48 = vmul.f32 0.0078125, %v1794_v47  ;;  %v1937_v47 = vld [vmem:[%s6819_s30 + $0x3d8] sm:$0xff] }
 0x8a3   : > { %v4898_v0 = vcombine.low %v1929_v46, %v1937_v47 }
 0x8a4   : > { %v1796_v49 = vadd.f32 1e-05, %v1795_v48  ;;  %v4880_v48 = vcombine.low %v1912_v33, %v1920_v34 }
 0x8a6   : > { %5678 = vrsqrt.f32 %v1796_v49  ;;  %v4882_v49 = vcombine.low %v1913_v36, %v1921_v37  ;;  %v1907_v36 = vld [vmem:[%s6819_s30 + $0x2e8] sm:$0xff] }
 0x8b0   : > { %v5679_v50 = vpop.eup %5678 }
 0x8b1   : > { %v1798_v54 = vmul.f32 %v5679_v50, %v7006_v60  ;;  %v1856_v60 = vld [vmem:[%s6819_s30 + $0x150] sm:$0xff] }
 0x8b2   : > { %v4817_v16 = vcombine.high %v1848_v8, %v1856_v60  ;;  %v4816_v20 = vcombine.low %v1848_v8, %v1856_v60  ;;  %v1842_v8 = vld [vmem:[%s6819_s30 + $0xe0] sm:$0xff]  ;;  %v1835_v60 = vld [vmem:[%s6819_s30 + $0xa8] sm:$0xff] }
 0x8b3   : > { %v1805_v58 = vmul.f32 %v4778_v51, %v1798_v54  ;;  %v4899_v51 = vcombine.high %v1929_v46, %v1937_v47  ;;  %v1818_v54 = vld [vmem:[%s6819_s30 + $0x20] sm:$0xff]  ;;  %v1923_v46 = vld [vmem:[%s6819_s30 + $0x368] sm:$0xff] }
 0x8b5   : > { %v7043_v2 = vadd.f32 %v4779_v55, %v1805_v58  ;;  %v1826_v55 = vld [vmem:[%s6819_s30 + $0x60] sm:$0xff]  ;;  %v1819_v58 = vld [vmem:[%s6819_s30 + $0x28] sm:$0xff] }
 0x8b6   : > { %v4789_v1 = vcombine.high %v1818_v54, %v1826_v55  ;;  %v4788_v10 = vcombine.low %v1818_v54, %v1826_v55  ;;  %v1938_v54 = vld [vmem:[%s6819_s30 + $0x3e0] sm:$0xff]  ;;  %v1931_v55 = vld [vmem:[%s6819_s30 + $0x3a8] sm:$0xff] }
 0x8b7   : > { %v7047_v4 = vpack.c.bf16 %v7043_v2, %v7043_v2 }
 0x8b9   : > { %2699 = vmatmul.mubr.bf16.vlgmr.msra.gmra.mrb[20].mxu1 %v7047_v4  ;;  %2740 = vmatmul.mubr.bf16.vlgmr.msra.gmra.mrb[8].mxu0 %v7047_v4 }
 0x8ba   : > { %2749 = vmatpush1.bf16.msra.mxu1 %v4784_v40  ;;  %2790 = vmatpush1.bf16.msra.mxu0 %v4786_v45  ;;  %v4881_v40 = vcombine.high %v1912_v33, %v1920_v34  ;;  %v1936_v45 = vld [vmem:[%s6819_s30 + $0x3d0] sm:$0xff]  ;;  %v1906_v33 = vld [vmem:[%s6819_s30 + $0x2e0] sm:$0xff]  ;;  %v1899_v34 = vld [vmem:[%s6819_s30 + $0x2a8] sm:$0xff] }
 0x8bb   : > { %2750 = vmatprep.subr.bf16.mxu1 %v4801_v5  ;;  %2791 = vmatprep.subr.bf16.mxu0 %v4803_v7  ;;  %v4897_v50 = vcombine.high %v1928_v35, %v1936_v45  ;;  %v4896_v62 = vcombine.low %v1928_v35, %v1936_v45  ;;  %v4791_v5 = vcombine.high %v1819_v58, %v1827_v59  ;;  %v1834_v7 = vld [vmem:[%s6819_s30 + $0xa0] sm:$0xff]  ;;  %v1915_v45 = vld [vmem:[%s6819_s30 + $0x328] sm:$0xff] }
 0x8bc   : > { %2780 = vmatprep.mubr.bf16.mxu1 %v6196_v14  ;;  %2821 = vmatprep.mubr.bf16.mxu0 %v6196_v14  ;;  %v4804_v19 = vcombine.low %v1834_v7, %v1842_v8  ;;  %v1922_v35 = vld [vmem:[%s6819_s30 + $0x360] sm:$0xff] }
 0x8be   : > { %2751 = vmatpush1.bf16.msra.mxu1 %v4800_v12  ;;  %2792 = vmatpush1.bf16.msra.mxu0 %v4802_v13  ;;  %v4790_v12 = vcombine.low %v1819_v58, %v1827_v59  ;;  %v4805_v13 = vcombine.high %v1834_v7, %v1842_v8  ;;  %v1939_v58 = vld [vmem:[%s6819_s30 + $0x3e8] sm:$0xff]  ;;  %v1828_v7 = vld [vmem:[%s6819_s30 + $0x70] sm:$0xff]  ;;  %v1821_v8 = vld [vmem:[%s6819_s30 + $0x38] sm:$0xff] }
 0x8bf   : > { %2752 = vmatprep.subr.bf16.mxu1 %v4817_v16  ;;  %2793 = vmatprep.subr.bf16.mxu0 %v4819_v15  ;;  %v4807_v16 = vcombine.high %v1835_v60, %v1843_v9  ;;  %v1850_v15 = vld [vmem:[%s6819_s30 + $0x120] sm:$0xff] }
 0x8c0   : > { %v4820_v63 = vcombine.low %v1850_v15, %v1858_v17 }
 0x8c2   : > { %2753 = vmatpush1.bf16.msra.mxu1 %v4816_v20  ;;  %2794 = vmatpush1.bf16.msra.mxu0 %v4818_v52  ;;  %v4806_v20 = vcombine.low %v1835_v60, %v1843_v9  ;;  %v4821_v52 = vcombine.high %v1850_v15, %v1858_v17  ;;  %v1829_v60 = vld [vmem:[%s6819_s30 + $0x78] sm:$0xff]  ;;  %v1844_v15 = vld [vmem:[%s6819_s30 + $0xf0] sm:$0xff] }
 0x8c3   : > { %2754 = vmatprep.subr.bf16.mxu1 %v4833_v21  ;;  %2795 = vmatprep.subr.bf16.mxu0 %v4835_v57  ;;  %v4823_v21 = vcombine.high %v1851_v18, %v1859_v53  ;;  %v1866_v57 = vld [vmem:[%s6819_s30 + $0x1a0] sm:$0xff]  ;;  %v1837_v17 = vld [vmem:[%s6819_s30 + $0xb8] sm:$0xff] }
 0x8c4   : > { %v4836_v28 = vcombine.low %v1866_v57, %v1874_v61 }
 0x8c6   : > { %2755 = vmatpush1.bf16.msra.mxu1 %v4832_v3  ;;  %2796 = vmatpush1.bf16.msra.mxu0 %v4834_v24  ;;  %v4822_v3 = vcombine.low %v1851_v18, %v1859_v53  ;;  %v4837_v24 = vcombine.high %v1866_v57, %v1874_v61  ;;  %v1845_v18 = vld [vmem:[%s6819_s30 + $0xf8] sm:$0xff]  ;;  %v1860_v57 = vld [vmem:[%s6819_s30 + $0x170] sm:$0xff] }
 0x8c7   : > { %2756 = vmatprep.subr.bf16.mxu1 %v4849_v6  ;;  %2797 = vmatprep.subr.bf16.mxu0 %v4851_v25  ;;  %v4839_v6 = vcombine.high %v1867_v22, %v1875_v23  ;;  %v1882_v25 = vld [vmem:[%s6819_s30 + $0x220] sm:$0xff]  ;;  %v1853_v61 = vld [vmem:[%s6819_s30 + $0x138] sm:$0xff] }
 0x8c8   : > { %v4852_v37 = vcombine.low %v1882_v25, %v1890_v26 }
 0x8ca   : > { %2757 = vmatpush1.bf16.msra.mxu1 %v4848_v29  ;;  %2798 = vmatpush1.bf16.msra.mxu0 %v4850_v30  ;;  %v4838_v29 = vcombine.low %v1867_v22, %v1875_v23  ;;  %v4853_v30 = vcombine.high %v1882_v25, %v1890_v26  ;;  %v1861_v22 = vld [vmem:[%s6819_s30 + $0x178] sm:$0xff]  ;;  %v1876_v25 = vld [vmem:[%s6819_s30 + $0x1f0] sm:$0xff] }
 0x8cb   : > { %2758 = vmatprep.subr.bf16.mxu1 %v4865_v31  ;;  %2799 = vmatprep.subr.bf16.mxu0 %v4867_v32  ;;  %v4855_v31 = vcombine.high %v1883_v11, %v1891_v27  ;;  %v1898_v32 = vld [vmem:[%s6819_s30 + $0x2a0] sm:$0xff]  ;;  %v1869_v26 = vld [vmem:[%s6819_s30 + $0x1b8] sm:$0xff] }
 0x8cc   : > { %v4868_v47 = vcombine.low %v1898_v32, %v1906_v33 }
 0x8ce   : > { %2759 = vmatpush1.bf16.msra.mxu1 %v4864_v38  ;;  %2800 = vmatpush1.bf16.msra.mxu0 %v4866_v39  ;;  %v4854_v38 = vcombine.low %v1883_v11, %v1891_v27  ;;  %v4869_v39 = vcombine.high %v1898_v32, %v1906_v33  ;;  %v1877_v11 = vld [vmem:[%s6819_s30 + $0x1f8] sm:$0xff]  ;;  %v1892_v32 = vld [vmem:[%s6819_s30 + $0x270] sm:$0xff] }
 0x8cf   : > { %2760 = vmatprep.subr.bf16.mxu1 %v4881_v40  ;;  %2801 = vmatprep.subr.bf16.mxu0 %v4883_v43  ;;  %v4871_v40 = vcombine.high %v1899_v34, %v1907_v36  ;;  %v1914_v43 = vld [vmem:[%s6819_s30 + $0x320] sm:$0xff]  ;;  %v1885_v33 = vld [vmem:[%s6819_s30 + $0x238] sm:$0xff] }
 0x8d0   : > { %v4884_v59 = vcombine.low %v1914_v43, %v1922_v35 }
 0x8d2   : > { %2761 = vmatpush1.bf16.msra.mxu1 %v4880_v48  ;;  %2802 = vmatpush1.bf16.msra.mxu0 %v4882_v49  ;;  %v4870_v48 = vcombine.low %v1899_v34, %v1907_v36  ;;  %v4885_v49 = vcombine.high %v1914_v43, %v1922_v35  ;;  %v1893_v34 = vld [vmem:[%s6819_s30 + $0x278] sm:$0xff] }
 0x8d3   : > { %2762 = vmatprep.subr.bf16.mxu1 %v4897_v50  ;;  %2803 = vmatprep.subr.bf16.mxu0 %v4899_v51  ;;  %v4887_v50 = vcombine.high %v1915_v45, %v1923_v46  ;;  %v1930_v51 = vld [vmem:[%s6819_s30 + $0x3a0] sm:$0xff]  ;;  %v1901_v43 = vld [vmem:[%s6819_s30 + $0x2b8] sm:$0xff] }
 0x8d4   : > { %v4900_v9 = vcombine.low %v1930_v51, %v1938_v54  ;;  %v1909_v35 = vld [vmem:[%s6819_s30 + $0x2f8] sm:$0xff] }
 0x8d6   : > { %2763 = vmatpush1.bf16.msra.mxu1 %v4896_v62  ;;  %2804 = vmatpush1.bf16.msra.mxu0 %v4898_v0  ;;  %v4886_v62 = vcombine.low %v1915_v45, %v1923_v46  ;;  %v4901_v0 = vcombine.high %v1930_v51, %v1938_v54  ;;  %v4858_v46 = vcombine.low %v1885_v33, %v1893_v34  ;;  %v1917_v51 = vld [vmem:[%s6819_s30 + $0x338] sm:$0xff] }
 0x8d7   : > { %2830 = vmatprep.subr.bf16.mxu1 %v4789_v1  ;;  %2871 = vmatprep.subr.bf16.mxu0 %v4791_v5  ;;  %v4903_v1 = vcombine.high %v1931_v55, %v1939_v58  ;;  %v1820_v5 = vld [vmem:[%s6819_s30 + $0x30] sm:$0xff]  ;;  %v1925_v54 = vld [vmem:[%s6819_s30 + $0x378] sm:$0xff] }
 0x8d8   : > { %v4792_v53 = vcombine.low %v1820_v5, %v1828_v7 }
 0x8d9   : > { %2781 = vmatmul.mubr.bf16.vlgmr.msra.gmra.mrb[24].mxu1 %v7047_v4  ;;  %2822 = vmatmul.mubr.bf16.vlgmr.msra.gmra.mrb[12].mxu0 %v7047_v4 }
 0x8da   : > { %2831 = vmatpush1.bf16.msra.mxu1 %v4788_v10  ;;  %2872 = vmatpush1.bf16.msra.mxu0 %v4790_v12  ;;  %v4902_v10 = vcombine.low %v1931_v55, %v1939_v58  ;;  %v4793_v12 = vcombine.high %v1820_v5, %v1828_v7  ;;  %v4874_v58 = vcombine.low %v1901_v43, %v1909_v35  ;;  %v1933_v5 = vld [vmem:[%s6819_s30 + $0x3b8] sm:$0xff] }
 0x8db   : > { %2832 = vmatprep.subr.bf16.mxu1 %v4805_v13  ;;  %2873 = vmatprep.subr.bf16.mxu0 %v4807_v16  ;;  %v4795_v13 = vcombine.high %v1821_v8, %v1829_v60  ;;  %v1836_v16 = vld [vmem:[%s6819_s30 + $0xb0] sm:$0xff]  ;;  %v1941_v7 = vld [vmem:[%s6819_s30 + $0x3f8] sm:$0xff] }
 0x8dc   : > { %2862 = vmatprep.mubr.bf16.mxu1 %v6196_v14  ;;  %2903 = vmatprep.mubr.bf16.mxu0 %v6196_v14  ;;  %v4808_v23 = vcombine.low %v1836_v16, %v1844_v15 }
 0x8de   : > { %2833 = vmatpush1.bf16.msra.mxu1 %v4804_v19  ;;  %2874 = vmatpush1.bf16.msra.mxu0 %v4806_v20  ;;  %v4794_v19 = vcombine.low %v1821_v8, %v1829_v60  ;;  %v4809_v20 = vcombine.high %v1836_v16, %v1844_v15  ;;  %v4890_v60 = vcombine.low %v1917_v51, %v1925_v54  ;;  %v5518_v16 = vld [vmem:[%s6823_s18 + $0x40] sm:$0xff]  }
 0x8df   : > { %2834 = vmatprep.subr.bf16.mxu1 %v4821_v52  ;;  %2875 = vmatprep.subr.bf16.mxu0 %v4823_v21  ;;  %v4811_v52 = vcombine.high %v1837_v17, %v1845_v18  ;;  %v1852_v21 = vld [vmem:[%s6819_s30 + $0x130] sm:$0xff]  ;;  %v5519_v15 = vld [vmem:[%s6823_s18 + $0xc0] sm:$0xff]  }
 0x8e0   : > { %v4824_v27 = vcombine.low %v1852_v21, %v1860_v57 }
 0x8e2   : > { %2835 = vmatpush1.bf16.msra.mxu1 %v4820_v63  ;;  %2876 = vmatpush1.bf16.msra.mxu0 %v4822_v3  ;;  %v4810_v63 = vcombine.low %v1837_v17, %v1845_v18  ;;  %v4825_v3 = vcombine.high %v1852_v21, %v1860_v57  ;;  %v5520_v17 = vld [vmem:[%s6823_s18] sm:$0xff]   ;;  %v5526_v21 = vld [vmem:[%s6823_s18 + $0x50] sm:$0xff]  }
 0x8e3   : > { %2836 = vmatprep.subr.bf16.mxu1 %v4837_v24  ;;  %2877 = vmatprep.subr.bf16.mxu0 %v4839_v6  ;;  %v4827_v24 = vcombine.high %v1853_v61, %v1861_v22  ;;  %v1868_v6 = vld [vmem:[%s6819_s30 + $0x1b0] sm:$0xff]  ;;  %v5521_v18 = vld [vmem:[%s6823_s18 + $0x80] sm:$0xff]  }
 0x8e4   : > { %v4840_v36 = vcombine.low %v1868_v6, %v1876_v25  ;;  %v5527_v57 = vld [vmem:[%s6823_s18 + $0xd0] sm:$0xff]  }
 0x8e6   : > { %2837 = vmatpush1.bf16.msra.mxu1 %v4836_v28  ;;  %2878 = vmatpush1.bf16.msra.mxu0 %v4838_v29  ;;  %v4826_v28 = vcombine.low %v1853_v61, %v1861_v22  ;;  %v4841_v29 = vcombine.high %v1868_v6, %v1876_v25  ;;  %v5528_v61 = vld [vmem:[%s6823_s18 + $0x10] sm:$0xff]   ;;  %v5535_v6 = vld [vmem:[%s6823_s18 + $0xe0] sm:$0xff]  }
 0x8e7   : > { %2838 = vmatprep.subr.bf16.mxu1 %v4853_v30  ;;  %2879 = vmatprep.subr.bf16.mxu0 %v4855_v31  ;;  %v4843_v30 = vcombine.high %v1869_v26, %v1877_v11  ;;  %v1884_v31 = vld [vmem:[%s6819_s30 + $0x230] sm:$0xff]  ;;  %v5536_v25 = vld [vmem:[%s6823_s18 + $0x20] sm:$0xff]  }
 0x8e8   : > { %v4856_v45 = vcombine.low %v1884_v31, %v1892_v32  ;;  %v5529_v22 = vld [vmem:[%s6823_s18 + $0x90] sm:$0xff]  }
 0x8ea   : > { %2839 = vmatpush1.bf16.msra.mxu1 %v4852_v37  ;;  %2880 = vmatpush1.bf16.msra.mxu0 %v4854_v38  ;;  %v4857_v37 = vcombine.high %v1884_v31, %v1892_v32  ;;  %v4859_v38 = vcombine.high %v1885_v33, %v1893_v34  ;;  %v5543_v31 = vld [vmem:[%s6823_s18 + $0xf0] sm:$0xff]   ;;  %v5546_v34 = vld [vmem:[%s6823_s18 + $0x78] sm:$0xff]  }
 0x8eb   : > { %2840 = vmatprep.subr.bf16.mxu1 %v4869_v39  ;;  %2881 = vmatprep.subr.bf16.mxu0 %v4871_v40  ;;  %v1900_v39 = vld [vmem:[%s6819_s30 + $0x2b0] sm:$0xff] }
 0x8ec   : > { %v1908_v40 = vld [vmem:[%s6819_s30 + $0x2f0] sm:$0xff] }
 0x8ed   : > { %v4872_v55 = vcombine.low %v1900_v39, %v1908_v40  ;;  %v5544_v32 = vld [vmem:[%s6823_s18 + $0x30] sm:$0xff]  }
 0x8ee   : > { %2841 = vmatpush1.bf16.msra.mxu1 %v4868_v47  ;;  %2882 = vmatpush1.bf16.msra.mxu0 %v4870_v48  ;;  %v4873_v47 = vcombine.high %v1900_v39, %v1908_v40  ;;  %v4875_v48 = vcombine.high %v1901_v43, %v1909_v35  ;;  %v5545_v33 = vld [vmem:[%s6823_s18 + $0xb0] sm:$0xff]   ;;  %v5551_v39 = vld [vmem:[%s6823_s18 + $0x1c0] sm:$0xff]   ;;  %v1960_v43 = vsub.s32 3, %v6879_v41 }
 0x8ef   : > { %2842 = vmatprep.subr.bf16.mxu1 %v4885_v49  ;;  %2883 = vmatprep.subr.bf16.mxu0 %v4887_v50  ;;  %v1916_v49 = vld [vmem:[%s6819_s30 + $0x330] sm:$0xff] }
 0x8f0   : > { %v1924_v50 = vld [vmem:[%s6819_s30 + $0x370] sm:$0xff] }
 0x8f1   : > { %v4888_v8 = vcombine.low %v1916_v49, %v1924_v50  ;;  %v7186_v40 = vld [vmem:[%s6821_s2] sm:$0xff] }
 0x8f2   : > { %2843 = vmatpush1.bf16.msra.mxu1 %v4884_v59  ;;  %2884 = vmatpush1.bf16.msra.mxu0 %v4886_v62  ;;  %v4889_v59 = vcombine.high %v1916_v49, %v1924_v50  ;;  %v4891_v62 = vcombine.high %v1917_v51, %v1925_v54  ;;  %v1949_v35 = vrot.slane %v7186_v40, %v6882_v42 }
 0x8f3   : > { %2844 = vmatprep.subr.bf16.mxu1 %v4901_v0  ;;  %2885 = vmatprep.subr.bf16.mxu0 %v4903_v1  ;;  %v1932_v0 = vld [vmem:[%s6819_s30 + $0x3b0] sm:$0xff] }
 0x8f4   : > { %v1940_v1 = vld [vmem:[%s6819_s30 + $0x3f0] sm:$0xff] }
 0x8f6   : > { %2845 = vmatpush1.bf16.msra.mxu1 %v4900_v9  ;;  %2886 = vmatpush1.bf16.msra.mxu0 %v4902_v10  ;;  %v4905_v9 = vcombine.high %v1932_v0, %v1940_v1  ;;  %v4907_v10 = vcombine.high %v1933_v5, %v1941_v7 }
 0x8f7   : > { %2912 = vmatprep.subr.bf16.mxu1 %v4793_v12  ;;  %2953 = vmatprep.subr.bf16.mxu0 %v4795_v13  ;;  %v4904_v12 = vcombine.low %v1932_v0, %v1940_v1  ;;  %v4906_v13 = vcombine.low %v1933_v5, %v1941_v7 }
 0x8f9   : > { %2863 = vmatmul.mubr.bf16.vlgmr.msra.gmra.mrb[28].mxu1 %v7047_v4  ;;  %2904 = vmatmul.mubr.bf16.vlgmr.msra.gmra.mrb[16].mxu0 %v7047_v4 }
 0x8fa   : > { %2913 = vmatpush1.bf16.msra.mxu1 %v4792_v53  ;;  %2954 = vmatpush1.bf16.msra.mxu0 %v4794_v19  ;;  %v5522_v53 = vld [vmem:[%s6823_s18 + $0x48] sm:$0xff]  }
 0x8fb   : > { %2914 = vmatprep.subr.bf16.mxu1 %v4809_v20  ;;  %2955 = vmatprep.subr.bf16.mxu0 %v4811_v52  ;;  %v5523_v19 = vld [vmem:[%s6823_s18 + $0xc8] sm:$0xff]  }
 0x8fc   : > { %2944 = vmatprep.mubr.bf16.mxu1 %v6196_v14  ;;  %2985 = vmatprep.mubr.bf16.mxu0 %v6196_v14  ;;  %v4842_v14 = vcombine.low %v1869_v26, %v1877_v11  ;;  %v5524_v20 = vld [vmem:[%s6823_s18 + $0x8] sm:$0xff]   ;;  %v5537_v26 = vld [vmem:[%s6823_s18 + $0xa0] sm:$0xff]  }
 0x8fd   : > { %v5525_v52 = vld [vmem:[%s6823_s18 + $0x88] sm:$0xff]  }
 0x8fe   : > { %2915 = vmatpush1.bf16.msra.mxu1 %v4808_v23  ;;  %2956 = vmatpush1.bf16.msra.mxu0 %v4810_v63  ;;  %v5531_v23 = vld [vmem:[%s6823_s18 + $0xd8] sm:$0xff]   ;;  %v5538_v11 = vld [vmem:[%s6823_s18 + $0x68] sm:$0xff]  }
 0x8ff   : > { %2916 = vmatprep.subr.bf16.mxu1 %v4825_v3  ;;  %2957 = vmatprep.subr.bf16.mxu0 %v4827_v24  ;;  %v5532_v63 = vld [vmem:[%s6823_s18 + $0x18] sm:$0xff]   ;;  %v5534_v24 = vld [vmem:[%s6823_s18 + $0x60] sm:$0xff]  }
 0x900   : > { %v5533_v3 = vld [vmem:[%s6823_s18 + $0x98] sm:$0xff]  }
 0x902   : > { %2917 = vmatpush1.bf16.msra.mxu1 %v4824_v27  ;;  %2958 = vmatpush1.bf16.msra.mxu0 %v4826_v28  ;;  %v5539_v27 = vld [vmem:[%s6823_s18 + $0xe8] sm:$0xff]  }
 0x903   : > { %2918 = vmatprep.subr.bf16.mxu1 %v4841_v29  ;;  %2959 = vmatprep.subr.bf16.mxu0 %v4843_v30  ;;  %v5540_v28 = vld [vmem:[%s6823_s18 + $0x28] sm:$0xff]   ;;  %v5542_v30 = vld [vmem:[%s6823_s18 + $0x70] sm:$0xff]  }
 0x904   : > { %v5541_v29 = vld [vmem:[%s6823_s18 + $0xa8] sm:$0xff]  }
 0x906   : > { %2919 = vmatpush1.bf16.msra.mxu1 %v4840_v36  ;;  %2960 = vmatpush1.bf16.msra.mxu0 %v4842_v14  ;;  %v5547_v36 = vld [vmem:[%s6823_s18 + $0xf8] sm:$0xff]  }
 0x907   : > { %2920 = vmatprep.subr.bf16.mxu1 %v4857_v37  ;;  %2961 = vmatprep.subr.bf16.mxu0 %v4859_v38  ;;  %v5548_v14 = vld [vmem:[%s6823_s18 + $0x38] sm:$0xff]   ;;  %v5550_v38 = vld [vmem:[%s6823_s18 + $0x140] sm:$0xff]  }
 0x908   : > { %v5549_v37 = vld [vmem:[%s6823_s18 + $0xb8] sm:$0xff]  }
 0x90a   : > { %2921 = vmatpush1.bf16.msra.mxu1 %v4856_v45  ;;  %2962 = vmatpush1.bf16.msra.mxu0 %v4858_v46  ;;  %v1957_v45 = vrot.slane %v7186_v40, %v6901_v56  ;;  %v1953_v46 = vrot.slane %v7186_v40, %v6886_v44 }
 0x90b   : > { %2922 = vmatprep.subr.bf16.mxu1 %v4873_v47  ;;  %2963 = vmatprep.subr.bf16.mxu0 %v4875_v48  ;;  %v1961_v47 = vrot.slane %v7186_v40, %v1960_v43 }
 0x90e   : > { %2923 = vmatpush1.bf16.msra.mxu1 %v4872_v55  ;;  %2964 = vmatpush1.bf16.msra.mxu0 %v4874_v58 }
 0x90f   : > { %2924 = vmatprep.subr.bf16.mxu1 %v4889_v59  ;;  %2965 = vmatprep.subr.bf16.mxu0 %v4891_v62 }
 0x912   : > { %2925 = vmatpush1.bf16.msra.mxu1 %v4888_v8  ;;  %2966 = vmatpush1.bf16.msra.mxu0 %v4890_v60 }
 0x913   : > { %2926 = vmatprep.subr.bf16.mxu1 %v4905_v9  ;;  %2967 = vmatprep.subr.bf16.mxu0 %v4907_v10 }
 0x916   : > { %2927 = vmatpush1.bf16.msra.mxu1 %v4904_v12  ;;  %2968 = vmatpush1.bf16.msra.mxu0 %v4906_v13  ;;  %v5552_v13 = vld [vmem:[%s6823_s18 + $0x100] sm:$0xff]  }
 0x917   : > { %5086 = vmatprep.subr.bf16.mxu1 %v5518_v16  ;;  %5108 = vmatprep.subr.bf16.mxu0 %v5519_v15  ;;  %v5553_v16 = vld [vmem:[%s6823_s18 + $0x180] sm:$0xff]  }
 0x919   : > { %2945 = vmatmul.mubr.bf16.vlgmr.msra.gmra.mrb[32].mxu1 %v7047_v4  ;;  %2986 = vmatmul.mubr.bf16.vlgmr.msra.gmra.mrb[20].mxu0 %v7047_v4  ;;  %v5530_v4 = vld [vmem:[%s6823_s18 + $0x58] sm:$0xff]  }
 0x91a   : > { %5087 = vmatpush3.bf16.msra.mxu1 %v5520_v17  ;;  %5109 = vmatpush3.bf16.msra.mxu0 %v5521_v18  ;;  %v5554_v18 = vld [vmem:[%s6823_s18 + $0x148] sm:$0xff]  }
 0x91b   : > { %5088 = vmatprep.subr.bf16.mxu1 %v5522_v53  ;;  %5110 = vmatprep.subr.bf16.mxu0 %v5523_v19  ;;  %v5555_v53 = vld [vmem:[%s6823_s18 + $0x1c8] sm:$0xff]  }
 0x91c   : > { %v5556_v19 = vld [vmem:[%s6823_s18 + $0x108] sm:$0xff]  }
 0x91e   : > { %5089 = vmatpush3.bf16.msra.mxu1 %v5524_v20  ;;  %5111 = vmatpush3.bf16.msra.mxu0 %v5525_v52  ;;  %v5557_v20 = vld [vmem:[%s6823_s18 + $0x188] sm:$0xff]   ;;  %v5558_v52 = vld [vmem:[%s6823_s18 + $0x150] sm:$0xff]  }
 0x91f   : > { %5090 = vmatprep.subr.bf16.mxu1 %v5526_v21  ;;  %5112 = vmatprep.subr.bf16.mxu0 %v5527_v57  ;;  %v5559_v21 = vld [vmem:[%s6823_s18 + $0x1d0] sm:$0xff]  }
 0x920   : > { %v5560_v57 = vld [vmem:[%s6823_s18 + $0x110] sm:$0xff]  }
 0x922   : > { %5091 = vmatpush3.bf16.msra.mxu1 %v5528_v61  ;;  %5113 = vmatpush3.bf16.msra.mxu0 %v5529_v22  ;;  %v5561_v61 = vld [vmem:[%s6823_s18 + $0x190] sm:$0xff]   ;;  %v5562_v22 = vld [vmem:[%s6823_s18 + $0x158] sm:$0xff]  }
 0x923   : > { %5092 = vmatprep.subr.bf16.mxu1 %v5530_v4  ;;  %5114 = vmatprep.subr.bf16.mxu0 %v5531_v23  ;;  %v5563_v4 = vld [vmem:[%s6823_s18 + $0x1d8] sm:$0xff]  }
 0x924   : > { %v5564_v23 = vld [vmem:[%s6823_s18 + $0x118] sm:$0xff]  }
 0x926   : > { %5093 = vmatpush3.bf16.msra.mxu1 %v5532_v63  ;;  %5115 = vmatpush3.bf16.msra.mxu0 %v5533_v3  ;;  %v5565_v63 = vld [vmem:[%s6823_s18 + $0x198] sm:$0xff]   ;;  %v5566_v3 = vld [vmem:[%s6823_s18 + $0x160] sm:$0xff]  }
 0x927   : > { %5094 = vmatprep.subr.bf16.mxu1 %v5534_v24  ;;  %5116 = vmatprep.subr.bf16.mxu0 %v5535_v6  ;;  %v5567_v24 = vld [vmem:[%s6823_s18 + $0x1e0] sm:$0xff]  }
 0x928   : > { %v5568_v6 = vld [vmem:[%s6823_s18 + $0x120] sm:$0xff]  }
 0x92a   : > { %5095 = vmatpush3.bf16.msra.mxu1 %v5536_v25  ;;  %5117 = vmatpush3.bf16.msra.mxu0 %v5537_v26  ;;  %v5569_v25 = vld [vmem:[%s6823_s18 + $0x1a0] sm:$0xff]   ;;  %v5570_v26 = vld [vmem:[%s6823_s18 + $0x168] sm:$0xff]  }
 0x92b   : > { %5096 = vmatprep.subr.bf16.mxu1 %v5538_v11  ;;  %5118 = vmatprep.subr.bf16.mxu0 %v5539_v27  ;;  %v5571_v11 = vld [vmem:[%s6823_s18 + $0x1e8] sm:$0xff]   ;;  %v1964_v27 = vsub.s32 4, %v6879_v41 }
 0x92e   : > { %5097 = vmatpush3.bf16.msra.mxu1 %v5540_v28  ;;  %5119 = vmatpush3.bf16.msra.mxu0 %v5541_v29  ;;  %v1972_v28 = vsub.s32 6, %v6879_v41  ;;  %v5572_v29 = vld [vmem:[%s6823_s18 + $0x128] sm:$0xff]  }
 0x92f   : > { %5098 = vmatprep.subr.bf16.mxu1 %v5542_v30  ;;  %5120 = vmatprep.subr.bf16.mxu0 %v5543_v31  ;;  %v5573_v30 = vld [vmem:[%s6823_s18 + $0x1a8] sm:$0xff]   ;;  %v1968_v31 = vsub.s32 5, %v6879_v41 }
 0x932   : > { %5099 = vmatpush3.bf16.msra.mxu1 %v5544_v32  ;;  %5121 = vmatpush3.bf16.msra.mxu0 %v5545_v33  ;;  %v1976_v32 = vsub.s32 7, %v6879_v41  ;;  %v5574_v33 = vld [vmem:[%s6823_s18 + $0x170] sm:$0xff]  }
 0x933   : > { %5100 = vmatprep.subr.bf16.mxu1 %v5546_v34  ;;  %5122 = vmatprep.subr.bf16.mxu0 %v5547_v36  ;;  %v5575_v34 = vld [vmem:[%s6823_s18 + $0x1f0] sm:$0xff]   ;;  %v1965_v36 = vrot.slane %v7186_v40, %v1964_v27 }
 0x936   : > { %5101 = vmatpush3.bf16.msra.mxu1 %v5548_v14  ;;  %5123 = vmatpush3.bf16.msra.mxu0 %v5549_v37  ;;  %v1973_v14 = vrot.slane %v7186_v40, %v1972_v28  ;;  %v1969_v37 = vrot.slane %v7186_v40, %v1968_v31 }
 0x937   : > { %5130 = vmatprep.subr.bf16.mxu1 %v5550_v38  ;;  %5152 = vmatprep.subr.bf16.mxu0 %v5551_v39  ;;  %v1977_v38 = vrot.slane %v7186_v40, %v1976_v32  ;;  %v5576_v39 = vld [vmem:[%s6823_s18 + $0x130] sm:$0xff]  }
 0x98c   : > { %v2700_v48 = vpop.f32.mrb[20].mxu1  ;;  %v2741_v49 = vpop.f32.mrb[8].mxu0 }
 0x98d   : > { %v2701_v50 = vadd.f32 %v2700_v48, %v1949_v35  ;;  %v2742_v51 = vadd.f32 %v2741_v49, %v1957_v45  ;;  %v2702_v54 = vpop.f32.mrb[21].mxu1  ;;  %v2743_v55 = vpop.f32.mrb[9].mxu0  ;;  %v5577_v35 = vld [vmem:[%s6823_s18 + $0x1b0] sm:$0xff]   ;;  %v5578_v45 = vld [vmem:[%s6823_s18 + $0x178] sm:$0xff]  }
 0x98e   : > { %v2703_v58 = vadd.f32 %v2702_v54, %v1953_v46  ;;  %v2744_v59 = vadd.f32 %v2743_v55, %v1961_v47  ;;  %v2704_v62 = vpop.f32.mrb[22].mxu1  ;;  %v2745_v0 = vpop.f32.mrb[10].mxu0  ;;  %v5579_v46 = vld [vmem:[%s6823_s18 + $0x1f8] sm:$0xff]  }
 0x98f   : > { %v2994_v1 = vmax.f32 %v2701_v50, 0.0  ;;  %v2996_v5 = vmax.f32 %v2742_v51, 0.0  ;;  %v2705_v7 = vpop.f32.mrb[23].mxu1  ;;  %v2746_v8 = vpop.f32.mrb[11].mxu0  ;;  %v5580_v62 = vld [vmem:[%s6823_s18 + $0x138] sm:$0xff]  }
 0x990   : > { %v2995_v60 = vmax.f32 %v2703_v58, 0.0  ;;  %v2997_v9 = vmax.f32 %v2744_v59, 0.0  ;;  %v5581_v0 = vld [vmem:[%s6823_s18 + $0x1b8] sm:$0xff]  }
 0x991   : > { %v3010_v15 = vpack.c.bf16 %v2994_v1, %v2994_v1  ;;  %v3012_v17 = vpack.c.bf16 %v2996_v5, %v2996_v5 }
 0x992   : > { %v3011_v10 = vpack.c.bf16 %v2995_v60, %v2995_v60  ;;  %v3013_v12 = vpack.c.bf16 %v2997_v9, %v2997_v9  ;;  %v5582_v60 = vld [vmem:[%s6823_s18 + $0x240] sm:$0xff]  }
 0x993   : > { %v5583_v9 = vld [vmem:[%s6823_s18 + $0x2c0] sm:$0xff]  }
 0x994   : > { %4089 = vmatprep.mubr.bf16.mxu1 %v3011_v10  ;;  %4129 = vmatprep.mubr.bf16.mxu0 %v3013_v12 }
 0x995   : > { %4090 = vmatmul.mubr.bf16.vlgmr.msra.gmra.mrb[36].mxu1 %v3010_v15  ;;  %4130 = vmatmul.mubr.bf16.vlgmr.msra.gmra.mrb[24].mxu0 %v3012_v17  ;;  %v5584_v15 = vld [vmem:[%s6823_s18 + $0x200] sm:$0xff]  }
 0x996   : > { %5131 = vmatpush3.bf16.msra.mxu1 %v5552_v13  ;;  %5153 = vmatpush3.bf16.msra.mxu0 %v5553_v16  ;;  %v5585_v17 = vld [vmem:[%s6823_s18 + $0x280] sm:$0xff]  }
 0x997   : > { %5132 = vmatprep.subr.bf16.mxu1 %v5554_v18  ;;  %5154 = vmatprep.subr.bf16.mxu0 %v5555_v53 }
 0x99a   : > { %5133 = vmatpush3.bf16.msra.mxu1 %v5556_v19  ;;  %5155 = vmatpush3.bf16.msra.mxu0 %v5557_v20  ;;  %v5586_v19 = vld [vmem:[%s6823_s18 + $0x248] sm:$0xff]  }
 0x99b   : > { %5134 = vmatprep.subr.bf16.mxu1 %v5558_v52  ;;  %5156 = vmatprep.subr.bf16.mxu0 %v5559_v21  ;;  %v5587_v20 = vld [vmem:[%s6823_s18 + $0x2c8] sm:$0xff]  }
 0x99c   : > { %v5588_v52 = vld [vmem:[%s6823_s18 + $0x208] sm:$0xff]  }
 0x99d   : > { %v5589_v21 = vld [vmem:[%s6823_s18 + $0x288] sm:$0xff]  }
 0x99e   : > { %5135 = vmatpush3.bf16.msra.mxu1 %v5560_v57  ;;  %5157 = vmatpush3.bf16.msra.mxu0 %v5561_v61  ;;  %v5590_v57 = vld [vmem:[%s6823_s18 + $0x250] sm:$0xff]  }
 0x99f   : > { %5136 = vmatprep.subr.bf16.mxu1 %v5562_v22  ;;  %5158 = vmatprep.subr.bf16.mxu0 %v5563_v4  ;;  %v5591_v61 = vld [vmem:[%s6823_s18 + $0x2d0] sm:$0xff]  }
 0x9a0   : > { %v5592_v22 = vld [vmem:[%s6823_s18 + $0x210] sm:$0xff]  }
 0x9a1   : > { %v5593_v4 = vld [vmem:[%s6823_s18 + $0x290] sm:$0xff]  }
 0x9a2   : > { %5137 = vmatpush3.bf16.msra.mxu1 %v5564_v23  ;;  %5159 = vmatpush3.bf16.msra.mxu0 %v5565_v63  ;;  %v5594_v23 = vld [vmem:[%s6823_s18 + $0x258] sm:$0xff]  }
 0x9a3   : > { %5138 = vmatprep.subr.bf16.mxu1 %v5566_v3  ;;  %5160 = vmatprep.subr.bf16.mxu0 %v5567_v24  ;;  %v5595_v63 = vld [vmem:[%s6823_s18 + $0x2d8] sm:$0xff]  }
 0x9a4   : > { %v5596_v3 = vld [vmem:[%s6823_s18 + $0x218] sm:$0xff]  }
 0x9a5   : > { %v5597_v24 = vld [vmem:[%s6823_s18 + $0x298] sm:$0xff]  }
 0x9a6   : > { %5139 = vmatpush3.bf16.msra.mxu1 %v5568_v6  ;;  %5161 = vmatpush3.bf16.msra.mxu0 %v5569_v25  ;;  %v5598_v6 = vld [vmem:[%s6823_s18 + $0x260] sm:$0xff]  }
 0x9a7   : > { %5140 = vmatprep.subr.bf16.mxu1 %v5570_v26  ;;  %5162 = vmatprep.subr.bf16.mxu0 %v5571_v11  ;;  %v5599_v25 = vld [vmem:[%s6823_s18 + $0x2e0] sm:$0xff]  }
 0x9a8   : > { %v5600_v26 = vld [vmem:[%s6823_s18 + $0x220] sm:$0xff]  }
 0x9a9   : > { %v5601_v11 = vld [vmem:[%s6823_s18 + $0x2a0] sm:$0xff]  }
 0x9aa   : > { %5141 = vmatpush3.bf16.msra.mxu1 %v5572_v29  ;;  %5163 = vmatpush3.bf16.msra.mxu0 %v5573_v30  ;;  %v5602_v29 = vld [vmem:[%s6823_s18 + $0x268] sm:$0xff]  }
 0x9ab   : > { %5142 = vmatprep.subr.bf16.mxu1 %v5574_v33  ;;  %5164 = vmatprep.subr.bf16.mxu0 %v5575_v34  ;;  %v5603_v30 = vld [vmem:[%s6823_s18 + $0x2e8] sm:$0xff]  }
 0x9ac   : > { %v2782_v47 = vpop.f32.mrb[24].mxu1  ;;  %v2823_v48 = vpop.f32.mrb[12].mxu0  ;;  %v5604_v33 = vld [vmem:[%s6823_s18 + $0x228] sm:$0xff]  }
 0x9ad   : > { %v2783_v49 = vadd.f32 %v2782_v47, %v1965_v36  ;;  %v2824_v50 = vadd.f32 %v2823_v48, %v1973_v14  ;;  %v2784_v51 = vpop.f32.mrb[25].mxu1  ;;  %v2825_v54 = vpop.f32.mrb[13].mxu0  ;;  %v5605_v34 = vld [vmem:[%s6823_s18 + $0x2a8] sm:$0xff]   ;;  %v5606_v14 = vld [vmem:[%s6823_s18 + $0x270] sm:$0xff]   ;;  %v5610_v48 = vld [vmem:[%s6823_s18 + $0x278] sm:$0xff]  }
 0x9ae   : > { %v2785_v55 = vadd.f32 %v2784_v51, %v1969_v37  ;;  %v2826_v58 = vadd.f32 %v2825_v54, %v1977_v38  ;;  %v2786_v59 = vpop.f32.mrb[26].mxu1  ;;  %v2827_v40 = vpop.f32.mrb[14].mxu0  ;;  %5143 = vmatpush3.bf16.msra.mxu1 %v5576_v39  ;;  %5165 = vmatpush3.bf16.msra.mxu0 %v5577_v35  ;;  %v7269_v36 = vld [vmem:[%s6821_s2 + $0x8] sm:$0xff]  ;;  %v5607_v37 = vld [vmem:[%s6823_s18 + $0x2f0] sm:$0xff]  }
 0x9af   : > { %v2998_v1 = vmax.f32 %v2783_v49, 0.0  ;;  %v3000_v5 = vmax.f32 %v2824_v50, 0.0  ;;  %v2787_v7 = vpop.f32.mrb[27].mxu1  ;;  %v2828_v8 = vpop.f32.mrb[15].mxu0  ;;  %5144 = vmatprep.subr.bf16.mxu1 %v5578_v45  ;;  %5166 = vmatprep.subr.bf16.mxu0 %v5579_v46  ;;  %v1981_v38 = vrot.slane %v7269_v36, %v6882_v42  ;;  %v1989_v39 = vrot.slane %v7269_v36, %v6901_v56  ;;  %v5608_v46 = vld [vmem:[%s6823_s18 + $0x230] sm:$0xff]   ;;  %v5611_v42 = vld [vmem:[%s6823_s18 + $0x2f8] sm:$0xff]  }
 0x9b0   : > { %v2999_v10 = vmax.f32 %v2785_v55, 0.0  ;;  %v3001_v12 = vmax.f32 %v2826_v58, 0.0  ;;  %v1985_v35 = vrot.slane %v7269_v36, %v6886_v44  ;;  %v1993_v45 = vrot.slane %v7269_v36, %v1960_v43  ;;  %v5609_v47 = vld [vmem:[%s6823_s18 + $0x2b0] sm:$0xff]   ;;  %v5612_v40 = vld [vmem:[%s6823_s18 + $0x238] sm:$0xff]   ;;  %v5614_v8 = vld [vmem:[%s6823_s18 + $0x340] sm:$0xff]  }
 0x9b1   : > { %v3014_v18 = vpack.c.bf16 %v2998_v1, %v2998_v1  ;;  %v3016_v53 = vpack.c.bf16 %v3000_v5, %v3000_v5 }
 0x9b2   : > { %v3015_v13 = vpack.c.bf16 %v2999_v10, %v2999_v10  ;;  %v3017_v16 = vpack.c.bf16 %v3001_v12, %v3001_v12  ;;  %5145 = vmatpush3.bf16.msra.mxu1 %v5580_v62  ;;  %5167 = vmatpush3.bf16.msra.mxu0 %v5581_v0  ;;  %v5613_v62 = vld [vmem:[%s6823_s18 + $0x2b8] sm:$0xff]  }
 0x9b3   : > { %5174 = vmatprep.subr.bf16.mxu1 %v5582_v60  ;;  %5196 = vmatprep.subr.bf16.mxu0 %v5583_v9  ;;  %v5615_v60 = vld [vmem:[%s6823_s18 + $0x3c0] sm:$0xff]  }
 0x9b4   : > { %4169 = vmatprep.mubr.bf16.mxu1 %v3015_v13  ;;  %4209 = vmatprep.mubr.bf16.mxu0 %v3017_v16  ;;  %v5616_v16 = vld [vmem:[%s6823_s18 + $0x300] sm:$0xff]  }
 0x9b5   : > { %4170 = vmatmul.mubr.bf16.vlgmr.msra.gmra.mrb[40].mxu1 %v3014_v18  ;;  %4210 = vmatmul.mubr.bf16.vlgmr.msra.gmra.mrb[28].mxu0 %v3016_v53  ;;  %v5618_v53 = vld [vmem:[%s6823_s18 + $0x348] sm:$0xff]  }
 0x9b6   : > { %5175 = vmatpush3.bf16.msra.mxu1 %v5584_v15  ;;  %5197 = vmatpush3.bf16.msra.mxu0 %v5585_v17  ;;  %v5617_v15 = vld [vmem:[%s6823_s18 + $0x380] sm:$0xff]  }
 0x9b7   : > { %5176 = vmatprep.subr.bf16.mxu1 %v5586_v19  ;;  %5198 = vmatprep.subr.bf16.mxu0 %v5587_v20  ;;  %v5619_v19 = vld [vmem:[%s6823_s18 + $0x3c8] sm:$0xff]  }
 0x9b8   : > { %v5620_v20 = vld [vmem:[%s6823_s18 + $0x308] sm:$0xff]  }
 0x9ba   : > { %5177 = vmatpush3.bf16.msra.mxu1 %v5588_v52  ;;  %5199 = vmatpush3.bf16.msra.mxu0 %v5589_v21  ;;  %v5621_v52 = vld [vmem:[%s6823_s18 + $0x388] sm:$0xff]   ;;  %v5622_v21 = vld [vmem:[%s6823_s18 + $0x350] sm:$0xff]  }
 0x9bb   : > { %5178 = vmatprep.subr.bf16.mxu1 %v5590_v57  ;;  %5200 = vmatprep.subr.bf16.mxu0 %v5591_v61  ;;  %v5623_v57 = vld [vmem:[%s6823_s18 + $0x3d0] sm:$0xff]  }
 0x9bc   : > { %v5624_v61 = vld [vmem:[%s6823_s18 + $0x310] sm:$0xff]  }
 0x9be   : > { %5179 = vmatpush3.bf16.msra.mxu1 %v5592_v22  ;;  %5201 = vmatpush3.bf16.msra.mxu0 %v5593_v4  ;;  %v5625_v22 = vld [vmem:[%s6823_s18 + $0x390] sm:$0xff]   ;;  %v5626_v4 = vld [vmem:[%s6823_s18 + $0x358] sm:$0xff]  }
 0x9bf   : > { %5180 = vmatprep.subr.bf16.mxu1 %v5594_v23  ;;  %5202 = vmatprep.subr.bf16.mxu0 %v5595_v63  ;;  %v5627_v23 = vld [vmem:[%s6823_s18 + $0x3d8] sm:$0xff]  }
 0x9c0   : > { %v5628_v63 = vld [vmem:[%s6823_s18 + $0x318] sm:$0xff]  }
 0x9c2   : > { %5181 = vmatpush3.bf16.msra.mxu1 %v5596_v3  ;;  %5203 = vmatpush3.bf16.msra.mxu0 %v5597_v24  ;;  %v5629_v3 = vld [vmem:[%s6823_s18 + $0x398] sm:$0xff]   ;;  %v5630_v24 = vld [vmem:[%s6823_s18 + $0x360] sm:$0xff]  }
 0x9c3   : > { %5182 = vmatprep.subr.bf16.mxu1 %v5598_v6  ;;  %5204 = vmatprep.subr.bf16.mxu0 %v5599_v25  ;;  %v5631_v6 = vld [vmem:[%s6823_s18 + $0x3e0] sm:$0xff]  }
 0x9c4   : > { %v5632_v25 = vld [vmem:[%s6823_s18 + $0x320] sm:$0xff]  }
 0x9c6   : > { %5183 = vmatpush3.bf16.msra.mxu1 %v5600_v26  ;;  %5205 = vmatpush3.bf16.msra.mxu0 %v5601_v11  ;;  %v5633_v26 = vld [vmem:[%s6823_s18 + $0x3a0] sm:$0xff]   ;;  %v5634_v11 = vld [vmem:[%s6823_s18 + $0x368] sm:$0xff]  }
 0x9c7   : > { %5184 = vmatprep.subr.bf16.mxu1 %v5602_v29  ;;  %5206 = vmatprep.subr.bf16.mxu0 %v5603_v30  ;;  %v5635_v29 = vld [vmem:[%s6823_s18 + $0x3e8] sm:$0xff]  }
 0x9c8   : > { %v5636_v30 = vld [vmem:[%s6823_s18 + $0x328] sm:$0xff]  }
 0x9ca   : > { %5185 = vmatpush3.bf16.msra.mxu1 %v5604_v33  ;;  %5207 = vmatpush3.bf16.msra.mxu0 %v5605_v34  ;;  %v5637_v33 = vld [vmem:[%s6823_s18 + $0x3a8] sm:$0xff]   ;;  %v5638_v34 = vld [vmem:[%s6823_s18 + $0x370] sm:$0xff]  }
 0x9cb   : > { %5186 = vmatprep.subr.bf16.mxu1 %v5606_v14  ;;  %5208 = vmatprep.subr.bf16.mxu0 %v5607_v37  ;;  %v5639_v14 = vld [vmem:[%s6823_s18 + $0x3f0] sm:$0xff]   ;;  %v1997_v37 = vrot.slane %v7269_v36, %v1964_v27  ;;  %v5642_v27 = vld [vmem:[%s6823_s18 + $0x378] sm:$0xff]  }
 0x9cc   : > { %v2864_v49 = vpop.f32.mrb[28].mxu1  ;;  %v2905_v50 = vpop.f32.mrb[16].mxu0 }
 0x9cd   : > { %v2865_v56 = vadd.f32 %v2864_v49, %v1981_v38  ;;  %v2906_v51 = vadd.f32 %v2905_v50, %v1989_v39  ;;  %v2866_v54 = vpop.f32.mrb[29].mxu1  ;;  %v2907_v55 = vpop.f32.mrb[17].mxu0  ;;  %v2005_v38 = vrot.slane %v7269_v36, %v1972_v28  ;;  %v2001_v39 = vrot.slane %v7269_v36, %v1968_v31 }
 0x9ce   : > { %v2867_v44 = vadd.f32 %v2866_v54, %v1985_v35  ;;  %v2908_v58 = vadd.f32 %v2907_v55, %v1993_v45  ;;  %v2868_v59 = vpop.f32.mrb[30].mxu1  ;;  %v2909_v43 = vpop.f32.mrb[18].mxu0  ;;  %5187 = vmatpush3.bf16.msra.mxu1 %v5608_v46  ;;  %5209 = vmatpush3.bf16.msra.mxu0 %v5609_v47  ;;  %v2009_v35 = vrot.slane %v7269_v36, %v1976_v32  ;;  %v5640_v45 = vld [vmem:[%s6823_s18 + $0x330] sm:$0xff]   ;;  %v5643_v47 = vld [vmem:[%s6823_s18 + $0x3f8] sm:$0xff]  }
 0x9cf   : > { %v3002_v0 = vmax.f32 %v2865_v56, 0.0  ;;  %v3004_v1 = vmax.f32 %v2906_v51, 0.0  ;;  %v2869_v5 = vpop.f32.mrb[31].mxu1  ;;  %v2910_v7 = vpop.f32.mrb[19].mxu0  ;;  %5188 = vmatprep.subr.bf16.mxu1 %v5610_v48  ;;  %5210 = vmatprep.subr.bf16.mxu0 %v5611_v42  ;;  %v5641_v46 = vld [vmem:[%s6823_s18 + $0x3b0] sm:$0xff]   ;;  %v5644_v32 = vld [vmem:[%s6823_s18 + $0x338] sm:$0xff]  }
 0x9d0   : > { %v3003_v9 = vmax.f32 %v2867_v44, 0.0  ;;  %v3005_v10 = vmax.f32 %v2908_v58, 0.0  ;;  %v5645_v36 = vld [vmem:[%s6823_s18 + $0x3b8] sm:$0xff]  }
 0x9d1   : > { %v3018_v17 = vpack.c.bf16 %v3002_v0, %v3002_v0  ;;  %v3020_v18 = vpack.c.bf16 %v3004_v1, %v3004_v1 }
 0x9d2   : > { %v3019_v12 = vpack.c.bf16 %v3003_v9, %v3003_v9  ;;  %v3021_v13 = vpack.c.bf16 %v3005_v10, %v3005_v10  ;;  %5189 = vmatpush3.bf16.msra.mxu1 %v5612_v40  ;;  %5211 = vmatpush3.bf16.msra.mxu0 %v5613_v62 }
 0x9d3   : > { %5218 = vmatprep.subr.bf16.mxu1 %v5614_v8  ;;  %5240 = vmatprep.subr.bf16.mxu0 %v5615_v60  ;;  %v4908_v60 = vld [vmem:[%s870_s3] ss:$0 sm:$0xff] }
 0x9d4   : > { %4249 = vmatprep.mubr.bf16.mxu1 %v3019_v12  ;;  %4289 = vmatprep.mubr.bf16.mxu0 %v3021_v13 }
 0x9d5   : > { %4250 = vmatmul.mubr.bf16.vlgmr.msra.gmra.mrb[44].mxu1 %v3018_v17  ;;  %4290 = vmatmul.mubr.bf16.vlgmr.msra.gmra.mrb[32].mxu0 %v3020_v18 }
 0x9d6   : > { %5219 = vmatpush3.bf16.msra.mxu1 %v5616_v16  ;;  %5241 = vmatpush3.bf16.msra.mxu0 %v5617_v15 }
 0x9d7   : > { %5220 = vmatprep.subr.bf16.mxu1 %v5618_v53  ;;  %5242 = vmatprep.subr.bf16.mxu0 %v5619_v19 }
 0x9da   : > { %5221 = vmatpush3.bf16.msra.mxu1 %v5620_v20  ;;  %5243 = vmatpush3.bf16.msra.mxu0 %v5621_v52 }
 0x9db   : > { %5222 = vmatprep.subr.bf16.mxu1 %v5622_v21  ;;  %5244 = vmatprep.subr.bf16.mxu0 %v5623_v57 }
 0x9de   : > { %5223 = vmatpush3.bf16.msra.mxu1 %v5624_v61  ;;  %5245 = vmatpush3.bf16.msra.mxu0 %v5625_v22 }
 0x9df   : > { %5224 = vmatprep.subr.bf16.mxu1 %v5626_v4  ;;  %5246 = vmatprep.subr.bf16.mxu0 %v5627_v23 }
 0x9e2   : > { %5225 = vmatpush3.bf16.msra.mxu1 %v5628_v63  ;;  %5247 = vmatpush3.bf16.msra.mxu0 %v5629_v3 }
 0x9e3   : > { %5226 = vmatprep.subr.bf16.mxu1 %v5630_v24  ;;  %5248 = vmatprep.subr.bf16.mxu0 %v5631_v6 }
 0x9e6   : > { %5227 = vmatpush3.bf16.msra.mxu1 %v5632_v25  ;;  %5249 = vmatpush3.bf16.msra.mxu0 %v5633_v26 }
 0x9e7   : > { %5228 = vmatprep.subr.bf16.mxu1 %v5634_v11  ;;  %5250 = vmatprep.subr.bf16.mxu0 %v5635_v29 }
 0x9ea   : > { %5229 = vmatpush3.bf16.msra.mxu1 %v5636_v30  ;;  %5251 = vmatpush3.bf16.msra.mxu0 %v5637_v33 }
 0x9eb   : > { %5230 = vmatprep.subr.bf16.mxu1 %v5638_v34  ;;  %5252 = vmatprep.subr.bf16.mxu0 %v5639_v14 }
 0x9ec   : > { %v2946_v48 = vpop.f32.mrb[32].mxu1  ;;  %v2987_v28 = vpop.f32.mrb[20].mxu0 }
 0x9ed   : > { %v2947_v42 = vadd.f32 %v2946_v48, %v1997_v37  ;;  %v2988_v49 = vadd.f32 %v2987_v28, %v2005_v38  ;;  %v2948_v50 = vpop.f32.mrb[33].mxu1  ;;  %v2989_v56 = vpop.f32.mrb[21].mxu0 }
 0x9ee   : > { %v2949_v51 = vadd.f32 %v2948_v50, %v2001_v39  ;;  %v2990_v31 = vadd.f32 %v2989_v56, %v2009_v35  ;;  %v2950_v54 = vpop.f32.mrb[34].mxu1  ;;  %v2991_v41 = vpop.f32.mrb[22].mxu0  ;;  %5231 = vmatpush3.bf16.msra.mxu1 %v5640_v45  ;;  %5253 = vmatpush3.bf16.msra.mxu0 %v5641_v46 }
 0x9ef   : > { %v3006_v55 = vmax.f32 %v2947_v42, 0.0  ;;  %v3008_v44 = vmax.f32 %v2988_v49, 0.0  ;;  %v2951_v58 = vpop.f32.mrb[35].mxu1  ;;  %v2992_v59 = vpop.f32.mrb[23].mxu0  ;;  %5232 = vmatprep.subr.bf16.mxu1 %v5642_v27  ;;  %5254 = vmatprep.subr.bf16.mxu0 %v5643_v47 }
 0x9f0   : > { %v3007_v43 = vmax.f32 %v2949_v51, 0.0  ;;  %v3009_v40 = vmax.f32 %v2990_v31, 0.0 }
 0x9f1   : > { %v3022_v1 = vpack.c.bf16 %v3006_v55, %v3006_v55  ;;  %v3024_v5 = vpack.c.bf16 %v3008_v44, %v3008_v44 }
 0x9f2   : > { %v3023_v62 = vpack.c.bf16 %v3007_v43, %v3007_v43  ;;  %v3025_v0 = vpack.c.bf16 %v3009_v40, %v3009_v40  ;;  %5233 = vmatpush3.bf16.msra.mxu1 %v5644_v32  ;;  %5255 = vmatpush3.bf16.msra.mxu0 %v5645_v36  ;;  %v5037_v40 = vld [vmem:[%s878_s20] ss:$0 sm:$0xff] }
 0x9f4   : > { %4329 = vmatprep.mubr.bf16.mxu1 %v3023_v62  ;;  %4369 = vmatprep.mubr.bf16.mxu0 %v3025_v0  ;;  %v5038_v0 = vld [vmem:[%s886_s25] ss:$0 sm:$0xff] }
 0x9f5   : > { %4330 = vmatmul.mubr.bf16.vlgmr.msra.gmra.mrb[48].mxu1 %v3022_v1  ;;  %4370 = vmatmul.mubr.bf16.vlgmr.msra.gmra.mrb[36].mxu0 %v3024_v5 }
 0xa68   : > { %v5102_v7 = vpop.f32.mrb[36].mxu1  ;;  %v5124_v8 = vpop.f32.mrb[24].mxu0 }
 0xa69   : > { %v5103_v9 = vpop.f32.mrb[37].mxu1  ;;  %v5125_v10 = vpop.f32.mrb[25].mxu0 }
 0xa6a   : > { %v5104_v12 = vadd.f32 %v5103_v9, %v5102_v7  ;;  %v5126_v13 = vadd.f32 %v5125_v10, %v5124_v8  ;;  %v5105_v16 = vpop.f32.mrb[38].mxu1  ;;  %v5127_v15 = vpop.f32.mrb[26].mxu0  ;;  %v5041_v8 = vld [vmem:[#allocation3] ss:$0 sm:$0xff] (!%p5039_p12) }
 0xa6b   : > { %v5106_v17 = vpop.f32.mrb[39].mxu1  ;;  %v5128_v18 = vpop.f32.mrb[27].mxu0 }
 0xa6c   : > { %v4092_v53 = vadd.f32 %v5104_v12, %v4908_v60 }
 0xa6e   : > { %v4132_v19 = vadd.f32 %v5126_v13, %v4092_v53 }
 0xa88   : > { %v5146_v20 = vpop.f32.mrb[40].mxu1  ;;  %v5168_v52 = vpop.f32.mrb[28].mxu0 }
 0xa89   : > { %v5147_v21 = vpop.f32.mrb[41].mxu1  ;;  %v5169_v57 = vpop.f32.mrb[29].mxu0 }
 0xa8a   : > { %v5148_v61 = vadd.f32 %v5147_v21, %v5146_v20  ;;  %v5170_v22 = vadd.f32 %v5169_v57, %v5168_v52  ;;  %v5149_v4 = vpop.f32.mrb[42].mxu1  ;;  %v5171_v23 = vpop.f32.mrb[30].mxu0 }
 0xa8b   : > { %v5150_v63 = vpop.f32.mrb[43].mxu1  ;;  %v5172_v3 = vpop.f32.mrb[31].mxu0 }
 0xa8c   : > { %v4172_v24 = vadd.f32 %v5148_v61, %v4132_v19 }
 0xa8e   : > { %v4212_v6 = vadd.f32 %v5170_v22, %v4172_v24 }
 0xaa8   : > { %v5190_v25 = vpop.f32.mrb[44].mxu1  ;;  %v5212_v26 = vpop.f32.mrb[32].mxu0 }
 0xaa9   : > { %v5191_v11 = vpop.f32.mrb[45].mxu1  ;;  %v5213_v29 = vpop.f32.mrb[33].mxu0 }
 0xaaa   : > { %v5192_v30 = vadd.f32 %v5191_v11, %v5190_v25  ;;  %v5214_v33 = vadd.f32 %v5213_v29, %v5212_v26  ;;  %v5193_v34 = vpop.f32.mrb[46].mxu1  ;;  %v5215_v14 = vpop.f32.mrb[34].mxu0 }
 0xaab   : > { %v5194_v37 = vpop.f32.mrb[47].mxu1  ;;  %v5216_v38 = vpop.f32.mrb[35].mxu0 }
 0xaac   : > { %v4252_v39 = vadd.f32 %v5192_v30, %v4212_v6 }
 0xaae   : > { %v4292_v35 = vadd.f32 %v5214_v33, %v4252_v39 }
 0xac8   : > { %v5234_v45 = vpop.f32.mrb[48].mxu1  ;;  %v5256_v46 = vpop.f32.mrb[36].mxu0 }
 0xac9   : > { %v5235_v27 = vpop.f32.mrb[49].mxu1  ;;  %v5257_v47 = vpop.f32.mrb[37].mxu0 }
 0xaca   : > { %v5236_v48 = vadd.f32 %v5235_v27, %v5234_v45  ;;  %v5258_v28 = vadd.f32 %v5257_v47, %v5256_v46  ;;  %v5237_v42 = vpop.f32.mrb[50].mxu1  ;;  %v5259_v49 = vpop.f32.mrb[38].mxu0 }
 0xacb   : > { %v5238_v50 = vpop.f32.mrb[51].mxu1  ;;  %v5260_v56 = vpop.f32.mrb[39].mxu0 }
 0xacc   : > { %v4332_v51 = vadd.f32 %v5236_v48, %v4292_v35 }
 0xace   : > { %v4372_v31 = vadd.f32 %v5258_v28, %v4332_v51 }
 0xad0   : > { %v4377_v54 = vadd.f32 %v4372_v31, %v7043_v2  ;;  %v5040_v2 = vld [vmem:[#allocation20] ss:$0 sm:$0xff] (!%p5039_p12) }
 0xad2   : > { %4380 = vadd.xlane.f32.xlu0 %v4377_v54 }
 0xb5f   : > { %v4381_v41 = vpop.xlane.xlu0 %4380 }
 0xb60   : > { %v4382_v32 = vmul.f32 0.0078125, %v4381_v41 }
 0xb62   : > { %v4383_v36 = vsub.f32 %v4377_v54, %v4382_v32 }
 0xb64   : > { %v4384_v55 = vmul.f32 %v4383_v36, %v4383_v36 }
 0xb66   : > { %4385 = vadd.xlane.f32.xlu1 %v4384_v55 }
 0xbf3   : > { %v4386_v44 = vpop.xlane.xlu1 %4385 }
 0xbf4   : > { %v4387_v58 = vmul.f32 0.0078125, %v4386_v44 }
 0xbf6   : > { %v4388_v59 = vadd.f32 1e-05, %v4387_v58 }
 0xbf8   : > { %5680 = vrsqrt.f32 %v4388_v59 }
 0xc02   : > { %v5681_v43 = vpop.eup %5680 }
 0xc03   : > { %v4390_v62 = vmul.f32 %v5681_v43, %v4383_v36  ;;  %4409 = sbr.rel (%p5039_p12) target bundleno = 3228 (0xc9c), region = 160 }
 0xc05   : > { %v4397_v1 = vmul.f32 %v5037_v40, %v4390_v62 }
 0xc07   : > { %v4404_v5 = vadd.f32 %v5038_v0, %v4397_v1 }
 0xc09   : > { %4405 = vst [vmem:[#allocation2] sm:$0xff] %v4404_v5  ;;  %v4417_v7 = vmul.f32 (!%p5039_p12), %v5040_v2, %v4404_v5 }
 0xc0b   : > { %4418 = vadd.xlane.f32.xlu0 %v4417_v7 }
 0xc98   : > { %v4419_v60 = vpop.xlane.xlu0 %4418 }
 0xc99   : > { %v4427_v9 = vadd.f32 %v5041_v8, %v4419_v60 }
 0xc9b   : > { %4429 = vst.msk [vmem:[%s7469_s27] sm:$0xff] %vm4428_vm5, %v4427_v9 }
 0xc9c PF: > { %s7470_s19 = sld [smem:[#allocation28_spill]]  ;;  %s7471_s29 = sld [smem:[#allocation25_spill]] }
 0xc9d   : > { %s7472_s30 = sld [smem:[#allocation26_spill]]  ;;  %s7473_s0 = sld [smem:[#allocation29_spill]] }
 0xca2   : > { %p29_p8 = scmp.ge.s32.totalorder %s7470_s19, 8  }
 0xca4   :  { %31 = sbr.rel (!%p29_p8) target bundleno = 14 (0xe), region = 268 }
 0xcab   :  { %4441 = vsyncpa [#allocation5], 1 }
 0xcac   :  { %4443 = vsyncpa [#allocation5 + $0x1], 1 }
 0xcad   :  { %4444 = vsyncpa [#allocation7], 1 }

</bundles_post_ra>
